<compile_context>
chip_gen: v6e
topology: v6e:2x2x1
jax: 0.10.0
libtpu: 0.0.40
codegen_flags: <defaults>
</compile_context>

<pallas_src>
import functools

import jax
import jax.numpy as jnp
from jax.experimental import pallas as pl
from jax.experimental.pallas import tpu as pltpu

D = 128    # input / output feature dim (lane axis)
H = 256    # hidden dim

_DESIRED_TILE_M = 1024   # 512-2048 band amortizes ~0.35 us per-grid-step overhead


def _model_wrapper_kernel(x_ref, w1_ref, b1_ref, w2_ref, b2_ref, o_ref, *,
                          elem_dtype):
    # pre_transform: log1p (bf16 EUP on v6e/v7x, f32 on v5e).
    x = jnp.log1p(x_ref[...].astype(elem_dtype))

    # _model: 2-layer MLP with GELU; bf16 MXU operands, f32 accumulation.
    h = jnp.dot(x.astype(jnp.bfloat16), w1_ref[...],
                preferred_element_type=jnp.float32)
    h = jax.nn.gelu(h.astype(elem_dtype) + b1_ref[...])   # tanh approx -> EUP
    y = jnp.dot(h.astype(jnp.bfloat16), w2_ref[...],
                preferred_element_type=jnp.float32)
    y = y.astype(elem_dtype) + b2_ref[...]

    # post_transform: softplus.
    o_ref[...] = jax.nn.softplus(y).astype(o_ref.dtype)


def _default_elem_dtype():
    # v6e / v7x VPU+EUP have a bf16 path (~2x transcendental throughput);
    # v5e and older do not, so keep elementwise math in f32 there.
    try:
        kind = jax.devices()[0].device_kind.lower()
    except Exception:
        kind = ""
    if ("v6" in kind) or ("v7" in kind):
        return jnp.bfloat16
    return jnp.float32


def _pick_tile_m(b):
    # Size the tile to amortize per-step overhead (NOT to match MXU height),
    # but keep the grid at >= 2 steps so both v7x TensorCores get work.
    if b <= 16:
        return b                                   # single full-extent block
    half = ((pl.cdiv(b, 2) + 7) // 8) * 8          # round up to x8 sublanes
    return max(8, min(_DESIRED_TILE_M, half))


def model_wrapper_forward(x, w1, b1, w2, b2, *, tile_m=None, elem_dtype=None):
    b, d = x.shape
    hdim = w1.shape[1]
    if tile_m is None:
        tile_m = _pick_tile_m(b)
    if elem_dtype is None:
        elem_dtype = _default_elem_dtype()

    # Weights as bf16 MXU operands (no-op if already stored that way);
    # biases in the elementwise dtype so no per-tile casts are needed.
    w1 = w1.astype(jnp.bfloat16)
    w2 = w2.astype(jnp.bfloat16)
    b1 = b1.reshape(1, hdim).astype(elem_dtype)
    b2 = b2.reshape(1, d).astype(elem_dtype)

    kernel = functools.partial(_model_wrapper_kernel, elem_dtype=elem_dtype)

    # No pad / slice: ragged last block is masked by Pallas (reads padded,
    # out-of-range rows of the write are dropped).
    return pl.pallas_call(
        kernel,
        out_shape=jax.ShapeDtypeStruct((b, d), jnp.float32),
        grid=(pl.cdiv(b, tile_m),),
        in_specs=[
            pl.BlockSpec((tile_m, d), lambda i: (i, 0)),   # x: batch-tiled
            pl.BlockSpec((d, hdim), lambda i: (0, 0)),     # w1: VMEM-resident
            pl.BlockSpec((1, hdim), lambda i: (0, 0)),     # b1: VMEM-resident
            pl.BlockSpec((hdim, d), lambda i: (0, 0)),     # w2: VMEM-resident
            pl.BlockSpec((1, d), lambda i: (0, 0)),        # b2: VMEM-resident
        ],
        out_specs=pl.BlockSpec((tile_m, d), lambda i: (i, 0)),
        compiler_params=pltpu.CompilerParams(
            dimension_semantics=("parallel",)),
    )(x, w1, b1, w2, b2)


def _reference(x, w1, b1, w2, b2):
    x = jnp.log1p(x)
    h = jax.nn.gelu(x @ w1 + b1)
    y = h @ w2 + b2
    return jax.nn.softplus(y)


if __name__ == "__main__":
    key = jax.random.PRNGKey(0)
    k_x, k_w1, k_b1, k_w2, k_b2 = jax.random.split(key, 5)

    # Ragged on purpose: exercises the masked last block (no pad / no slice).
    B = 1000

    # Poisson-like nonnegative counts as input (so log1p makes sense),
    # streamed as bf16 (small integer counts are exact in bf16).
    x = jax.random.poisson(k_x, lam=3.0, shape=(B, D)).astype(jnp.bfloat16)

    # Deterministic parameter init; weights stored bf16 in HBM (cast once).
    w1 = (jax.random.normal(k_w1, (D, H), jnp.float32)
          * (1.0 / D) ** 0.5).astype(jnp.bfloat16)
    b1 = jax.random.normal(k_b1, (1, H), jnp.float32) * 0.01
    w2 = (jax.random.normal(k_w2, (H, D), jnp.float32)
          * (1.0 / H) ** 0.5).astype(jnp.bfloat16)
    b2 = jax.random.normal(k_b2, (1, D), jnp.float32) * 0.01

    out = jax.block_until_ready(model_wrapper_forward(x, w1, b1, w2, b2))

    # f32 reference against the same (bf16-stored) weights; tolerance covers
    # the bf16 MXU operands plus the bf16 elementwise path on v6e/v7x.
    ref = _reference(x.astype(jnp.float32), w1.astype(jnp.float32), b1,
                     w2.astype(jnp.float32), b2)
    assert out.shape == (B, D)
    err = float(jnp.max(jnp.abs(out - ref)))
    assert jnp.allclose(out, ref, atol=1e-1, rtol=1e-1), err

    print("KERNEL_OK")
</pallas_src>

<mosaic_0001>
module attributes {stable_mosaic.version = 11 : i64} {
  func.func @_model_wrapper_kernel(%arg0: i32, %arg1: memref<504x128xbf16, #tpu.memory_space<vmem>>, %arg2: memref<128x256xbf16, #tpu.memory_space<vmem>>, %arg3: memref<1x256xf32, #tpu.memory_space<vmem>>, %arg4: memref<256x128xbf16, #tpu.memory_space<vmem>>, %arg5: memref<1x128xf32, #tpu.memory_space<vmem>>, %arg6: memref<504x128xf32, #tpu.memory_space<vmem>>) attributes {dimension_semantics = [#tpu.dimension_semantics<parallel>], iteration_bounds = array<i64: 2>, scalar_prefetch = 0 : i64, scratch_operands = 0 : i64, tpu.core_type = #tpu.core_type<tc>, window_params = [{transform_indices = @transform_0, window_bounds = array<i64: 504, 128>}, {pipeline_mode = #tpu.pipeline_mode<synchronous>, transform_indices = @transform_1, window_bounds = array<i64: 128, 256>}, {pipeline_mode = #tpu.pipeline_mode<synchronous>, transform_indices = @transform_2, window_bounds = array<i64: 1, 256>}, {pipeline_mode = #tpu.pipeline_mode<synchronous>, transform_indices = @transform_3, window_bounds = array<i64: 256, 128>}, {pipeline_mode = #tpu.pipeline_mode<synchronous>, transform_indices = @transform_4, window_bounds = array<i64: 1, 128>}, {transform_indices = @transform_5, window_bounds = array<i64: 504, 128>}]} {
    %c0 = arith.constant 0 : index
    %c0_0 = arith.constant 0 : index
    %0 = vector.load %arg1[%c0, %c0_0] : memref<504x128xbf16, #tpu.memory_space<vmem>>, vector<504x128xbf16>
    %1 = arith.extf %0 : vector<504x128xbf16> to vector<504x128xf32>
    %2 = math.log1p %1 : vector<504x128xf32>
    %3 = arith.truncf %2 : vector<504x128xf32> to vector<504x128xbf16>
    %c0_1 = arith.constant 0 : index
    %c0_2 = arith.constant 0 : index
    %4 = vector.load %arg2[%c0_1, %c0_2] : memref<128x256xbf16, #tpu.memory_space<vmem>>, vector<128x256xbf16>
    %cst = arith.constant dense<0.000000e+00> : vector<504x256xf32>
    %5 = tpu.matmul %3, %4, %cst {dimension_numbers = #tpu.dot_dimension_numbers<[1], [0], [0], [1], [0, 0, 1, 1], [], []>} : vector<504x128xbf16>, vector<128x256xbf16>, vector<504x256xf32> -> vector<504x256xf32>
    %c0_3 = arith.constant 0 : index
    %c0_4 = arith.constant 0 : index
    %6 = vector.load %arg3[%c0_3, %c0_4] : memref<1x256xf32, #tpu.memory_space<vmem>>, vector<1x256xf32>
    %7 = vector.broadcast %6 : vector<1x256xf32> to vector<504x256xf32>
    %8 = arith.addf %5, %7 : vector<504x256xf32>
    %9 = arith.mulf %8, %8 : vector<504x256xf32>
    %10 = arith.mulf %8, %9 : vector<504x256xf32>
    %cst_5 = arith.constant 4.471500e-02 : f32
    %11 = vector.broadcast %cst_5 : f32 to vector<504x256xf32>
    %12 = arith.mulf %11, %10 : vector<504x256xf32>
    %13 = arith.addf %8, %12 : vector<504x256xf32>
    %cst_6 = arith.constant 0.797884583 : f32
    %14 = vector.broadcast %cst_6 : f32 to vector<504x256xf32>
    %15 = arith.mulf %14, %13 : vector<504x256xf32>
    %16 = math.tanh %15 : vector<504x256xf32>
    %cst_7 = arith.constant 1.000000e+00 : f32
    %17 = vector.broadcast %cst_7 : f32 to vector<504x256xf32>
    %18 = arith.addf %17, %16 : vector<504x256xf32>
    %cst_8 = arith.constant 5.000000e-01 : f32
    %19 = vector.broadcast %cst_8 : f32 to vector<504x256xf32>
    %20 = arith.mulf %19, %18 : vector<504x256xf32>
    %21 = arith.mulf %8, %20 : vector<504x256xf32>
    %22 = arith.truncf %21 : vector<504x256xf32> to vector<504x256xbf16>
    %c0_9 = arith.constant 0 : index
    %c0_10 = arith.constant 0 : index
    %23 = vector.load %arg4[%c0_9, %c0_10] : memref<256x128xbf16, #tpu.memory_space<vmem>>, vector<256x128xbf16>
    %cst_11 = arith.constant dense<0.000000e+00> : vector<504x128xf32>
    %24 = tpu.matmul %22, %23, %cst_11 {dimension_numbers = #tpu.dot_dimension_numbers<[1], [0], [0], [1], [0, 0, 1, 1], [], []>} : vector<504x256xbf16>, vector<256x128xbf16>, vector<504x128xf32> -> vector<504x128xf32>
    %c0_12 = arith.constant 0 : index
    %c0_13 = arith.constant 0 : index
    %25 = vector.load %arg5[%c0_12, %c0_13] : memref<1x128xf32, #tpu.memory_space<vmem>>, vector<1x128xf32>
    %26 = vector.broadcast %25 : vector<1x128xf32> to vector<504x128xf32>
    %27 = arith.addf %24, %26 : vector<504x128xf32>
    %cst_14 = arith.constant 0.000000e+00 : f32
    %28 = vector.broadcast %cst_14 : f32 to vector<504x128xf32>
    %29 = arith.maximumf %27, %28 : vector<504x128xf32>
    %30 = vector.broadcast %cst_14 : f32 to vector<504x128xf32>
    %31 = arith.subf %27, %30 : vector<504x128xf32>
    %32 = arith.cmpf one, %31, %31 : vector<504x128xf32>
    %33 = vector.broadcast %cst_14 : f32 to vector<504x128xf32>
    %34 = arith.addf %27, %33 : vector<504x128xf32>
    %35 = math.absf %31 : vector<504x128xf32>
    %cst_15 = arith.constant 0.000000e+00 : f32
    %36 = vector.broadcast %cst_15 : f32 to vector<504x128xf32>
    %37 = arith.subf %36, %35 : vector<504x128xf32>
    %38 = math.exp %37 : vector<504x128xf32>
    %39 = math.log1p %38 : vector<504x128xf32>
    %40 = arith.addf %29, %39 : vector<504x128xf32>
    %41 = arith.select %32, %34, %40 : vector<504x128xi1>, vector<504x128xf32>
    %c0_16 = arith.constant 0 : index
    %c0_17 = arith.constant 0 : index
    %42 = vector.load %arg6[%c0_16, %c0_17] : memref<504x128xf32, #tpu.memory_space<vmem>>, vector<504x128xf32>
    tpu.vector_store %arg6[%c0_16, %c0_17], %41 {strides = array<i32>} : memref<504x128xf32, #tpu.memory_space<vmem>>, vector<504x128xf32>,
    return
  }
  func.func @transform_0(%arg0: i32) -> (i32, i32) {
    %c0_i32 = arith.constant 0 : i32
    %c0_i32_0 = arith.constant 0 : i32
    return %arg0, %c0_i32 : i32, i32
  }
  func.func @transform_1(%arg0: i32) -> (i32, i32) {
    %c0_i32 = arith.constant 0 : i32
    %c0_i32_0 = arith.constant 0 : i32
    %c0_i32_1 = arith.constant 0 : i32
    return %c0_i32, %c0_i32_0 : i32, i32
  }
  func.func @transform_2(%arg0: i32) -> (i32, i32) {
    %c0_i32 = arith.constant 0 : i32
    %c0_i32_0 = arith.constant 0 : i32
    %c0_i32_1 = arith.constant 0 : i32
    return %c0_i32, %c0_i32_0 : i32, i32
  }
  func.func @transform_3(%arg0: i32) -> (i32, i32) {
    %c0_i32 = arith.constant 0 : i32
    %c0_i32_0 = arith.constant 0 : i32
    %c0_i32_1 = arith.constant 0 : i32
    return %c0_i32, %c0_i32_0 : i32, i32
  }
  func.func @transform_4(%arg0: i32) -> (i32, i32) {
    %c0_i32 = arith.constant 0 : i32
    %c0_i32_0 = arith.constant 0 : i32
    %c0_i32_1 = arith.constant 0 : i32
    return %c0_i32, %c0_i32_0 : i32, i32
  }
  func.func @transform_5(%arg0: i32) -> (i32, i32) {
    %c0_i32 = arith.constant 0 : i32
    %c0_i32_0 = arith.constant 0 : i32
    return %arg0, %c0_i32 : i32, i32
  }
}

</mosaic_0001>

<bundles_post_ra>
// kernel: tpu_custom_call.1
= control target key start
LH: loop header
LB: loop body
LE: loop exit
PB: predicated region body
PF: predicated region fallthrough
CT: control target
= control target key end

     0   :  { %10 = vsyncpa [#allocation3], 0  ;;  %s9744_s0 = inlined_call_operand.hbm [shape: bf16[1000,128], index: 0, kind: input, shape index: {}]   ;;  %s9745_s1 = inlined_call_operand.hbm [shape: bf16[128,256], index: 1, kind: input, shape index: {}]   ;;  %s9746_s2 = inlined_call_operand.vmem [shape: f32[1,256], index: 2, kind: input, shape index: {}]   ;;  %s9747_s3 = inlined_call_operand.hbm [shape: bf16[256,128], index: 3, kind: input, shape index: {}]   ;;  %s9748_s4 = inlined_call_operand.vmem [shape: f32[1,128], index: 4, kind: input, shape index: {}]   ;;  %s9749_s5 = inlined_call_operand.hbm [shape: f32[1000,128], index: 5, kind: output, shape index: {}]  }
   0x1   :  { %12 = vsyncpa [#allocation3 + $0x1], 0 }
   0x2   :  { %13 = vsyncpa [#allocation6], 0 }
   0x3   :  { %14 = vsyncpa [#allocation4], 0 }
   0x4   :  { %16 = vsyncpa [#allocation4 + $0x1], 0  ;;  %s5579_s18 = smov 0   ;;  %s5581_s19 = smov 0  }
   0x5   :  { %s5583_s20 = smov 0   ;;  %s5585_s21 = smov 0  }
   0x6 LB: > { %s5600_s22 = sadd.s32 4294967295, %s5534_s21   ;;  %s4403_s23 = sadd.s32 4294967294, %s5534_s21   ;;  %s5534_s21 = sphi %s5585_s21, %s10029_s21   ;;  %s5530_s20 = sphi %s5583_s20, %s10028_s20   ;;  %s5526_s19 = sphi %s5581_s19, %s10027_s19   ;;  %s5522_s18 = sphi %s5579_s18, %s10026_s18  }
   0x7   : > { %s5604_s24 = sadd.s32 1, %s5534_s21   ;;  %s29_s25 = sadd.s32 1, %s5530_s20 }
   0x8   : > { %s26_s26 = ssub.s32 %s5534_s21, %s5604_s24  ;;  %p36_p0 = scmp.ne.s32.totalorder %s5530_s20, %s5526_s19 }
   0x9   : > { %p27_p1 = scmp.eq.s32.totalorder %s26_s26, 0  ;;  %p37_p2 = scmp.eq.s32.totalorder %s5534_s21, 0 }
   0xa   : > { %p42_p3 = scmp.ne.s32.totalorder %s5526_s19, %s5522_s18  ;;  %p9750_p4 = scmp.eq.s32.totalorder %s5600_s22, 0 }
   0xb   : > { %s5616_s27 = scalar_select %p27_p1, %s5530_s20, %s29_s25  }
   0xc   : > { %p5618_p5 = por %p37_p2, %p36_p0  ;;  %p5624_p6 = por %p9750_p4, %p42_p3 }
   0xd   : > { %p150_p7 = scmp.eq.s32.totalorder %s5600_s22, 1  ;;  %p156_p8 = scmp.eq.s32.totalorder %s4403_s23, 1 }
   0xe   : > { %s9759_s29 = scalar_select %p5624_p6, 1, 0 }
   0xf   : > { %p4404_p9 = scmp.ge.s32.totalorder %s5534_s21, 1  ;;  %p163_p10 = scmp.lt.s32.totalorder %s5534_s21, 3 }
  0x10   : > { %p5631_p11 = por %p150_p7, %p36_p0  ;;  %p5635_p12 = por %p156_p8, %p42_p3 }
  0x11   : > { %p5639_p13 = pnand %p4404_p9, %p163_p10  ;;  %s5536_s8 = smov [#allocation5]  }
  0x12   : > { %s9760_s30 = scalar_select %p5631_p11, 1, 0 }
  0x13   : > { %s9761_s6 = scalar_select %p5635_p12, 1, 0 }
  0x14   : > { %p4657_p1 = pneg %p5639_p13  ;;  %s175_s9 = sshll.u32 %s5536_s8, 4  ;;  %s176_s9 = int_to_ptr.vmem [resolvable:$true] %s175_s9 }
  0x15   : > { %s5537_s11 = smov [#allocation7]   ;;  %s5399_s13 = scalar_lea.vmem %s176_s9, 2048 }
  0x16   : > { %p5647_p2 = pnand %p4657_p1, %p9750_p4  ;;  %s191_s12 = sshll.u32 %s5537_s11, 4  ;;  %s192_s12 = int_to_ptr.vmem [resolvable:$true] %s191_s12 }
  0x17   : > { %p5400_p3 = scmp.ne.s32.totalorder %s176_s9, %s5399_s13  ;;  %p5407_p9 = scmp.lt.s32.totalorder %s176_s9, %s176_s9 }
  0x18   : > { %p5390_p0 = pneg %p5647_p2  ;;  %p5408_p10 = scmp.lt.s32.totalorder %s5399_s13, %s5399_s13 }
  0x1a   : > { %p5402_p7 = pnand %p5400_p3, %p5390_p0  ;;  %p5409_p12 = por %p5408_p10, %p5407_p9 }
  0x1c   : > { %p5403_p8 = pneg %p5402_p7 }
  0x1e   : > { %p5410_p1 = pnand %p5409_p12, %p5403_p8 }
  0x20   : > { %5413 = shalt.err (!%p5410_p1)
}
  0x21   : > { %s5538_s14 = smov 128   ;;  %s5539_s15 = smov 8  }
  0x22   : > { %4660 = dma.hbm_to_vmem [thread:$0]  (!%p5647_p2), %s9745_s1, 2048, %s176_s9, [#allocation6], %s5538_s14, %s5538_s14, %s5539_s15  }
  0x23   : > { %s5425_s23 = scalar_lea.vmem %s192_s12, 2048  ;;  %p5433_p11 = scmp.lt.s32.totalorder %s192_s12, %s192_s12 }
  0x24   : > { %p5426_p4 = scmp.ne.s32.totalorder %s192_s12, %s5425_s23  ;;  %p5434_p6 = scmp.lt.s32.totalorder %s5425_s23, %s5425_s23 }
  0x26   : > { %p5428_p3 = pnand %p5426_p4, %p5390_p0  ;;  %p5435_p9 = por %p5434_p6, %p5433_p11 }
  0x28   : > { %p5429_p7 = pneg %p5428_p3 }
  0x2a   : > { %p5436_p12 = pnand %p5435_p9, %p5429_p7 }
  0x2c   : > { %5439 = shalt.err (!%p5436_p12)
}
  0x2d   : > { %s5540_s25 = smov 64   ;;  %s5541_s26 = smov 4  }
  0x2e   : > { %4663 = dma.hbm_to_vmem [thread:$0]  (!%p5647_p2), %s9747_s3, 2048, %s192_s12, [#allocation6], %s5540_s25, %s5540_s25, %s5541_s26  }
  0x2f   : > { %p4407_p8 = scmp.ge.s32.totalorder %s5534_s21, 2 }
  0x31   : > { %204 = sbr.rel (%p4407_p8) target bundleno = 88 (0x58), region = 32 }
  0x36   : > { %207 = sbr.rel (!%p5618_p5) target bundleno = 88 (0x58), region = 36  ;;  %s208_s9 = sand.u32 (%p5618_p5), 1, %s5530_s20  }
  0x37   : > { %s213_s13 = smul.u32 (%p5618_p5), 63, %s5534_s21  ;;  %s5679_s16 = scalar_lea.sflag (%p5618_p5), [#allocation3], %s208_s9 }
  0x38   : > { %s4644_s14 = smul.u32 (%p5618_p5), 252, %s208_s9 }
  0x39   : > { %s214_s15 = ssub.s32 (%p5618_p5), 125, %s213_s13 }
  0x3a   : > { %p215_p4 = scmp.lt.s32.totalorder (%p5618_p5), %s214_s15, 63  ;;  %s212_s17 = scalar_lea.vmem (%p5618_p5), [#allocation2], %s4644_s14 }
  0x3c   : > { %s10031_s15 = smov (!%p215_p4, %s214_s15), 63 }
  0x3d   : > { %s5676_s10 = sshll.u32 %s10031_s15, 6 }
  0x3e   : > { %s219_s12 = ssub.s32 4032, %s5676_s10 }
  0x3f   : > { %220 = vsyncadd %s5679_s16, %s219_s12  ;;  %p4409_p5 = scmp.ne.s32.totalorder %s5676_s10, 0  ;;  %s4456_s28 = smul.u32 4032, %s5534_s21 }
  0x40   : > { %s225_s23 = sshll.u32 %s212_s17, 4  ;;  %s5444_s14 = scalar_lea.hbm %s9744_s0, 8000  ;;  %s5689_s23 = int_to_ptr.vmem [resolvable:$true] %s225_s23 }
  0x41   : > { %s5687_s8 = scalar_lea.hbm %s9744_s0, %s4456_s28 }
  0x42   : > { %s5440_s11 = scalar_lea.hbm %s5687_s8, %s5676_s10  ;;  %p5445_p0 = scmp.lt.s32.totalorder %s5687_s8, %s9744_s0 }
  0x43   : > { %p5441_p6 = scmp.ne.s32.totalorder %s5687_s8, %s5440_s11  ;;  %p5446_p10 = scmp.lt.s32.totalorder %s5444_s14, %s5440_s11 }
  0x45   : > { %p5442_p11 = pnand %p5441_p6, %p4409_p5  ;;  %p5447_p1 = por %p5446_p10, %p5445_p0 }
  0x47   : > { %p5443_p2 = pneg %p5442_p11 }
  0x49   : > { %p5448_p3 = pnand %p5447_p1, %p5443_p2 }
  0x4b   : > { %5451 = shalt.err (!%p5448_p3)
}
  0x4c   : > { %s5452_s17 = scalar_lea.vmem %s5689_s23, %s5676_s10  ;;  %s5542_s28 = smov [#allocation2]  }
  0x4d   : > { %p5453_p7 = scmp.ne.s32.totalorder %s5689_s23, %s5452_s17  ;;  %s5456_s25 = sshll.u32 %s5542_s28, 4  ;;  %s5457_s25 = int_to_ptr.vmem [resolvable:$false] %s5456_s25 }
  0x4e   : > { %s5458_s26 = scalar_lea.vmem %s5457_s25, 8064  ;;  %p5459_p4 = scmp.lt.s32.totalorder %s5689_s23, %s5457_s25 }
  0x4f   : > { %p5454_p9 = pnand %p5453_p7, %p4409_p5  ;;  %p5460_p6 = scmp.lt.s32.totalorder %s5458_s26, %s5452_s17 }
  0x51   : > { %p5455_p12 = pneg %p5454_p9  ;;  %p5461_p11 = por %p5460_p6, %p5459_p4 }
  0x53   : > { %p5462_p0 = pnand %p5461_p11, %p5455_p12 }
  0x55   : > { %5465 = shalt.err (!%p5462_p0)
}
  0x56   : > { %s5543_s11 = smov 64   ;;  %s5544_s9 = smov 4  }
  0x57   : > { %231 = dma.hbm_to_vmem [thread:$0]  (%p4409_p5), %s5687_s8, %s5676_s10, %s5689_s23, %s5679_s16, %s5543_s11, %s5543_s11, %s5544_s9  }
  0x58 PF: > { %237 = sbr.rel (%p5639_p13) target bundleno = 993 (0x3e1), region = 40 }
  0x5d   : > { %s5718_s13 = sand.u32 1, %s5526_s19   ;;  %p9764_p2 = scmp.ne.s32.totalorder %s9759_s29, 0 }
  0x5e   : > { %s4645_s14 = smul.u32 252, %s5718_s13  ;;  %s240_s15 = scalar_lea.sflag [#allocation3], %s5718_s13 }
  0x60   : > { %s5722_s12 = scalar_lea.vmem [#allocation2], %s4645_s14 }
  0x61   : > { %5509 = dma.done.wait (%p9764_p2), %s240_s15, 4032  }
  0x62   : > { %5511 = vsyncadd (%p9764_p2), %s240_s15, 4294963264  ;;  %p9765_p5 = scmp.eq.s32.totalorder %s5600_s22, 0 }
  0x64   : > { %5513 = dma.done.wait (%p9765_p5), [#allocation6], 4096   ;;  %p9766_p13 = pmov %p9765_p5 }
  0x65   : > { %v5545_v0 = vmov 0   ;;  %v4716_v1 = vld [vmem:[#allocation5 + $0x74] ss:$8 sps:$4 sm:$0xff]   ;;  %v4718_v2 = vld [vmem:[#allocation5 + $0x70] ss:$8 sps:$4 sm:$0xff]   ;;  %v4459_v8 = vld [vmem:[%s5722_s12] sm:$0xff]  }
  0x66   : > { %5515 = vsyncadd (%p9766_p13), [#allocation6], 4294963200  ;;  %1154 = vmatprep.mubr.bf16.mxu0 %v5545_v0  ;;  %4612 = vmatprep.subr.bf16.mxu1 %v5545_v0  ;;  %v4719_v3 = vld [vmem:[#allocation5 + $0x64] ss:$8 sps:$4 sm:$0xff]   ;;  %v4721_v4 = vld [vmem:[#allocation5 + $0x60] ss:$8 sps:$4 sm:$0xff]   ;;  %v4460_v10 = vunpack.c.l.bf16 %v4459_v8  ;;  %v4461_v11 = vunpack.c.h.bf16 %v4459_v8 }
  0x67   : > { %1122 = vmatprep.subr.bf16.mxu0 %v4716_v1  ;;  %v4722_v5 = vld [vmem:[#allocation5 + $0x54] ss:$8 sps:$4 sm:$0xff]   ;;  %v4724_v6 = vld [vmem:[#allocation5 + $0x50] ss:$8 sps:$4 sm:$0xff]   ;;  %v4725_v7 = vld [vmem:[#allocation5 + $0x44] ss:$8 sps:$4 sm:$0xff]  }
  0x68   : > { %1123 = vmatpush1.bf16.msra.mxu0 %v4718_v2  ;;  %v4727_v9 = vld [vmem:[#allocation5 + $0x40] ss:$8 sps:$4 sm:$0xff]   ;;  %v4582_v12 = vld [vmem:[%s5722_s12 + $0x8] sm:$0xff]   ;;  %v4583_v15 = vld [vmem:[%s5722_s12 + $0x10] sm:$0xff]   ;;  %v415_v16 = vadd.f32 1.0, %v4460_v10  ;;  %v424_v17 = vadd.f32 1.0, %v4461_v11 }
  0x69   : > { %1124 = vmatprep.subr.bf16.mxu0 %v4719_v3  ;;  %v4728_v13 = vld [vmem:[#allocation5 + $0x34] ss:$8 sps:$4 sm:$0xff]   ;;  %v4464_v14 = vunpack.c.l.bf16 %v4582_v12  ;;  %v5737_v18 = vunpack.c.h.bf16 %v4582_v12  ;;  %v4730_v20 = vld [vmem:[#allocation5 + $0x30] ss:$8 sps:$4 sm:$0xff]   ;;  %v5739_v21 = vunpack.c.l.bf16 %v4583_v15  ;;  %v4731_v22 = vld [vmem:[#allocation5 + $0x24] ss:$8 sps:$4 sm:$0xff]   ;;  %v5741_v23 = vunpack.c.h.bf16 %v4583_v15 }
  0x6a   : > { %4756 = vlog2.f32 %v415_v16  ;;  %v4733_v25 = vld [vmem:[#allocation5 + $0x20] ss:$8 sps:$4 sm:$0xff]   ;;  %v418_v26 = vmul.f32 -0.5, %v4460_v10  ;;  %v4734_v28 = vld [vmem:[#allocation5 + $0x14] ss:$8 sps:$4 sm:$0xff]   ;;  %v427_v29 = vmul.f32 -0.5, %v4461_v11 }
  0x6b   : > { %v433_v19 = vadd.f32 1.0, %v4464_v14  ;;  %4758 = vlog2.f32 %v424_v17  ;;  %v442_v24 = vadd.f32 1.0, %v5737_v18  ;;  %v451_v27 = vadd.f32 1.0, %v5739_v21  ;;  %v4584_v31 = vld [vmem:[%s5722_s12 + $0x18] sm:$0xff]   ;;  %v4736_v32 = vld [vmem:[#allocation5 + $0x10] ss:$8 sps:$4 sm:$0xff]  }
  0x6c   : > { %1125 = vmatpush1.bf16.msra.mxu0 %v4721_v4  ;;  %v460_v30 = vadd.f32 1.0, %v5741_v23  ;;  %v436_v33 = vmul.f32 -0.5, %v4464_v14  ;;  %v4737_v34 = vld [vmem:[#allocation5 + $0x4] ss:$8 sps:$4 sm:$0xff]   ;;  %v421_v35 = vand.u32 2147483647, %v4460_v10  ;;  %v5748_v38 = vunpack.c.l.bf16 %v4584_v31 }
  0x6d   : > { %1126 = vmatprep.subr.bf16.mxu0 %v4722_v5  ;;  %4760 = vlog2.f32 %v433_v19  ;;  %v419_v36 = vadd.f32 1.0, %v418_v26  ;;  %v445_v37 = vmul.f32 -0.5, %v5737_v18  ;;  %v428_v39 = vadd.f32 1.0, %v427_v29  ;;  %v4739_v45 = vld [vmem:[#allocation5] ss:$8 sps:$4 sm:$0xff]   ;;  %v4586_v17 = vld [vmem:[%s5722_s12 + $0x28] sm:$0xff]  }
  0x6e   : > { %4762 = vlog2.f32 %v442_v24  ;;  %v430_v40 = vand.u32 2147483647, %v4461_v11  ;;  %v5750_v41 = vunpack.c.h.bf16 %v4584_v31  ;;  %v437_v42 = vadd.f32 1.0, %v436_v33  ;;  %v4585_v54 = vld [vmem:[%s5722_s12 + $0x20] sm:$0xff]   ;;  %v4588_v61 = vld [vmem:[%s5722_s12 + $0x38] sm:$0xff]   ;;  %s4646_s23 = smul.u32 504, %s5718_s13 }
  0x6f   : > { %4764 = vlog2.f32 %v451_v27  ;;  %v439_v43 = vand.u32 2147483647, %v4464_v14  ;;  %v448_v44 = vand.u32 2147483647, %v5737_v18  ;;  %v420_v46 = vmul.f32 %v4460_v10, %v419_v36  ;;  %s4292_s11 = scalar_lea.sflag [#allocation4], %s5718_s13  ;;  %p10024_p10 = scmp.ne.s32.totalorder %s9760_s30, 0 }
  0x70   : > { %1127 = vmatpush1.bf16.msra.mxu0 %v4724_v6  ;;  %4766 = vlog2.f32 %v460_v30  ;;  %vm5753_vm0 = vcmp.lt.f32.partialorder %v421_v35, 0.0004427343  ;;  %v446_v48 = vadd.f32 1.0, %v445_v37  ;;  %v469_v49 = vadd.f32 1.0, %v5748_v38  ;;  %s8388_s8 = scalar_lea.vmem [#allocation8], %s4646_s23  ;;  %s4299_s9 = smul.u32 (%p10024_p10), 63, %s5600_s22 }
  0x71   : > { %1128 = vmatprep.subr.bf16.mxu0 %v4725_v7  ;;  %v429_v51 = vmul.f32 %v4461_v11, %v428_v39  ;;  %vm5758_vm1 = vcmp.lt.f32.partialorder %v430_v40, 0.0004427343  ;;  %v478_v53 = vadd.f32 1.0, %v5750_v41  ;;  %v438_v57 = vmul.f32 %v4464_v14, %v437_v42  ;;  %v4587_v40 = vld [vmem:[%s5722_s12 + $0x30] sm:$0xff]  }
  0x72   : > { %vm5764_vm2 = vcmp.lt.f32.partialorder %v439_v43, 0.0004427343  ;;  %vm5768_vm3 = vcmp.lt.f32.partialorder %v448_v44, 0.0004427343  ;;  %v454_v62 = vmul.f32 -0.5, %v5739_v21  ;;  %v463_v63 = vmul.f32 -0.5, %v5741_v23 }
  0x73   : > { %v447_v2 = vmul.f32 %v5737_v18, %v446_v48  ;;  %4768 = vlog2.f32 %v469_v49  ;;  %v5777_v3 = vunpack.c.l.bf16 %v4585_v54  ;;  %v5781_v7 = vunpack.c.h.bf16 %v4585_v54  ;;  %s4300_s14 = ssub.s32 (%p10024_p10), 125, %s4299_s9 }
  0x74   : > { %1129 = vmatpush1.bf16.msra.mxu0 %v4727_v9  ;;  %4770 = vlog2.f32 %v478_v53  ;;  %v455_v10 = vadd.f32 1.0, %v454_v62  ;;  %v464_v11 = vadd.f32 1.0, %v463_v63  ;;  %v457_v19 = vand.u32 2147483647, %v5739_v21  ;;  %p4301_p1 = scmp.lt.s32.totalorder (%p10024_p10), %s4300_s14, 63 }
  0x75   : > { %1130 = vmatprep.subr.bf16.mxu0 %v4728_v13  ;;  %v487_v12 = vadd.f32 1.0, %v5777_v3  ;;  %v496_v16 = vadd.f32 1.0, %v5781_v7  ;;  %v472_v24 = vmul.f32 -0.5, %v5748_v38  ;;  %v5800_v31 = vunpack.c.h.bf16 %v4586_v17 }
  0x76   : > { %v465_v27 = vmul.f32 %v5741_v23, %v464_v11  ;;  %vm5802_vm4 = vcmp.lt.f32.partialorder %v457_v19, 0.0004427343  ;;  %v475_v43 = vand.u32 2147483647, %v5748_v38  ;;  %v484_v44 = vand.u32 2147483647, %v5750_v41 }
  0x77   : > { %v4757_v50 = vpop.eup %4756  ;;  %4772 = vlog2.f32 %v487_v12  ;;  %v473_v33 = vadd.f32 1.0, %v472_v24  ;;  %v514_v39 = vadd.f32 1.0, %v5800_v31  ;;  %v490_v47 = vmul.f32 -0.5, %v5777_v3 }
  0x78   : > { %1131 = vmatpush1.bf16.msra.mxu0 %v4730_v20  ;;  %v4759_v55 = vpop.eup %4758  ;;  %v417_v56 = vmul.f32 0.6931472, %v4757_v50  ;;  %v466_v20 = vand.u32 2147483647, %v5741_v23  ;;  %4774 = vlog2.f32 %v496_v16  ;;  %v499_v49 = vmul.f32 -0.5, %v5781_v7 }
  0x79   : > { %1132 = vmatprep.subr.bf16.mxu0 %v4731_v22  ;;  %v426_v60 = vmul.f32 0.6931472, %v4759_v55  ;;  %v456_v22 = vmul.f32 %v5739_v21, %v455_v10  ;;  %v5824_v50 = vunpack.c.l.bf16 %v4587_v40  ;;  %v5826_v53 = vunpack.c.h.bf16 %v4587_v40 }
  0x7a   : > { %v4761_v59 = vpop.eup %4760  ;;  %v423_v1 = vsel %vm5753_vm0, %v420_v46, %v417_v56  ;;  %vm5806_vm5 = vcmp.lt.f32.partialorder %v466_v20, 0.0004427343  ;;  %vm5828_vm6 = vcmp.lt.f32.partialorder %v475_v43, 0.0004427343  ;;  %vm5832_vm7 = vcmp.lt.f32.partialorder %v484_v44, 0.0004427343 }
  0x7b   : > { %v4763_v4 = vpop.eup %4762  ;;  %v432_v5 = vsel %vm5758_vm1, %v429_v51, %v426_v60  ;;  %v435_v6 = vmul.f32 0.6931472, %v4761_v59  ;;  %v500_v55 = vadd.f32 1.0, %v499_v49  ;;  %v523_v56 = vadd.f32 1.0, %v5824_v50  ;;  %v4589_v20 = vld [vmem:[%s5722_s12 + $0x40] sm:$0xff]   ;;  %v4590_v44 = vld [vmem:[%s5722_s12 + $0x48] sm:$0xff]  }
  0x7c   : > { %1133 = vmatpush1.bf16.msra.mxu0 %v4733_v25  ;;  %v982_v8 = vpack.c.bf16 %v432_v5, %v423_v1  ;;  %v444_v9 = vmul.f32 0.6931472, %v4763_v4  ;;  %v4765_v13 = vpop.eup %4764  ;;  %v481_v25 = vmul.f32 -0.5, %v5750_v41  ;;  %v532_v60 = vadd.f32 1.0, %v5826_v53 }
  0x7d   : > { %1134 = vmatprep.subr.bf16.mxu0 %v4734_v28  ;;  %v441_v14 = vsel %vm5764_vm2, %v438_v57, %v435_v6  ;;  %v4767_v18 = vpop.eup %4766  ;;  %v5798_v28 = vunpack.c.l.bf16 %v4586_v17  ;;  %v453_v29 = vmul.f32 0.6931472, %v4765_v13  ;;  %v493_v63 = vand.u32 2147483647, %v5777_v3 }
  0x7e   : > { %v450_v15 = vsel %vm5768_vm3, %v447_v2, %v444_v9  ;;  %v462_v30 = vmul.f32 0.6931472, %v4767_v18  ;;  %v502_v1 = vand.u32 2147483647, %v5781_v7  ;;  %v517_v5 = vmul.f32 -0.5, %v5800_v31 }
  0x7f   : > { %v983_v26 = vpack.c.bf16 %v450_v15, %v441_v14  ;;  %v505_v23 = vadd.f32 1.0, %v5798_v28  ;;  %v459_v36 = vsel %vm5802_vm4, %v456_v22, %v453_v29  ;;  %v508_v4 = vmul.f32 -0.5, %v5798_v28 }
  0x80   : > { %1135 = vmatpush1.bf16.msra.mxu0 %v4736_v32  ;;  %v4769_v35 = vpop.eup %4768  ;;  %v468_v37 = vsel %vm5806_vm5, %v465_v27, %v462_v30  ;;  %v5850_v9 = vunpack.c.l.bf16 %v4588_v61  ;;  %v5852_v12 = vunpack.c.h.bf16 %v4588_v61  ;;  %vm5854_vm8 = vcmp.lt.f32.partialorder %v493_v63, 0.0004427343 }
  0x81   : > { %1136 = vmatprep.subr.bf16.mxu0 %v4737_v34  ;;  %v482_v34 = vadd.f32 1.0, %v481_v25  ;;  %v4771_v42 = vpop.eup %4770  ;;  %v984_v48 = vpack.c.bf16 %v468_v37, %v459_v36  ;;  %4776 = vlog2.f32 %v505_v23  ;;  %v471_v51 = vmul.f32 0.6931472, %v4769_v35 }
  0x82   : > { %v480_v52 = vmul.f32 0.6931472, %v4771_v42  ;;  %4778 = vlog2.f32 %v514_v39  ;;  %vm5858_vm9 = vcmp.lt.f32.partialorder %v502_v1, 0.0004427343  ;;  %v509_v14 = vadd.f32 1.0, %v508_v4  ;;  %v4591_v1 = vld [vmem:[%s5722_s12 + $0x50] sm:$0xff]  }
  0x83   : > { %v483_v46 = vmul.f32 %v5750_v41, %v482_v34  ;;  %v491_v41 = vadd.f32 1.0, %v490_v47  ;;  %4780 = vlog2.f32 %v523_v56  ;;  %v518_v15 = vadd.f32 1.0, %v517_v5 }
  0x84   : > { %1137 = vmatpush1.bf16.msra.mxu0 %v4739_v45  ;;  %v474_v45 = vmul.f32 %v5748_v38, %v473_v33  ;;  %v4773_v57 = vpop.eup %4772  ;;  %4782 = vlog2.f32 %v532_v60  ;;  %v550_v19 = vadd.f32 1.0, %v5852_v12  ;;  %v511_v24 = vand.u32 2147483647, %v5798_v28 }
  0x85   : > { %2806 = vmatprep.subr.bf16.mxu0 %v5545_v0  ;;  %v486_v59 = vsel %vm5832_vm7, %v483_v46, %v480_v52  ;;  %v4775_v62 = vpop.eup %4774  ;;  %v492_v2 = vmul.f32 %v5777_v3, %v491_v41  ;;  %v489_v10 = vmul.f32 0.6931472, %v4773_v57  ;;  %v520_v25 = vand.u32 2147483647, %v5800_v31 }
  0x86   : > { %v477_v58 = vsel %vm5828_vm6, %v474_v45, %v471_v51  ;;  %v498_v11 = vmul.f32 0.6931472, %v4775_v62  ;;  %v519_v27 = vmul.f32 %v5800_v31, %v518_v15  ;;  %v526_v29 = vmul.f32 -0.5, %v5824_v50 }
  0x87   : > { %1155 = vmatmul.mubr.bf16.vlgmr.msra.gmra.mxu0 %v982_v8  ;;  %v985_v6 = vpack.c.bf16 %v486_v59, %v477_v58  ;;  %v501_v8 = vmul.f32 %v5781_v7, %v500_v55  ;;  %v541_v7 = vadd.f32 1.0, %v5850_v9  ;;  %v495_v17 = vsel %vm5854_vm8, %v492_v2, %v489_v10 }
  0x88   : > { %1164 = vmatprep.mubr.bf16.mxu0 %v5545_v0  ;;  %v535_v32 = vmul.f32 -0.5, %v5826_v53  ;;  %v5876_v21 = vunpack.c.l.bf16 %v4589_v20  ;;  %v5878_v23 = vunpack.c.h.bf16 %v4589_v20  ;;  %vm5880_vm10 = vcmp.lt.f32.partialorder %v511_v24, 0.0004427343 }
  0x89   : > { %v504_v18 = vsel %vm5858_vm9, %v501_v8, %v498_v11  ;;  %4784 = vlog2.f32 %v541_v7  ;;  %vm5884_vm11 = vcmp.lt.f32.partialorder %v520_v25, 0.0004427343  ;;  %v527_v31 = vadd.f32 1.0, %v526_v29  ;;  %v4592_v25 = vld [vmem:[%s5722_s12 + $0x58] sm:$0xff]  }
  0x8a   : > { %v986_v30 = vpack.c.bf16 %v504_v18, %v495_v17  ;;  %4786 = vlog2.f32 %v550_v19  ;;  %v536_v36 = vadd.f32 1.0, %v535_v32  ;;  %v559_v37 = vadd.f32 1.0, %v5876_v21 }
  0x8b   : > { %v568_v43 = vadd.f32 1.0, %v5878_v23  ;;  %v529_v46 = vand.u32 2147483647, %v5824_v50  ;;  %v538_v47 = vand.u32 2147483647, %v5826_v53  ;;  %v544_v49 = vmul.f32 -0.5, %v5850_v9 }
  0x8c   : > { %v553_v51 = vmul.f32 -0.5, %v5852_v12  ;;  %v537_v54 = vmul.f32 %v5826_v53, %v536_v36  ;;  %4788 = vlog2.f32 %v559_v37  ;;  %v5902_v38 = vunpack.c.l.bf16 %v4590_v44 }
  0x8d   : > { %4790 = vlog2.f32 %v568_v43  ;;  %v5904_v56 = vunpack.c.h.bf16 %v4590_v44  ;;  %vm5906_vm12 = vcmp.lt.f32.partialorder %v529_v46, 0.0004427343  ;;  %vm5910_vm13 = vcmp.lt.f32.partialorder %v538_v47, 0.0004427343  ;;  %v4740_v43 = vld [vmem:[#allocation7 + $0x38] sm:$0xff]  }
  0x8e   : > { %v4777_v16 = vpop.eup %4776  ;;  %v545_v58 = vadd.f32 1.0, %v544_v49  ;;  %v554_v59 = vadd.f32 1.0, %v553_v51  ;;  %v577_v53 = vadd.f32 1.0, %v5902_v38  ;;  %v547_v4 = vand.u32 2147483647, %v5850_v9  ;;  %4628 = vmatpush1.bf16.msra.mxu1 %v4740_v43  ;;  %2807 = vmatpush1.bf16.msra.mxu0 %v4740_v43 }
  0x8f   : > { %1165 = vmatmul.mubr.bf16.gmra.mxu0 %v983_v26  ;;  %v4779_v22 = vpop.eup %4778  ;;  %v510_v26 = vmul.f32 %v5798_v28, %v509_v14  ;;  %v507_v33 = vmul.f32 0.6931472, %v4777_v16  ;;  %v586_v63 = vadd.f32 1.0, %v5904_v56  ;;  %v556_v5 = vand.u32 2147483647, %v5852_v12  ;;  %4613 = vmatprep.subr.bf16.mxu1 %v5545_v0 }
  0x90   : > { %1174 = vmatprep.mubr.bf16.mxu0 %v5545_v0  ;;  %v516_v34 = vmul.f32 0.6931472, %v4779_v22  ;;  %v4781_v39 = vpop.eup %4780  ;;  %v555_v8 = vmul.f32 %v5852_v12, %v554_v59  ;;  %v562_v10 = vmul.f32 -0.5, %v5876_v21  ;;  %v571_v13 = vmul.f32 -0.5, %v5878_v23  ;;  %2808 = vmatprep.subr.bf16.mxu0 %v5545_v0 }
  0x91   : > { %v513_v40 = vsel %vm5880_vm10, %v510_v26, %v507_v33  ;;  %v4783_v45 = vpop.eup %4782  ;;  %v525_v41 = vmul.f32 0.6931472, %v4781_v39  ;;  %4792 = vlog2.f32 %v577_v53  ;;  %v5928_v3 = vunpack.c.l.bf16 %v4591_v1  ;;  %v4744_v39 = vld [vmem:[#allocation7 + $0x18] sm:$0xff]  }
  0x92   : > { %v522_v42 = vsel %vm5884_vm11, %v519_v27, %v516_v34  ;;  %v534_v55 = vmul.f32 0.6931472, %v4783_v45  ;;  %4794 = vlog2.f32 %v586_v63  ;;  %v5930_v7 = vunpack.c.h.bf16 %v4591_v1 }
  0x93   : > { %v987_v52 = vpack.c.bf16 %v522_v42, %v513_v40  ;;  %vm5932_vm14 = vcmp.lt.f32.partialorder %v547_v4, 0.0004427343  ;;  %vm5936_vm15 = vcmp.lt.f32.partialorder %v556_v5, 0.0004427343  ;;  %v563_v12 = vadd.f32 1.0, %v562_v10  ;;  %v4742_v10 = vld [vmem:[#allocation7 + $0x28] sm:$0xff]  }
  0x94   : > { %v540_v62 = vsel %vm5910_vm13, %v537_v54, %v534_v55  ;;  %v572_v17 = vadd.f32 1.0, %v571_v13  ;;  %v595_v18 = vadd.f32 1.0, %v5928_v3  ;;  %v604_v24 = vadd.f32 1.0, %v5930_v7  ;;  %v4741_v54 = vld [vmem:[#allocation7 + $0x30] sm:$0xff]  }
  0x95   : > { %v565_v27 = vand.u32 2147483647, %v5876_v21  ;;  %v574_v29 = vand.u32 2147483647, %v5878_v23  ;;  %v580_v32 = vmul.f32 -0.5, %v5902_v38  ;;  %v589_v33 = vmul.f32 -0.5, %v5904_v56  ;;  %4629 = vmatpush1.bf16.msra.mxu1 %v4741_v54  ;;  %2809 = vmatpush1.bf16.msra.mxu0 %v4741_v54 }
  0x96   : > { %v4785_v60 = vpop.eup %4784  ;;  %v573_v35 = vmul.f32 %v5878_v23, %v572_v17  ;;  %4796 = vlog2.f32 %v595_v18  ;;  %v5954_v28 = vunpack.c.l.bf16 %v4592_v25  ;;  %v5956_v37 = vunpack.c.h.bf16 %v4592_v25  ;;  %4614 = vmatprep.subr.bf16.mxu1 %v5545_v0  ;;  %2810 = vmatprep.subr.bf16.mxu0 %v5545_v0 }
  0x97   : > { %1175 = vmatmul.mubr.bf16.gmra.mxu0 %v984_v48  ;;  %v528_v48 = vmul.f32 %v5824_v50, %v527_v31  ;;  %v4787_v2 = vpop.eup %4786  ;;  %v543_v14 = vmul.f32 0.6931472, %v4785_v60  ;;  %4798 = vlog2.f32 %v604_v24  ;;  %vm5958_vm0 = vcmp.lt.f32.partialorder %v565_v27, 0.0004427343  ;;  %v4748_v24 = vld [vmem:[#allocation7 + $0x78] sm:$0xff]  }
  0x98   : > { %1184 = vmatprep.mubr.bf16.mxu0 %v5545_v0  ;;  %v552_v15 = vmul.f32 0.6931472, %v4787_v2  ;;  %vm5962_vm1 = vcmp.lt.f32.partialorder %v574_v29, 0.0004427343  ;;  %v581_v40 = vadd.f32 1.0, %v580_v32  ;;  %v590_v42 = vadd.f32 1.0, %v589_v33 }
  0x99   : > { %v531_v61 = vsel %vm5906_vm12, %v528_v48, %v525_v41  ;;  %v4789_v19 = vpop.eup %4788  ;;  %v613_v23 = vadd.f32 1.0, %v5954_v28  ;;  %v622_v47 = vadd.f32 1.0, %v5956_v37  ;;  %v4593_v48 = vld [vmem:[%s5722_s12 + $0x60] sm:$0xff]   ;;  %v583_v51 = vand.u32 2147483647, %v5902_v38  ;;  %4630 = vmatpush1.bf16.msra.mxu1 %v4742_v10  ;;  %2811 = vmatpush1.bf16.msra.mxu0 %v4742_v10 }
  0x9a   : > { %v988_v11 = vpack.c.bf16 %v540_v62, %v531_v61  ;;  %v558_v22 = vsel %vm5936_vm15, %v555_v8, %v552_v15  ;;  %v4791_v26 = vpop.eup %4790  ;;  %v561_v31 = vmul.f32 0.6931472, %v4789_v19  ;;  %v582_v41 = vmul.f32 %v5902_v38, %v581_v40  ;;  %v4594_v8 = vld [vmem:[%s5722_s12 + $0x68] sm:$0xff]   ;;  %4615 = vmatprep.subr.bf16.mxu1 %v5545_v0  ;;  %2812 = vmatprep.subr.bf16.mxu0 %v5545_v0 }
  0x9b   : > { %v570_v36 = vmul.f32 0.6931472, %v4791_v26  ;;  %v591_v55 = vmul.f32 %v5904_v56, %v590_v42  ;;  %v598_v57 = vmul.f32 -0.5, %v5928_v3  ;;  %4800 = vlog2.f32 %v613_v23  ;;  %v4746_v38 = vld [vmem:[#allocation7 + $0x8] sm:$0xff]  }
  0x9c   : > { %v5982_v59 = vunpack.c.l.bf16 %v4593_v48  ;;  %4802 = vlog2.f32 %v622_v47  ;;  %v5984_v61 = vunpack.c.h.bf16 %v4593_v48  ;;  %vm5986_vm2 = vcmp.lt.f32.partialorder %v583_v51, 0.0004427343  ;;  %v4745_v48 = vld [vmem:[#allocation7 + $0x10] sm:$0xff]  }
  0x9d   : > { %v576_v46 = vsel %vm5962_vm1, %v573_v35, %v570_v36  ;;  %v599_v62 = vadd.f32 1.0, %v598_v57  ;;  %v601_v13 = vand.u32 2147483647, %v5928_v3  ;;  %v616_v16 = vmul.f32 -0.5, %v5954_v28 }
  0x9e   : > { %v4793_v44 = vpop.eup %4792  ;;  %v631_v1 = vadd.f32 1.0, %v5982_v59  ;;  %v6010_v18 = vunpack.c.l.bf16 %v4594_v8  ;;  %v628_v36 = vand.u32 2147483647, %v5956_v37  ;;  %v634_v42 = vmul.f32 -0.5, %v5982_v59 }
  0x9f   : > { %1185 = vmatmul.mubr.bf16.gmra.mxu0 %v985_v6  ;;  %v546_v6 = vmul.f32 %v5850_v9, %v545_v58  ;;  %v4795_v49 = vpop.eup %4794  ;;  %v607_v58 = vmul.f32 -0.5, %v5930_v7  ;;  %v579_v53 = vmul.f32 0.6931472, %v4793_v44  ;;  %v600_v15 = vmul.f32 %v5928_v3, %v599_v62 }
  0xa0   : > { %1194 = vmatprep.mubr.bf16.mxu0 %v5545_v0  ;;  %v588_v60 = vmul.f32 0.6931472, %v4795_v49  ;;  %v625_v9 = vmul.f32 -0.5, %v5956_v37  ;;  %4804 = vlog2.f32 %v631_v1  ;;  %v6014_v3 = vunpack.c.h.bf16 %v4594_v8 }
  0xa1   : > { %v549_v20 = vsel %vm5932_vm14, %v546_v6, %v543_v14  ;;  %v608_v63 = vadd.f32 1.0, %v607_v58  ;;  %v585_v4 = vsel %vm5986_vm2, %v582_v41, %v579_v53  ;;  %v640_v6 = vadd.f32 1.0, %v5984_v61 }
  0xa2   : > { %v989_v34 = vpack.c.bf16 %v558_v22, %v549_v20  ;;  %v610_v14 = vand.u32 2147483647, %v5930_v7  ;;  %v4743_v22 = vld [vmem:[#allocation7 + $0x20] sm:$0xff]   ;;  %vm6016_vm4 = vcmp.lt.f32.partialorder %v601_v13, 0.0004427343  ;;  %v617_v25 = vadd.f32 1.0, %v616_v16 }
  0xa3   : > { %v4797_v2 = vpop.eup %4796  ;;  %v609_v17 = vmul.f32 %v5930_v7, %v608_v63  ;;  %4806 = vlog2.f32 %v640_v6  ;;  %v626_v26 = vadd.f32 1.0, %v625_v9  ;;  %4631 = vmatpush1.bf16.msra.mxu1 %v4743_v22  ;;  %2813 = vmatpush1.bf16.msra.mxu0 %v4743_v22  ;;  %v649_v27 = vadd.f32 1.0, %v6010_v18 }
  0xa4   : > { %v597_v19 = vmul.f32 0.6931472, %v4797_v2  ;;  %vm6020_vm5 = vcmp.lt.f32.partialorder %v610_v14, 0.0004427343  ;;  %4616 = vmatprep.subr.bf16.mxu1 %v5545_v0  ;;  %v658_v33 = vadd.f32 1.0, %v6014_v3  ;;  %2814 = vmatprep.subr.bf16.mxu0 %v5545_v0  ;;  %v643_v43 = vmul.f32 -0.5, %v5984_v61 }
  0xa5   : > { %v627_v40 = vmul.f32 %v5956_v37, %v626_v26  ;;  %4808 = vlog2.f32 %v649_v27  ;;  %vm6050_vm7 = vcmp.lt.f32.partialorder %v628_v36, 0.0004427343  ;;  %v635_v49 = vadd.f32 1.0, %v634_v42  ;;  %v4750_v37 = vld [vmem:[#allocation7 + $0x68] sm:$0xff]  }
  0xa6   : > { %4810 = vlog2.f32 %v658_v33  ;;  %v644_v51 = vadd.f32 1.0, %v643_v43  ;;  %v637_v53 = vand.u32 2147483647, %v5982_v59  ;;  %v652_v62 = vmul.f32 -0.5, %v6010_v18  ;;  %v4598_v43 = vld [vmem:[%s5722_s12 + $0x88] sm:$0xff]  }
  0xa7   : > { %1195 = vmatmul.mubr.bf16.gmra.mxu0 %v986_v30  ;;  %v564_v30 = vmul.f32 %v5876_v21, %v563_v12  ;;  %v618_v21 = vmul.f32 %v5954_v28, %v617_v25  ;;  %4632 = vmatpush1.bf16.msra.mxu1 %v4744_v39  ;;  %v661_v63 = vmul.f32 -0.5, %v6014_v3  ;;  %v664_v22 = vand.u32 2147483647, %v6014_v3 }
  0xa8   : > { %1204 = vmatprep.mubr.bf16.mxu0 %v5545_v0  ;;  %2815 = vmatpush1.bf16.msra.mxu0 %v4744_v39  ;;  %v645_v2 = vmul.f32 %v5984_v61, %v644_v51  ;;  %vm6075_vm8 = vcmp.lt.f32.partialorder %v637_v53, 0.0004427343 }
  0xa9   : > { %v567_v45 = vsel %vm5958_vm0, %v564_v30, %v561_v31  ;;  %v603_v30 = vsel %vm6016_vm4, %v600_v15, %v597_v19  ;;  %v619_v31 = vand.u32 2147483647, %v5954_v28  ;;  %4617 = vmatprep.subr.bf16.mxu1 %v5545_v0  ;;  %2816 = vmatprep.subr.bf16.mxu0 %v5545_v0  ;;  %v662_v13 = vadd.f32 1.0, %v661_v63 }
  0xaa   : > { %v990_v50 = vpack.c.bf16 %v576_v46, %v567_v45  ;;  %vm6109_vm11 = vcmp.lt.f32.partialorder %v664_v22, 0.0004427343 }
  0xab   : > { %vm6046_vm6 = vcmp.lt.f32.partialorder %v619_v31, 0.0004427343  ;;  %4633 = vmatpush1.bf16.msra.mxu1 %v4745_v48  ;;  %v663_v25 = vmul.f32 %v6014_v3, %v662_v13 }
  0xac   : > { %4618 = vmatprep.subr.bf16.mxu1 %v5545_v0  ;;  %2817 = vmatpush1.bf16.msra.mxu0 %v4745_v48 }
  0xad   : > { %2818 = vmatprep.subr.bf16.mxu0 %v5545_v0 }
  0xaf   : > { %1205 = vmatmul.mubr.bf16.gmra.mxu0 %v987_v52  ;;  %v592_v52 = vand.u32 2147483647, %v5904_v56  ;;  %v636_v56 = vmul.f32 %v5982_v59, %v635_v49  ;;  %4634 = vmatpush1.bf16.msra.mxu1 %v4746_v38 }
  0xb0   : > { %1214 = vmatprep.mubr.bf16.mxu0 %v5545_v0  ;;  %4619 = vmatprep.subr.bf16.mxu1 %v5545_v0 }
  0xb1   : > { %vm5990_vm3 = vcmp.lt.f32.partialorder %v592_v52, 0.0004427343  ;;  %2819 = vmatpush1.bf16.msra.mxu0 %v4746_v38  ;;  %v4751_v38 = vld [vmem:[#allocation7 + $0x60] sm:$0xff]  }
  0xb2   : > { %v594_v5 = vsel %vm5990_vm3, %v591_v55, %v588_v60  ;;  %v646_v60 = vand.u32 2147483647, %v5984_v61  ;;  %v4747_v61 = vld [vmem:[#allocation7] sm:$0xff]   ;;  %2820 = vmatprep.subr.bf16.mxu0 %v5545_v0 }
  0xb3   : > { %v991_v12 = vpack.c.bf16 %v594_v5, %v585_v4  ;;  %4635 = vmatpush1.bf16.msra.mxu1 %v4747_v61 }
  0xb4   : > { %vm6079_vm9 = vcmp.lt.f32.partialorder %v646_v60, 0.0004427343  ;;  %4620 = vmatprep.subr.bf16.mxu1 %v5545_v0 }
  0xb5   : > { %2821 = vmatpush1.bf16.msra.mxu0 %v4747_v61 }
  0xb6   : > { %2822 = vmatprep.subr.bf16.mxu0 %v5545_v0 }
  0xb7   : > { %1215 = vmatmul.mubr.bf16.gmra.mxu0 %v988_v11  ;;  %v4799_v11 = vpop.eup %4798  ;;  %4636 = vmatpush2.bf16.msra.mxu1 %v4748_v24 }
  0xb8   : > { %1224 = vmatprep.mubr.bf16.mxu0 %v5545_v0  ;;  %v606_v20 = vmul.f32 0.6931472, %v4799_v11  ;;  %v4801_v29 = vpop.eup %4800  ;;  %v653_v11 = vadd.f32 1.0, %v652_v62  ;;  %4621 = vmatprep.subr.bf16.mxu1 %v5545_v0 }
  0xb9   : > { %v4803_v35 = vpop.eup %4802  ;;  %v615_v45 = vmul.f32 0.6931472, %v4801_v29  ;;  %2823 = vmatpush2.bf16.msra.mxu0 %v4748_v24  ;;  %v4753_v24 = vld [vmem:[#allocation7 + $0x50] sm:$0xff]  }
  0xba   : > { %v612_v32 = vsel %vm6020_vm5, %v609_v17, %v606_v20  ;;  %v624_v46 = vmul.f32 0.6931472, %v4803_v35  ;;  %v4805_v54 = vpop.eup %4804  ;;  %v4597_v17 = vld [vmem:[%s5722_s12 + $0x80] sm:$0xff]   ;;  %v655_v20 = vand.u32 2147483647, %v6010_v18  ;;  %v654_v7 = vmul.f32 %v6010_v18, %v653_v11  ;;  %v4749_v35 = vld [vmem:[#allocation7 + $0x70] sm:$0xff]   ;;  %2824 = vmatprep.subr.bf16.mxu0 %v5545_v0 }
  0xbb   : > { %v992_v23 = vpack.c.bf16 %v612_v32, %v603_v30  ;;  %v621_v41 = vsel %vm6046_vm6, %v618_v21, %v615_v45  ;;  %v4807_v58 = vpop.eup %4806  ;;  %v633_v5 = vmul.f32 0.6931472, %v4805_v54  ;;  %v6100_v30 = vunpack.c.l.bf16 %v4597_v17  ;;  %4637 = vmatpush2.bf16.msra.mxu1 %v4749_v35 }
  0xbc   : > { %v630_v55 = vsel %vm6050_vm7, %v627_v40, %v624_v46  ;;  %v642_v6 = vmul.f32 0.6931472, %v4807_v58  ;;  %v4809_v15 = vpop.eup %4808  ;;  %vm6105_vm10 = vcmp.lt.f32.partialorder %v655_v20, 0.0004427343  ;;  %4622 = vmatprep.subr.bf16.mxu1 %v5545_v0 }
  0xbd   : > { %v993_v1 = vpack.c.bf16 %v630_v55, %v621_v41  ;;  %v639_v16 = vsel %vm6075_vm8, %v636_v56, %v633_v5  ;;  %v4811_v19 = vpop.eup %4810  ;;  %v651_v32 = vmul.f32 0.6931472, %v4809_v15  ;;  %v703_v39 = vadd.f32 1.0, %v6100_v30  ;;  %2825 = vmatpush2.bf16.msra.mxu0 %v4749_v35 }
  0xbe   : > { %v648_v9 = vsel %vm6079_vm9, %v645_v2, %v642_v6  ;;  %v660_v33 = vmul.f32 0.6931472, %v4811_v19  ;;  %2826 = vmatprep.subr.bf16.mxu0 %v5545_v0  ;;  %v6130_v41 = vunpack.c.l.bf16 %v4598_v43  ;;  %v4599_v2 = vld [vmem:[%s5722_s12 + $0x90] sm:$0xff]   ;;  %v706_v11 = vmul.f32 -0.5, %v6100_v30 }
  0xbf   : > { %1225 = vmatmul.mubr.bf16.gmra.mxu0 %v989_v34  ;;  %v4595_v34 = vld [vmem:[%s5722_s12 + $0x70] sm:$0xff]   ;;  %v994_v27 = vpack.c.bf16 %v648_v9, %v639_v16  ;;  %v657_v40 = vsel %vm6105_vm10, %v654_v7, %v651_v32  ;;  %4638 = vmatpush2.bf16.msra.mxu1 %v4750_v37  ;;  %v6160_v15 = vunpack.c.l.bf16 %v4599_v2 }
  0xc0   : > { %1234 = vmatprep.mubr.bf16.mxu0 %v5545_v0  ;;  %v6040_v44 = vunpack.c.l.bf16 %v4595_v34  ;;  %v6042_v47 = vunpack.c.h.bf16 %v4595_v34  ;;  %v6102_v34 = vunpack.c.h.bf16 %v4597_v17  ;;  %v666_v42 = vsel %vm6109_vm11, %v663_v25, %v660_v33  ;;  %4623 = vmatprep.subr.bf16.mxu1 %v5545_v0  ;;  %v4752_v16 = vld [vmem:[#allocation7 + $0x58] sm:$0xff]  }
  0xc1   : > { %2827 = vmatpush2.bf16.msra.mxu0 %v4750_v37  ;;  %v721_v60 = vadd.f32 1.0, %v6130_v41  ;;  %v6162_v17 = vunpack.c.h.bf16 %v4599_v2  ;;  %v707_v19 = vadd.f32 1.0, %v706_v11  ;;  %v739_v22 = vadd.f32 1.0, %v6160_v15  ;;  %v4755_v37 = vld [vmem:[#allocation7 + $0x40] sm:$0xff]  }
  0xc2   : > { %v667_v52 = vadd.f32 1.0, %v6040_v44  ;;  %v676_v57 = vadd.f32 1.0, %v6042_v47  ;;  %v670_v26 = vmul.f32 -0.5, %v6040_v44  ;;  %v679_v29 = vmul.f32 -0.5, %v6042_v47  ;;  %2828 = vmatprep.subr.bf16.mxu0 %v5545_v0 }
  0xc3   : > { %v673_v46 = vand.u32 2147483647, %v6040_v44  ;;  %v682_v28 = vand.u32 2147483647, %v6042_v47  ;;  %4639 = vmatpush2.bf16.msra.mxu1 %v4751_v38  ;;  %v709_v33 = vand.u32 2147483647, %v6100_v30  ;;  %v708_v3 = vmul.f32 %v6100_v30, %v707_v19 }
  0xc4   : > { %4812 = vlog2.f32 %v667_v52  ;;  %v671_v31 = vadd.f32 1.0, %v670_v26  ;;  %v680_v36 = vadd.f32 1.0, %v679_v29  ;;  %v995_v52 = vpack.c.bf16 %v666_v42, %v657_v40  ;;  %4624 = vmatprep.subr.bf16.mxu1 %v5545_v0  ;;  %v4600_v29 = vld [vmem:[%s5722_s12 + $0x98] sm:$0xff]   ;;  %v4754_v40 = vld [vmem:[#allocation7 + $0x48] sm:$0xff]  }
  0xc5   : > { %4814 = vlog2.f32 %v676_v57  ;;  %vm6135_vm12 = vcmp.lt.f32.partialorder %v673_v46, 0.0004427343  ;;  %vm6139_vm13 = vcmp.lt.f32.partialorder %v682_v28, 0.0004427343  ;;  %2829 = vmatpush2.bf16.msra.mxu0 %v4751_v38  ;;  %v718_v18 = vand.u32 2147483647, %v6102_v34 }
  0xc6   : > { %v672_v48 = vmul.f32 %v6040_v44, %v671_v31  ;;  %v681_v54 = vmul.f32 %v6042_v47, %v680_v36  ;;  %2830 = vmatprep.subr.bf16.mxu0 %v5545_v0  ;;  %v724_v35 = vmul.f32 -0.5, %v6130_v41  ;;  %vm6194_vm0 = vcmp.lt.f32.partialorder %v709_v33, 0.0004427343 }
  0xc7   : > { %1235 = vmatmul.mubr.bf16.gmra.mxu0 %v990_v50  ;;  %v4596_v50 = vld [vmem:[%s5722_s12 + $0x78] sm:$0xff]   ;;  %4640 = vmatpush2.bf16.msra.mxu1 %v4752_v16  ;;  %vm6198_vm1 = vcmp.lt.f32.partialorder %v718_v18, 0.0004427343  ;;  %v751_v38 = vmul.f32 -0.5, %v6162_v17 }
  0xc8   : > { %1244 = vmatprep.mubr.bf16.mxu0 %v5545_v0  ;;  %v6070_v4 = vunpack.c.l.bf16 %v4596_v50  ;;  %v6072_v8 = vunpack.c.h.bf16 %v4596_v50  ;;  %v6132_v50 = vunpack.c.h.bf16 %v4598_v43  ;;  %4625 = vmatprep.subr.bf16.mxu1 %v5545_v0  ;;  %v6192_v43 = vunpack.c.h.bf16 %v4600_v29 }
  0xc9   : > { %2831 = vmatpush2.bf16.msra.mxu0 %v4752_v16  ;;  %v745_v16 = vand.u32 2147483647, %v6160_v15 }
  0xca   : > { %v685_v14 = vadd.f32 1.0, %v6070_v4  ;;  %v688_v49 = vmul.f32 -0.5, %v6070_v4  ;;  %v697_v51 = vmul.f32 -0.5, %v6072_v8  ;;  %v691_v6 = vand.u32 2147483647, %v6070_v4  ;;  %2832 = vmatprep.subr.bf16.mxu0 %v5545_v0 }
  0xcb   : > { %v700_v59 = vand.u32 2147483647, %v6072_v8  ;;  %4641 = vmatpush2.bf16.msra.mxu1 %v4753_v24  ;;  %v733_v31 = vmul.f32 -0.5, %v6132_v50  ;;  %v736_v44 = vand.u32 2147483647, %v6132_v50 }
  0xcc   : > { %4816 = vlog2.f32 %v685_v14  ;;  %v689_v47 = vadd.f32 1.0, %v688_v49  ;;  %v698_v53 = vadd.f32 1.0, %v697_v51  ;;  %v715_v14 = vmul.f32 -0.5, %v6102_v34  ;;  %4626 = vmatprep.subr.bf16.mxu1 %v5545_v0 }
  0xcd   : > { %vm6164_vm14 = vcmp.lt.f32.partialorder %v691_v6, 0.0004427343  ;;  %vm6168_vm15 = vcmp.lt.f32.partialorder %v700_v59, 0.0004427343  ;;  %2833 = vmatpush2.bf16.msra.mxu0 %v4753_v24  ;;  %v734_v46 = vadd.f32 1.0, %v733_v31 }
  0xce   : > { %v690_v10 = vmul.f32 %v6070_v4, %v689_v47  ;;  %v699_v61 = vmul.f32 %v6072_v8, %v698_v53  ;;  %v716_v20 = vadd.f32 1.0, %v715_v14  ;;  %2834 = vmatprep.subr.bf16.mxu0 %v5545_v0  ;;  %v742_v53 = vmul.f32 -0.5, %v6160_v15 }
  0xcf   : > { %1245 = vmatmul.mubr.bf16.gmra.mxu0 %v991_v12  ;;  %v694_v12 = vadd.f32 1.0, %v6072_v8  ;;  %4642 = vmatpush2.bf16.msra.mxu1 %v4754_v40  ;;  %v735_v47 = vmul.f32 %v6132_v50, %v734_v46  ;;  %vm6226_vm3 = vcmp.lt.f32.partialorder %v736_v44, 0.0004427343  ;;  %v769_v8 = vmul.f32 -0.5, %v6192_v43 }
  0xd0   : > { %1254 = vmatprep.mubr.bf16.mxu0 %v5545_v0  ;;  %4627 = vmatprep.subr.bf16.mxu1 %v5545_v0  ;;  %vm6248_vm4 = vcmp.lt.f32.partialorder %v745_v16, 0.0004427343 }
  0xd1   : > { %4818 = vlog2.f32 %v694_v12  ;;  %v4813_v21 = vpop.eup %4812  ;;  %2835 = vmatpush2.bf16.msra.mxu0 %v4754_v40 }
  0xd2   : > { %v4815_v45 = vpop.eup %4814  ;;  %4820 = vlog2.f32 %v703_v39  ;;  %v669_v55 = vmul.f32 0.6931472, %v4813_v21  ;;  %v717_v39 = vmul.f32 %v6102_v34, %v716_v20  ;;  %v6190_v21 = vunpack.c.l.bf16 %v4600_v29  ;;  %2836 = vmatprep.subr.bf16.mxu0 %v5545_v0 }
  0xd3   : > { %v678_v57 = vmul.f32 0.6931472, %v4815_v45  ;;  %4643 = vmatpush2.bf16.msra.mxu1 %v4755_v37  ;;  %v770_v29 = vadd.f32 1.0, %v769_v8 }
  0xd4   : > { %v675_v62 = vsel %vm6135_vm12, %v672_v48, %v669_v55  ;;  %v757_v28 = vadd.f32 1.0, %v6190_v21  ;;  %v760_v4 = vmul.f32 -0.5, %v6190_v21 }
  0xd5   : > { %v684_v63 = vsel %vm6139_vm13, %v681_v54, %v678_v57  ;;  %v4601_v54 = vld [vmem:[%s5722_s12 + $0xa0] sm:$0xff]   ;;  %v727_v57 = vand.u32 2147483647, %v6130_v41  ;;  %2837 = vmatpush2.bf16.msra.mxu0 %v4755_v37 }
  0xd6   : > { %v996_v13 = vpack.c.bf16 %v684_v63, %v675_v62 }
  0xd7   : > { %1255 = vmatmul.mubr.bf16.gmra.mxu0 %v992_v23  ;;  %v712_v23 = vadd.f32 1.0, %v6102_v34  ;;  %v725_v34 = vadd.f32 1.0, %v724_v35  ;;  %vm6222_vm2 = vcmp.lt.f32.partialorder %v727_v57, 0.0004427343  ;;  %v4603_v35 = vld [vmem:[%s5722_s12 + $0xb0] sm:$0xff]  }
  0xd8   : > { %1264 = vmatprep.mubr.bf16.mxu0 %v5545_v0  ;;  %v6272_v37 = vunpack.c.h.bf16 %v4603_v35 }
  0xd9   : > { %4822 = vlog2.f32 %v712_v23  ;;  %v4817_v56 = vpop.eup %4816  ;;  %v726_v58 = vmul.f32 %v6130_v41, %v725_v34  ;;  %v6270_v34 = vunpack.c.l.bf16 %v4603_v35 }
  0xda   : > { %4824 = vlog2.f32 %v721_v60  ;;  %v687_v9 = vmul.f32 0.6931472, %v4817_v56  ;;  %v6218_v56 = vunpack.c.l.bf16 %v4601_v54  ;;  %v820_v44 = vadd.f32 1.0, %v6272_v37 }
  0xdc   : > { %v693_v25 = vsel %vm6164_vm14, %v690_v10, %v687_v9  ;;  %v775_v6 = vadd.f32 1.0, %v6218_v56  ;;  %v754_v9 = vand.u32 2147483647, %v6162_v17 }
  0xde   : > { %v4819_v5 = vpop.eup %4818  ;;  %vm6252_vm5 = vcmp.lt.f32.partialorder %v754_v9, 0.0004427343 }
  0xdf   : > { %1265 = vmatmul.mubr.bf16.gmra.mxu0 %v993_v1  ;;  %v730_v1 = vadd.f32 1.0, %v6132_v50  ;;  %v696_v12 = vmul.f32 0.6931472, %v4819_v5  ;;  %v4821_v7 = vpop.eup %4820  ;;  %v743_v50 = vadd.f32 1.0, %v742_v53  ;;  %v752_v5 = vadd.f32 1.0, %v751_v38 }
  0xe0   : > { %1274 = vmatprep.mubr.bf16.mxu0 %v5545_v0  ;;  %v705_v42 = vmul.f32 0.6931472, %v4821_v7 }
  0xe1   : > { %4826 = vlog2.f32 %v730_v1  ;;  %v702_v26 = vsel %vm6168_vm15, %v699_v61, %v696_v12  ;;  %v6220_v1 = vunpack.c.h.bf16 %v4601_v54  ;;  %v744_v12 = vmul.f32 %v6160_v15, %v743_v50  ;;  %v4605_v50 = vld [vmem:[%s5722_s12 + $0xc0] sm:$0xff]  }
  0xe2   : > { %v997_v36 = vpack.c.bf16 %v702_v26, %v693_v25  ;;  %4828 = vlog2.f32 %v739_v22  ;;  %v711_v49 = vsel %vm6194_vm0, %v708_v3, %v705_v42  ;;  %v753_v20 = vmul.f32 %v6162_v17, %v752_v5 }
  0xe3   : > { %v784_v11 = vadd.f32 1.0, %v6220_v1  ;;  %v771_v42 = vmul.f32 %v6192_v43, %v770_v29  ;;  %v787_v45 = vmul.f32 -0.5, %v6220_v1  ;;  %v790_v53 = vand.u32 2147483647, %v6220_v1 }
  0xe4   : > { %v6312_v9 = vunpack.c.l.bf16 %v4605_v50  ;;  %v817_v15 = vand.u32 2147483647, %v6270_v34 }
  0xe5   : > { %v788_v57 = vadd.f32 1.0, %v787_v45  ;;  %vm6305_vm9 = vcmp.lt.f32.partialorder %v790_v53, 0.0004427343 }
  0xe6   : > { %v4823_v32 = vpop.eup %4822  ;;  %vm6344_vm12 = vcmp.lt.f32.partialorder %v817_v15, 0.0004427343 }
  0xe7   : > { %1275 = vmatmul.mubr.bf16.gmra.mxu0 %v994_v27  ;;  %v748_v27 = vadd.f32 1.0, %v6162_v17  ;;  %v714_v23 = vmul.f32 0.6931472, %v4823_v32  ;;  %v4825_v48 = vpop.eup %4824 }
  0xe8   : > { %1284 = vmatprep.mubr.bf16.mxu0 %v5545_v0  ;;  %v723_v62 = vmul.f32 0.6931472, %v4825_v48 }
  0xe9   : > { %4830 = vlog2.f32 %v748_v27  ;;  %v720_v51 = vsel %vm6198_vm1, %v717_v39, %v714_v23  ;;  %v761_v27 = vadd.f32 1.0, %v760_v4  ;;  %v772_v39 = vand.u32 2147483647, %v6192_v43 }
  0xea   : > { %v998_v60 = vpack.c.bf16 %v720_v51, %v711_v49  ;;  %4832 = vlog2.f32 %v757_v28  ;;  %v729_v10 = vsel %vm6222_vm2, %v726_v58, %v723_v62  ;;  %v778_v23 = vmul.f32 -0.5, %v6218_v56 }
  0xeb   : > { %v762_v40 = vmul.f32 %v6190_v21, %v761_v27  ;;  %vm6278_vm7 = vcmp.lt.f32.partialorder %v772_v39, 0.0004427343  ;;  %v811_v51 = vadd.f32 1.0, %v6270_v34  ;;  %v4606_v27 = vld [vmem:[%s5722_s12 + $0xc8] sm:$0xff]  }
  0xec   : > { %v779_v49 = vadd.f32 1.0, %v778_v23  ;;  %v6331_v39 = vunpack.c.l.bf16 %v4606_v27  ;;  %v6342_v23 = vunpack.c.h.bf16 %v4606_v27 }
  0xee   : > { %v4827_v55 = vpop.eup %4826  ;;  %v780_v41 = vmul.f32 %v6218_v56, %v779_v49  ;;  %v868_v15 = vmul.f32 -0.5, %v6331_v39 }
  0xef   : > { %1285 = vmatmul.mubr.bf16.gmra.mxu0 %v995_v52  ;;  %v766_v52 = vadd.f32 1.0, %v6192_v43  ;;  %v732_v63 = vmul.f32 0.6931472, %v4827_v55  ;;  %v4829_v59 = vpop.eup %4828  ;;  %v4604_v43 = vld [vmem:[%s5722_s12 + $0xb8] sm:$0xff]  }
  0xf0   : > { %1294 = vmatprep.mubr.bf16.mxu0 %v5545_v0  ;;  %v741_v24 = vmul.f32 0.6931472, %v4829_v59  ;;  %v6293_v38 = vunpack.c.l.bf16 %v4604_v43  ;;  %v789_v59 = vmul.f32 %v6220_v1, %v788_v57  ;;  %v6314_v1 = vunpack.c.h.bf16 %v4605_v50 }
  0xf1   : > { %4834 = vlog2.f32 %v766_v52  ;;  %v738_v61 = vsel %vm6226_vm3, %v735_v47, %v732_v63  ;;  %v781_v47 = vand.u32 2147483647, %v6218_v56  ;;  %v6296_v63 = vunpack.c.h.bf16 %v4604_v43 }
  0xf2   : > { %v999_v19 = vpack.c.bf16 %v738_v61, %v729_v10  ;;  %4836 = vlog2.f32 %v775_v6  ;;  %v747_v33 = vsel %vm6248_vm4, %v744_v12, %v741_v24  ;;  %v814_v56 = vmul.f32 -0.5, %v6270_v34 }
  0xf3   : > { %4838 = vlog2.f32 %v784_v11  ;;  %vm6301_vm8 = vcmp.lt.f32.partialorder %v781_v47, 0.0004427343  ;;  %v838_v16 = vadd.f32 1.0, %v6296_v63  ;;  %v856_v35 = vadd.f32 1.0, %v6314_v1 }
  0xf4   : > { %v835_v45 = vand.u32 2147483647, %v6293_v38  ;;  %v874_v47 = vadd.f32 1.0, %v6342_v23 }
  0xf6   : > { %v4831_v14 = vpop.eup %4830  ;;  %vm6370_vm14 = vcmp.lt.f32.partialorder %v835_v45, 0.0004427343  ;;  %v4610_v45 = vld [vmem:[%s5722_s12 + $0xe8] sm:$0xff]  }
  0xf7   : > { %1295 = vmatmul.mubr.bf16.gmra.mxu0 %v996_v13  ;;  %v4602_v13 = vld [vmem:[%s5722_s12 + $0xa8] sm:$0xff]   ;;  %v750_v7 = vmul.f32 0.6931472, %v4831_v14  ;;  %v4833_v32 = vpop.eup %4832 }
  0xf8   : > { %1304 = vmatprep.mubr.bf16.mxu0 %v5545_v0  ;;  %v6244_v22 = vunpack.c.l.bf16 %v4602_v13  ;;  %v6246_v25 = vunpack.c.h.bf16 %v4602_v13  ;;  %v759_v46 = vmul.f32 0.6931472, %v4833_v32  ;;  %v829_v13 = vadd.f32 1.0, %v6293_v38 }
  0xf9   : > { %v756_v18 = vsel %vm6252_vm5, %v753_v20, %v750_v7  ;;  %v823_v20 = vmul.f32 -0.5, %v6272_v37  ;;  %v847_v32 = vadd.f32 1.0, %v6312_v9 }
  0xfa   : > { %v793_v17 = vadd.f32 1.0, %v6244_v22  ;;  %v802_v3 = vadd.f32 1.0, %v6246_v25  ;;  %v1000_v30 = vpack.c.bf16 %v756_v18, %v747_v33  ;;  %v805_v62 = vmul.f32 -0.5, %v6246_v25 }
  0xfb   : > { %v808_v26 = vand.u32 2147483647, %v6246_v25  ;;  %v826_v18 = vand.u32 2147483647, %v6272_v37 }
  0xfc   : > { %4840 = vlog2.f32 %v793_v17  ;;  %v806_v14 = vadd.f32 1.0, %v805_v62  ;;  %v815_v17 = vadd.f32 1.0, %v814_v56  ;;  %v862_v56 = vand.u32 2147483647, %v6314_v1 }
  0xfd   : > { %4842 = vlog2.f32 %v802_v3  ;;  %v1032_v3 = vlaneseq  ;;  %vm6337_vm11 = vcmp.lt.f32.partialorder %v808_v26, 0.0004427343  ;;  %vm6352_vm13 = vcmp.lt.f32.partialorder %v826_v18, 0.0004427343 }
  0xfe   : > { %v4835_v31 = vpop.eup %4834  ;;  %4844 = vlog2.f32 %v811_v51  ;;  %v807_v29 = vmul.f32 %v6246_v25, %v806_v14  ;;  %v816_v48 = vmul.f32 %v6270_v34, %v815_v17  ;;  %v865_v34 = vadd.f32 1.0, %v6331_v39 }
  0xff   : > { %1305 = vmatmul.mubr.bf16.gmra.mxu0 %v997_v36  ;;  %v763_v36 = vand.u32 2147483647, %v6190_v21  ;;  %v768_v28 = vmul.f32 0.6931472, %v4835_v31  ;;  %v4837_v52 = vpop.eup %4836  ;;  %4846 = vlog2.f32 %v820_v44  ;;  %v6356_v43 = vshrl.u32 %v1032_v3, 7 }
 0x100   : > { %1314 = vmatprep.mubr.bf16.mxu0 %v5545_v0  ;;  %v4839_v58 = vpop.eup %4838  ;;  %v777_v5 = vmul.f32 0.6931472, %v4837_v52  ;;  %4848 = vlog2.f32 %v829_v13  ;;  %vm6411_vm1 = vcmp.lt.f32.partialorder %v862_v56, 0.0004427343 }
 0x101   : > { %vm6274_vm6 = vcmp.lt.f32.partialorder %v763_v36, 0.0004427343  ;;  %v774_v55 = vsel %vm6278_vm7, %v771_v42, %v768_v28  ;;  %v786_v6 = vmul.f32 0.6931472, %v4839_v58  ;;  %4850 = vlog2.f32 %v838_v16  ;;  %v4607_v28 = vld [vmem:[%s5722_s12 + $0xd0] sm:$0xff]  }
 0x102   : > { %v765_v54 = vsel %vm6274_vm6, %v762_v40, %v759_v46  ;;  %v783_v4 = vsel %vm6301_vm8, %v780_v41, %v777_v5  ;;  %v824_v36 = vadd.f32 1.0, %v823_v20  ;;  %v832_v42 = vmul.f32 -0.5, %v6293_v38 }
 0x103   : > { %v1001_v2 = vpack.c.bf16 %v774_v55, %v765_v54  ;;  %v792_v8 = vsel %vm6305_vm9, %v789_v59, %v786_v6  ;;  %v841_v46 = vmul.f32 -0.5, %v6296_v63  ;;  %4852 = vlog2.f32 %v847_v32  ;;  %v4608_v55 = vld [vmem:[%s5722_s12 + $0xd8] sm:$0xff]  }
 0x104   : > { %v1002_v33 = vpack.c.bf16 %v792_v8, %v783_v4  ;;  %4854 = vlog2.f32 %v856_v35  ;;  %v825_v54 = vmul.f32 %v6272_v37, %v824_v36  ;;  %v833_v44 = vadd.f32 1.0, %v832_v42  ;;  %v4609_v35 = vld [vmem:[%s5722_s12 + $0xe0] sm:$0xff]  }
 0x105   : > { %v844_v58 = vand.u32 2147483647, %v6296_v63  ;;  %v6368_v53 = vunpack.c.l.bf16 %v4607_v28  ;;  %v842_v62 = vadd.f32 1.0, %v841_v46  ;;  %v859_v37 = vmul.f32 -0.5, %v6314_v1 }
 0x106   : > { %v6376_v41 = vunpack.c.h.bf16 %v4607_v28  ;;  %v1034_v5 = vsub.s32 0, %v6356_v43  ;;  %v853_v6 = vand.u32 2147483647, %v6312_v9  ;;  %v6380_v59 = vunpack.c.l.bf16 %v4608_v55 }
 0x107   : > { %1315 = vmatmul.mubr.bf16.gmra.mxu0 %v998_v60  ;;  %v796_v60 = vmul.f32 -0.5, %v6244_v22  ;;  %4856 = vlog2.f32 %v865_v34  ;;  %v6385_v13 = vunpack.c.h.bf16 %v4608_v55  ;;  %vm6387_vm15 = vcmp.lt.f32.partialorder %v844_v58, 0.0004427343 }
 0x108   : > { %1324 = vmatprep.mubr.bf16.mxu0 %v5545_v0  ;;  %4858 = vlog2.f32 %v874_v47  ;;  %v883_v16 = vadd.f32 1.0, %v6368_v53  ;;  %v834_v4 = vmul.f32 %v6293_v38, %v833_v44  ;;  %v892_v20 = vadd.f32 1.0, %v6376_v41 }
 0x109   : > { %v797_v11 = vadd.f32 1.0, %v796_v60  ;;  %v4841_v12 = vpop.eup %4840  ;;  %v901_v27 = vadd.f32 1.0, %v6380_v59  ;;  %vm6405_vm0 = vcmp.lt.f32.partialorder %v853_v6, 0.0004427343  ;;  %v910_v32 = vadd.f32 1.0, %v6385_v13 }
 0x10a   : > { %v4843_v24 = vpop.eup %4842  ;;  %v1038_v3 = vsub.s32 1, %v6356_v43  ;;  %4860 = vlog2.f32 %v883_v16  ;;  %v869_v42 = vadd.f32 1.0, %v868_v15  ;;  %v6422_v21 = vunpack.c.l.bf16 %v4609_v35 }
 0x10b   : > { %v798_v7 = vmul.f32 %v6244_v22, %v797_v11  ;;  %v804_v31 = vmul.f32 0.6931472, %v4843_v24  ;;  %v4845_v49 = vpop.eup %4844  ;;  %v1030_v11 = vld [vmem:[%s9746_s2] sm:$0x3]  ;;  %4862 = vlog2.f32 %v892_v20  ;;  %v889_v43 = vand.u32 2147483647, %v6368_v53 }
 0x10c   : > { %v4847_v57 = vpop.eup %4846  ;;  %v813_v10 = vmul.f32 0.6931472, %v4845_v49  ;;  %v6396_v26 = vrot.slane %v1030_v11, %v1034_v5  ;;  %4864 = vlog2.f32 %v901_v27  ;;  %v6428_v49 = vunpack.c.h.bf16 %v4609_v35 }
 0x10d   : > { %v810_v52 = vsel %vm6337_vm11, %v807_v29, %v804_v31  ;;  %v822_v61 = vmul.f32 0.6931472, %v4847_v57  ;;  %4866 = vlog2.f32 %v910_v32  ;;  %v6434_v34 = vunpack.c.l.bf16 %v4610_v45 }
 0x10e   : > { %v819_v38 = vsel %vm6344_vm12, %v816_v48, %v813_v10  ;;  %v880_v48 = vand.u32 2147483647, %v6342_v23  ;;  %v904_v44 = vmul.f32 -0.5, %v6380_v59  ;;  %v6437_v58 = vunpack.c.h.bf16 %v4610_v45 }
 0x10f   : > { %1325 = vmatmul.mubr.bf16.gmra.mxu0 %v999_v19  ;;  %v799_v19 = vand.u32 2147483647, %v6244_v22  ;;  %v795_v22 = vmul.f32 0.6931472, %v4841_v12  ;;  %v4849_v12 = vpop.eup %4848  ;;  %v828_v29 = vsel %vm6352_vm13, %v825_v54, %v822_v61  ;;  %v898_v54 = vand.u32 2147483647, %v6376_v41 }
 0x110   : > { %1334 = vmatprep.mubr.bf16.mxu0 %v5545_v0  ;;  %v4851_v24 = vpop.eup %4850  ;;  %v1004_v25 = vpack.c.bf16 %v828_v29, %v819_v38  ;;  %v6440_v47 = vrot.slane %v1030_v11, %v1038_v3  ;;  %v6443_v60 = vmul.f32 %v6331_v39, %v869_v42  ;;  %vm6451_vm3 = vcmp.lt.f32.partialorder %v880_v48, 0.0004427343 }
 0x111   : > { %vm6333_vm10 = vcmp.lt.f32.partialorder %v799_v19, 0.0004427343  ;;  %v860_v19 = vadd.f32 1.0, %v859_v37  ;;  %v4853_v40 = vpop.eup %4852  ;;  %v928_v10 = vadd.f32 1.0, %v6428_v49  ;;  %v907_v14 = vand.u32 2147483647, %v6380_v59 }
 0x112   : > { %v801_v51 = vsel %vm6333_vm10, %v798_v7, %v795_v22  ;;  %v843_v7 = vmul.f32 %v6296_v63, %v842_v62  ;;  %v877_v63 = vmul.f32 -0.5, %v6342_v23  ;;  %v840_v22 = vmul.f32 0.6931472, %v4851_v24  ;;  %v4855_v46 = vpop.eup %4854 }
 0x113   : > { %v1003_v50 = vpack.c.bf16 %v810_v52, %v801_v51  ;;  %v861_v36 = vmul.f32 %v6314_v1, %v860_v19  ;;  %v886_v1 = vmul.f32 -0.5, %v6368_v53  ;;  %v895_v52 = vmul.f32 -0.5, %v6376_v41 }
 0x114   : > { %v878_v28 = vadd.f32 1.0, %v877_v63  ;;  %v846_v51 = vsel %vm6387_vm15, %v843_v7, %v840_v22  ;;  %v849_v55 = vmul.f32 0.6931472, %v4853_v40  ;;  %v858_v57 = vmul.f32 0.6931472, %v4855_v46  ;;  %v4857_v37 = vpop.eup %4856 }
 0x115   : > { %v887_v6 = vadd.f32 1.0, %v886_v1  ;;  %v4859_v61 = vpop.eup %4858  ;;  %v937_v56 = vadd.f32 1.0, %v6434_v34  ;;  %vm6462_vm4 = vcmp.lt.f32.partialorder %v889_v43, 0.0004427343  ;;  %vm6466_vm5 = vcmp.lt.f32.partialorder %v898_v54, 0.0004427343 }
 0x116   : > { %v946_v19 = vadd.f32 1.0, %v6437_v58  ;;  %v867_v20 = vmul.f32 0.6931472, %v4857_v37  ;;  %v913_v24 = vmul.f32 -0.5, %v6385_v13  ;;  %v916_v7 = vand.u32 2147483647, %v6385_v13 }
 0x117   : > { %1335 = vmatmul.mubr.bf16.gmra.mxu0 %v1000_v30  ;;  %v871_v30 = vand.u32 2147483647, %v6331_v39  ;;  %v896_v39 = vadd.f32 1.0, %v895_v52  ;;  %v876_v15 = vmul.f32 0.6931472, %v4859_v61  ;;  %v6474_v27 = vmul.f32 %v6368_v53, %v887_v6  ;;  %v4861_v29 = vpop.eup %4860 }
 0x118   : > { %1344 = vmatprep.mubr.bf16.mxu0 %v5545_v0  ;;  %v922_v38 = vmul.f32 -0.5, %v6422_v21  ;;  %vm6478_vm6 = vcmp.lt.f32.partialorder %v907_v14, 0.0004427343  ;;  %v4863_v18 = vpop.eup %4862  ;;  %v931_v53 = vmul.f32 -0.5, %v6428_v49  ;;  %v940_v35 = vmul.f32 -0.5, %v6434_v34 }
 0x119   : > { %vm6445_vm2 = vcmp.lt.f32.partialorder %v871_v30, 0.0004427343  ;;  %v897_v63 = vmul.f32 %v6376_v41, %v896_v39  ;;  %v4865_v22 = vpop.eup %4864  ;;  %vm6492_vm7 = vcmp.lt.f32.partialorder %v916_v7, 0.0004427343  ;;  %v934_v30 = vand.u32 2147483647, %v6428_v49 }
 0x11a   : > { %v873_v41 = vsel %vm6445_vm2, %v6443_v60, %v867_v20  ;;  %v4867_v40 = vpop.eup %4866  ;;  %v923_v42 = vadd.f32 1.0, %v922_v38  ;;  %v351_v46 = vld [vmem:[%s5722_s12 + $0xf8] sm:$0xf]  ;;  %v894_v48 = vmul.f32 0.6931472, %v4863_v18  ;;  %v932_v43 = vadd.f32 1.0, %v931_v53 }
 0x11b   : > { %v943_v52 = vand.u32 2147483647, %v6434_v34  ;;  %v952_v54 = vand.u32 2147483647, %v6437_v58  ;;  %vm6529_vm9 = vcmp.lt.f32.partialorder %v934_v30, 0.0004427343 }
 0x11c   : > { %v900_v6 = vsel %vm6466_vm5, %v897_v63, %v894_v48 }
 0x11d   : > { %vm6546_vm10 = vcmp.lt.f32.partialorder %v943_v52, 0.0004427343  ;;  %vm6550_vm11 = vcmp.lt.f32.partialorder %v952_v54, 0.0004427343 }
 0x11f   : > { %1345 = vmatmul.mubr.bf16.gmra.mxu0 %v1001_v2  ;;  %v850_v2 = vmul.f32 -0.5, %v6312_v9 }
 0x120   : > { %1354 = vmatprep.mubr.bf16.mxu0 %v5545_v0 }
 0x121   : > { %v851_v8 = vadd.f32 1.0, %v850_v2  ;;  %v919_v2 = vadd.f32 1.0, %v6422_v21 }
 0x123   : > { %v852_v31 = vmul.f32 %v6312_v9, %v851_v8  ;;  %v905_v8 = vadd.f32 1.0, %v904_v44  ;;  %4868 = vlog2.f32 %v919_v2  ;;  %v6511_v2 = vmul.f32 %v6422_v21, %v923_v42 }
 0x124   : > { %4870 = vlog2.f32 %v928_v10 }
 0x125   : > { %v855_v16 = vsel %vm6405_vm0, %v852_v31, %v849_v55  ;;  %4872 = vlog2.f32 %v937_v56  ;;  %v6484_v3 = vmul.f32 %v6380_v59, %v905_v8  ;;  %v914_v31 = vadd.f32 1.0, %v913_v24 }
 0x126   : > { %4874 = vlog2.f32 %v946_v19  ;;  %v925_v59 = vand.u32 2147483647, %v6422_v21  ;;  %v903_v55 = vmul.f32 0.6931472, %v4865_v22 }
 0x127   : > { %1355 = vmatmul.mubr.bf16.gmra.mxu0 %v1002_v33  ;;  %v831_v33 = vmul.f32 0.6931472, %v4849_v12  ;;  %v915_v44 = vmul.f32 %v6385_v13, %v914_v31 }
 0x128   : > { %1364 = vmatprep.mubr.bf16.mxu0 %v5545_v0  ;;  %vm6521_vm8 = vcmp.lt.f32.partialorder %v925_v59, 0.0004427343 }
 0x129   : > { %v837_v9 = vsel %vm6370_vm14, %v834_v4, %v831_v33  ;;  %v4611_v33 = vld [vmem:[%s5722_s12 + $0xf0] sm:$0xff]  }
 0x12a   : > { %v1005_v11 = vpack.c.bf16 %v846_v51, %v837_v9  ;;  %v6500_v45 = vunpack.c.l.bf16 %v4611_v33  ;;  %v949_v9 = vmul.f32 -0.5, %v6437_v58  ;;  %v6504_v1 = vunpack.c.h.bf16 %v4611_v33 }
 0x12b   : > { %v941_v51 = vadd.f32 1.0, %v940_v35 }
 0x12c   : > { %v958_v60 = vmul.f32 -0.5, %v6500_v45  ;;  %v955_v37 = vadd.f32 1.0, %v6500_v45  ;;  %v950_v13 = vadd.f32 1.0, %v949_v9  ;;  %v964_v61 = vadd.f32 1.0, %v6504_v1 }
 0x12d   : > { %v6534_v14 = vmul.f32 %v6434_v34, %v941_v51  ;;  %v967_v56 = vmul.f32 -0.5, %v6504_v1  ;;  %v961_v33 = vand.u32 2147483647, %v6500_v45 }
 0x12e   : > { %v959_v4 = vadd.f32 1.0, %v958_v60  ;;  %4876 = vlog2.f32 %v955_v37 }
 0x12f   : > { %1365 = vmatmul.mubr.bf16.gmra.mxu0 %v1003_v50  ;;  %v879_v50 = vmul.f32 %v6342_v23, %v878_v28  ;;  %v864_v23 = vsel %vm6411_vm1, %v861_v36, %v858_v57  ;;  %v885_v28 = vmul.f32 0.6931472, %v4861_v29  ;;  %v912_v57 = vmul.f32 0.6931472, %v4867_v40 }
 0x130   : > { %1374 = vmatprep.mubr.bf16.mxu0 %v5545_v0  ;;  %v1006_v17 = vpack.c.bf16 %v864_v23, %v855_v16  ;;  %v909_v23 = vsel %vm6478_vm6, %v6484_v3, %v903_v55  ;;  %v4869_v8 = vpop.eup %4868  ;;  %v6564_v29 = vmul.f32 %v6437_v58, %v950_v13  ;;  %4878 = vlog2.f32 %v964_v61 }
 0x131   : > { %v891_v5 = vsel %vm6462_vm4, %v6474_v27, %v885_v28  ;;  %v968_v18 = vadd.f32 1.0, %v967_v56  ;;  %v970_v3 = vand.u32 2147483647, %v6504_v1  ;;  %v6577_v58 = vmul.f32 %v6500_v45, %v959_v4 }
 0x132   : > { %v6554_v20 = vpack.c.bf16 %v900_v6, %v891_v5  ;;  %v921_v36 = vmul.f32 0.6931472, %v4869_v8  ;;  %vm6620_vm12 = vcmp.lt.f32.partialorder %v961_v33, 0.0004427343 }
 0x133   : > { %v6586_v45 = vmul.f32 %v6504_v1, %v968_v18  ;;  %vm6624_vm13 = vcmp.lt.f32.partialorder %v970_v3, 0.0004427343 }
 0x134   : > { %v927_v1 = vsel %vm6521_vm8, %v6511_v2, %v921_v36 }
 0x137   : > { %1375 = vmatmul.mubr.bf16.gmra.mxu0 %v1004_v25  ;;  %v882_v25 = vsel %vm6451_vm3, %v879_v50, %v876_v15  ;;  %v6514_v50 = vunpack.c.l.bf16 %v351_v46  ;;  %v4871_v15 = vpop.eup %4870 }
 0x138   : > { %1384 = vmatprep.mubr.bf16.mxu0 %v5545_v0  ;;  %v1007_v62 = vpack.c.bf16 %v882_v25, %v873_v41  ;;  %v930_v59 = vmul.f32 0.6931472, %v4871_v15 }
 0x139   : > { %v973_v24 = vadd.f32 1.0, %v6514_v50  ;;  %v976_v7 = vmul.f32 -0.5, %v6514_v50 }
 0x13b   : > { %4880 = vlog2.f32 %v973_v24  ;;  %v977_v40 = vadd.f32 1.0, %v976_v7 }
 0x13f   : > { %1385 = vmatmul.mubr.bf16.gmra.mxu0 %v1005_v11  ;;  %v6527_v11 = vmul.f32 %v6428_v49, %v932_v43  ;;  %v918_v49 = vsel %vm6492_vm7, %v915_v44, %v912_v57  ;;  %v979_v43 = vand.u32 2147483647, %v6514_v50 }
 0x140   : > { %1394 = vmatprep.mubr.bf16.mxu0 %v5545_v0  ;;  %v6566_v32 = vpack.c.bf16 %v918_v49, %v909_v23 }
 0x141   : > { %v936_v60 = vsel %vm6529_vm9, %v6527_v11, %v930_v59  ;;  %vm6642_vm14 = vcmp.lt.f32.partialorder %v979_v43, 0.0004427343 }
 0x142   : > { %v6634_v8 = vpack.c.bf16 %v936_v60, %v927_v1 }
 0x147   : > { %v1156_v21 = vpop.f32.mrf.mxu0  ;;  %1395 = vmatmul.mubr.bf16.gmra.mxu0 %v1006_v17  ;;  %v4873_v17 = vpop.eup %4872 }
 0x148   : > { %v6538_v16 = vadd.f32 %v1156_v21, %v6396_v26  ;;  %1404 = vmatprep.mubr.bf16.mxu0 %v5545_v0  ;;  %v4875_v53 = vpop.eup %4874  ;;  %v939_v48 = vmul.f32 0.6931472, %v4873_v17 }
 0x149   : > { %v1158_v19 = vpop.f32.mrf.mxu0  ;;  %v948_v9 = vmul.f32 0.6931472, %v4875_v53 }
 0x14a   : > { %v1473_v27 = vmul.f32 %v6538_v16, %v6538_v16  ;;  %v6561_v38 = vadd.f32 %v1158_v19, %v6440_v47  ;;  %v945_v10 = vsel %vm6546_vm10, %v6534_v14, %v939_v48  ;;  %v4877_v19 = vpop.eup %4876 }
 0x14b   : > { %v1160_v63 = vpop.f32.mrf.mxu0  ;;  %v4879_v17 = vpop.eup %4878 }
 0x14c   : > { %v1599_v35 = vmul.f32 %v1473_v27, %v6538_v16  ;;  %v1474_v22 = vmul.f32 %v6561_v38, %v6561_v38  ;;  %v6574_v41 = vadd.f32 %v1160_v63, %v6396_v26  ;;  %v966_v48 = vmul.f32 0.6931472, %v4879_v17 }
 0x14d   : > { %v1162_v31 = vpop.f32.mrf.mxu0 }
 0x14e   : > { %v1725_v25 = vmul.f32 0.044715, %v1599_v35  ;;  %v1600_v42 = vmul.f32 %v1474_v22, %v6561_v38  ;;  %v1475_v30 = vmul.f32 %v6574_v41, %v6574_v41  ;;  %v6583_v46 = vadd.f32 %v1162_v31, %v6440_v47 }
 0x14f   : > { %v1166_v28 = vpop.f32.mrf.mxu0  ;;  %1405 = vmatmul.mubr.bf16.gmra.mxu0 %v1007_v62  ;;  %v6604_v62 = vmul.f32 %v977_v40, %v6514_v50  ;;  %v954_v50 = vsel %vm6550_vm11, %v6564_v29, %v948_v9 }
 0x150   : > { %v1851_v51 = vadd.f32 %v1725_v25, %v6538_v16  ;;  %v1726_v52 = vmul.f32 0.044715, %v1600_v42  ;;  %v1601_v54 = vmul.f32 %v1475_v30, %v6574_v41  ;;  %v1476_v55 = vmul.f32 %v6583_v46, %v6583_v46  ;;  %1414 = vmatprep.mubr.bf16.mxu0 %v5545_v0  ;;  %v4881_v42 = vpop.eup %4880 }
 0x151   : > { %v6595_v57 = vadd.f32 %v1166_v28, %v6396_v26  ;;  %v1168_v44 = vpop.f32.mrf.mxu0  ;;  %v6640_v27 = vpack.c.bf16 %v954_v50, %v945_v10  ;;  %v957_v25 = vmul.f32 0.6931472, %v4877_v19 }
 0x152   : > { %v1977_v37 = vmul.f32 0.7978846, %v1851_v51  ;;  %v1852_v5 = vadd.f32 %v1726_v52, %v6561_v38  ;;  %v1727_v6 = vmul.f32 0.044715, %v1601_v54  ;;  %v1602_v13 = vmul.f32 %v1476_v55, %v6583_v46 }
 0x153   : > { %v1477_v61 = vmul.f32 %v6595_v57, %v6595_v57  ;;  %v6611_v21 = vadd.f32 %v1168_v44, %v6440_v47  ;;  %v1170_v2 = vpop.f32.mrf.mxu0 }
 0x154   : > { %4882 = vtanh.f32 %v1977_v37  ;;  %v1978_v11 = vmul.f32 0.7978846, %v1852_v5  ;;  %v1853_v39 = vadd.f32 %v1727_v6, %v6574_v41  ;;  %v1728_v56 = vmul.f32 0.044715, %v1602_v13 }
 0x155   : > { %v1603_v12 = vmul.f32 %v1477_v61, %v6595_v57  ;;  %v1478_v14 = vmul.f32 %v6611_v21, %v6611_v21  ;;  %v6632_v34 = vadd.f32 %v1170_v2, %v6396_v26  ;;  %v1172_v4 = vpop.f32.mrf.mxu0  ;;  %v975_v6 = vmul.f32 0.6931472, %v4881_v42 }
 0x156   : > { %v1979_v24 = vmul.f32 0.7978846, %v1853_v39  ;;  %v1854_v7 = vadd.f32 %v1728_v56, %v6583_v46  ;;  %v6638_v15 = vadd.f32 %v1172_v4, %v6440_v47  ;;  %4884 = vtanh.f32 %v1978_v11 }
 0x157   : > { %v1729_v63 = vmul.f32 0.044715, %v1603_v12  ;;  %v1604_v33 = vmul.f32 %v1478_v14, %v6611_v21  ;;  %v1479_v18 = vmul.f32 %v6632_v34, %v6632_v34  ;;  %v1176_v3 = vpop.f32.mrf.mxu0  ;;  %1415 = vmatmul.mubr.bf16.gmra.mxu0 %v6554_v20  ;;  %v963_v56 = vsel %vm6620_vm12, %v6577_v58, %v957_v25 }
 0x158   : > { %4886 = vtanh.f32 %v1979_v24  ;;  %v1980_v53 = vmul.f32 0.7978846, %v1854_v7  ;;  %v1480_v35 = vmul.f32 %v6638_v15, %v6638_v15  ;;  %v6653_v22 = vadd.f32 %v1176_v3, %v6396_v26  ;;  %1424 = vmatprep.mubr.bf16.mxu0 %v5545_v0 }
 0x159   : > { %v1855_v31 = vadd.f32 %v1729_v63, %v6595_v57  ;;  %v1730_v36 = vmul.f32 0.044715, %v1604_v33  ;;  %v1605_v59 = vmul.f32 %v1479_v18, %v6632_v34  ;;  %v1178_v40 = vpop.f32.mrf.mxu0  ;;  %v972_v12 = vsel %vm6624_vm13, %v6586_v45, %v966_v48 }
 0x15a   : > { %v1606_v20 = vmul.f32 %v1480_v35, %v6638_v15  ;;  %v1481_v30 = vmul.f32 %v6653_v22, %v6653_v22  ;;  %v6662_v28 = vadd.f32 %v1178_v40, %v6440_v47  ;;  %4888 = vtanh.f32 %v1980_v53 }
 0x15b   : > { %v1981_v9 = vmul.f32 0.7978846, %v1855_v31  ;;  %v1856_v43 = vadd.f32 %v1730_v36, %v6611_v21  ;;  %v1731_v51 = vmul.f32 0.044715, %v1605_v59  ;;  %v1180_v52 = vpop.f32.mrf.mxu0  ;;  %v6697_v45 = vsel %vm6642_vm14, %v6604_v62, %v975_v6 }
 0x15c   : > { %v1732_v54 = vmul.f32 0.044715, %v1606_v20  ;;  %v1607_v55 = vmul.f32 %v1481_v30, %v6653_v22  ;;  %v1482_v44 = vmul.f32 %v6662_v28, %v6662_v28  ;;  %v6669_v1 = vadd.f32 %v1180_v52, %v6396_v26 }
 0x15d   : > { %4890 = vtanh.f32 %v1981_v9  ;;  %v1982_v60 = vmul.f32 0.7978846, %v1856_v43  ;;  %v1857_v37 = vadd.f32 %v1731_v51, %v6632_v34  ;;  %v1182_v5 = vpop.f32.mrf.mxu0  ;;  %v6699_v63 = vpack.c.bf16 %v972_v12, %v963_v56 }
 0x15e   : > { %v1858_v13 = vadd.f32 %v1732_v54, %v6638_v15  ;;  %v1733_v61 = vmul.f32 0.044715, %v1607_v55  ;;  %v1608_v2 = vmul.f32 %v1482_v44, %v6662_v28  ;;  %v1483_v10 = vmul.f32 %v6669_v1, %v6669_v1 }
 0x15f   : > { %v1983_v50 = vmul.f32 0.7978846, %v1857_v37  ;;  %v6677_v11 = vadd.f32 %v1182_v5, %v6440_v47  ;;  %v1186_v39 = vpop.f32.mrf.mxu0  ;;  %1425 = vmatmul.mubr.bf16.gmra.mxu0 %v6566_v32  ;;  %v1013_v36 = vpack.c.bf16 %v6697_v45, %v6697_v45 }
 0x160   : > { %v1984_v14 = vmul.f32 0.7978846, %v1858_v13  ;;  %v1859_v4 = vadd.f32 %v1733_v61, %v6653_v22  ;;  %v1734_v19 = vmul.f32 0.044715, %v1608_v2  ;;  %v1609_v24 = vmul.f32 %v1483_v10, %v6669_v1  ;;  %1434 = vmatprep.mubr.bf16.mxu0 %v5545_v0 }
 0x161   : > { %v4883_v7 = vpop.eup %4882  ;;  %4892 = vtanh.f32 %v1983_v50  ;;  %v1484_v32 = vmul.f32 %v6677_v11, %v6677_v11  ;;  %v6692_v23 = vadd.f32 %v1186_v39, %v6396_v26  ;;  %v1188_v58 = vpop.f32.mrf.mxu0 }
 0x162   : > { %v2229_v49 = vadd.f32 1.0, %v4883_v7  ;;  %4894 = vtanh.f32 %v1982_v60  ;;  %v1985_v17 = vmul.f32 0.7978846, %v1859_v4  ;;  %v1735_v33 = vmul.f32 0.044715, %v1609_v24 }
 0x163   : > { %v1610_v18 = vmul.f32 %v1484_v32, %v6677_v11  ;;  %v1485_v3 = vmul.f32 %v6692_v23, %v6692_v23  ;;  %v6705_v53 = vadd.f32 %v1188_v58, %v6440_v47  ;;  %v1190_v35 = vpop.f32.mrf.mxu0  ;;  %v4885_v31 = vpop.eup %4884  ;;  %4896 = vtanh.f32 %v1984_v14 }
 0x164   : > { %v6708_v62 = vadd.f32 %v1734_v19, %v6662_v28  ;;  %v6711_v29 = vadd.f32 %v1190_v35, %v6396_v26  ;;  %v2355_v40 = vmul.f32 0.5, %v2229_v49  ;;  %v1861_v25 = vadd.f32 %v1735_v33, %v6669_v1 }
 0x165   : > { %v4887_v59 = vpop.eup %4886  ;;  %v1611_v42 = vmul.f32 %v1485_v3, %v6692_v23  ;;  %v1486_v20 = vmul.f32 %v6705_v53, %v6705_v53  ;;  %v1192_v30 = vpop.f32.mrf.mxu0  ;;  %4898 = vtanh.f32 %v1985_v17  ;;  %v6724_v51 = vmul.f32 0.044715, %v1610_v18 }
 0x166   : > { %v2231_v48 = vadd.f32 1.0, %v4887_v59  ;;  %v1487_v9 = vmul.f32 %v6711_v29, %v6711_v29  ;;  %v6722_v43 = vadd.f32 %v1192_v30, %v6440_v47  ;;  %v2230_v44 = vadd.f32 1.0, %v4885_v31 }
 0x167   : > { %v1737_v52 = vmul.f32 0.044715, %v1611_v42  ;;  %v1612_v54 = vmul.f32 %v1486_v20, %v6705_v53  ;;  %v1196_v55 = vpop.f32.mrf.mxu0  ;;  %1435 = vmatmul.mubr.bf16.gmra.mxu0 %v6634_v8  ;;  %v4889_v60 = vpop.eup %4888  ;;  %v6736_v61 = vmul.f32 %v2355_v40, %v6538_v16  ;;  %v1987_v2 = vmul.f32 0.7978846, %v1861_v25 }
 0x168   : > { %v2357_v37 = vmul.f32 0.5, %v2231_v48  ;;  %v1613_v5 = vmul.f32 %v1487_v9, %v6711_v29  ;;  %v1488_v6 = vmul.f32 %v6722_v43, %v6722_v43  ;;  %v6732_v13 = vadd.f32 %v1196_v55, %v6396_v26  ;;  %1444 = vmatprep.mubr.bf16.mxu0 %v5545_v0 }
 0x169   : > { %v1863_v10 = vadd.f32 %v1737_v52, %v6692_v23  ;;  %v1738_v8 = vmul.f32 0.044715, %v1612_v54  ;;  %v1198_v50 = vpop.f32.mrf.mxu0  ;;  %v2356_v17 = vmul.f32 0.5, %v2230_v44  ;;  %4900 = vtanh.f32 %v1987_v2 }
 0x16a   : > { %v4891_v39 = vpop.eup %4890  ;;  %v6740_v56 = vmul.f32 %v2357_v37, %v6574_v41  ;;  %v1739_v12 = vmul.f32 0.044715, %v1613_v5  ;;  %v1614_v14 = vmul.f32 %v1488_v6, %v6722_v43  ;;  %v1489_v4 = vmul.f32 %v6732_v13, %v6732_v13 }
 0x16b   : > { %v2233_v19 = vadd.f32 1.0, %v4891_v39  ;;  %v1989_v24 = vmul.f32 0.7978846, %v1863_v10  ;;  %v1864_v16 = vadd.f32 %v1738_v8, %v6705_v53  ;;  %v6747_v7 = vadd.f32 %v1198_v50, %v6440_v47  ;;  %v1200_v32 = vpop.f32.mrf.mxu0 }
 0x16c   : > { %v1865_v58 = vadd.f32 %v1739_v12, %v6711_v29  ;;  %v1740_v49 = vmul.f32 0.044715, %v1614_v14  ;;  %v1615_v41 = vmul.f32 %v1489_v4, %v6732_v13  ;;  %v2232_v35 = vadd.f32 1.0, %v4889_v60 }
 0x16d   : > { %v1990_v33 = vmul.f32 0.7978846, %v1864_v16  ;;  %v1490_v18 = vmul.f32 %v6747_v7, %v6747_v7  ;;  %v1202_v3 = vpop.f32.mrf.mxu0  ;;  %v6755_v42 = vadd.f32 %v1200_v32, %v6396_v26  ;;  %v2607_v30 = vpack.c.bf16 %v6740_v56, %v6736_v61 }
 0x16e   : > { %v4893_v31 = vpop.eup %4892  ;;  %v1991_v59 = vmul.f32 0.7978846, %v1865_v58  ;;  %v1866_v40 = vadd.f32 %v1740_v49, %v6722_v43  ;;  %v1741_v25 = vmul.f32 0.044715, %v1615_v41  ;;  %v6761_v48 = vmul.f32 0.5, %v2233_v19 }
 0x16f   : > { %v6757_v20 = vpop.eup %4894  ;;  %4902 = vtanh.f32 %v1989_v24  ;;  %v1616_v9 = vmul.f32 %v1490_v18, %v6747_v7  ;;  %v1206_v52 = vpop.f32.mrf.mxu0  ;;  %1445 = vmatmul.mubr.bf16.gmra.mxu0 %v6640_v27  ;;  %v6765_v54 = vadd.f32 1.0, %v4893_v31  ;;  %v1491_v60 = vmul.f32 %v6755_v42, %v6755_v42 }
 0x170   : > { %v1992_v55 = vmul.f32 0.7978846, %v1866_v40  ;;  %v1867_v44 = vadd.f32 %v1741_v25, %v6732_v13  ;;  %1454 = vmatprep.mubr.bf16.mxu0 %v5545_v0  ;;  %v6771_v37 = vpop.eup %4896  ;;  %4904 = vtanh.f32 %v1990_v33  ;;  %v6774_v6 = vadd.f32 %v1202_v3, %v6440_v47 }
 0x171   : > { %v1742_v5 = vmul.f32 0.044715, %v1616_v9  ;;  %v6777_v2 = vadd.f32 %v1206_v52, %v6396_v26  ;;  %v1208_v27 = vpop.f32.mrf.mxu0  ;;  %4906 = vtanh.f32 %v1991_v59  ;;  %v1617_v8 = vmul.f32 %v1491_v60, %v6755_v42 }
 0x172   : > { %v1993_v10 = vmul.f32 0.7978846, %v1867_v44  ;;  %v6781_v50 = vadd.f32 %v1208_v27, %v6440_v47  ;;  %v6783_v39 = vpop.eup %4898  ;;  %4908 = vtanh.f32 %v1992_v55  ;;  %v1492_v14 = vmul.f32 %v6774_v6, %v6774_v6 }
 0x173   : > { %v1868_v12 = vadd.f32 %v1742_v5, %v6747_v7  ;;  %v1493_v4 = vmul.f32 %v6777_v2, %v6777_v2  ;;  %v1210_v19 = vpop.f32.mrf.mxu0  ;;  %v1743_v24 = vmul.f32 0.044715, %v1617_v8  ;;  %v2358_v18 = vmul.f32 0.5, %v2232_v35 }
 0x174   : > { %4910 = vtanh.f32 %v1993_v10  ;;  %v1494_v16 = vmul.f32 %v6781_v50, %v6781_v50  ;;  %v6793_v32 = vadd.f32 %v1210_v19, %v6396_v26  ;;  %v1618_v49 = vmul.f32 %v1492_v14, %v6774_v6 }
 0x175   : > { %v1994_v58 = vmul.f32 0.7978846, %v1868_v12  ;;  %v1619_v41 = vmul.f32 %v1493_v4, %v6777_v2  ;;  %v1212_v33 = vpop.f32.mrf.mxu0  ;;  %v1869_v3 = vadd.f32 %v1743_v24, %v6755_v42  ;;  %v2482_v55 = vmul.f32 %v2356_v17, %v6561_v38 }
 0x176   : > { %v1620_v31 = vmul.f32 %v1494_v16, %v6781_v50  ;;  %v1495_v59 = vmul.f32 %v6793_v32, %v6793_v32  ;;  %v6802_v40 = vadd.f32 %v1212_v33, %v6440_v47  ;;  %v1744_v25 = vmul.f32 0.044715, %v1618_v49  ;;  %v6816_v38 = vpop.eup %4900 }
 0x177   : > { %4912 = vtanh.f32 %v1994_v58  ;;  %v1745_v9 = vmul.f32 0.044715, %v1619_v41  ;;  %v1216_v52 = vpop.f32.mrf.mxu0  ;;  %1455 = vmatmul.mubr.bf16.gmra.mxu0 %v6699_v63  ;;  %v1995_v44 = vmul.f32 0.7978846, %v1869_v3  ;;  %v2484_v63 = vmul.f32 %v2358_v18, %v6583_v46 }
 0x178   : > { %v1746_v35 = vmul.f32 0.044715, %v1620_v31  ;;  %v1621_v60 = vmul.f32 %v1495_v59, %v6793_v32  ;;  %v1496_v5 = vmul.f32 %v6802_v40, %v6802_v40  ;;  %1464 = vmatprep.mubr.bf16.mxu0 %v5545_v0  ;;  %v1870_v27 = vadd.f32 %v1744_v25, %v6774_v6 }
 0x179   : > { %v1871_v10 = vadd.f32 %v1745_v9, %v6777_v2  ;;  %v6813_v8 = vadd.f32 %v1216_v52, %v6396_v26  ;;  %v1218_v12 = vpop.f32.mrf.mxu0  ;;  %4914 = vtanh.f32 %v1995_v44  ;;  %v6832_v3 = vmul.f32 0.5, %v6765_v54 }
 0x17a   : > { %v1872_v17 = vadd.f32 %v1746_v35, %v6781_v50  ;;  %v1747_v14 = vmul.f32 0.044715, %v1621_v60  ;;  %v1622_v4 = vmul.f32 %v1496_v5, %v6802_v40  ;;  %v1996_v19 = vmul.f32 0.7978846, %v1870_v27 }
 0x17b   : > { %v1997_v0 = vmul.f32 0.7978846, %v1871_v10  ;;  %v1497_v24 = vmul.f32 %v6813_v8, %v6813_v8  ;;  %v6823_v16 = vadd.f32 %v1218_v12, %v6440_v47  ;;  %v1220_v58 = vpop.f32.mrf.mxu0  ;;  %v2608_v60 = vpack.c.bf16 %v2484_v63, %v2482_v55 }
 0x17c   : > { %v6825_v49 = vpop.eup %4902  ;;  %v1998_v46 = vmul.f32 0.7978846, %v1872_v17  ;;  %v1873_v41 = vadd.f32 %v1747_v14, %v6793_v32  ;;  %v1748_v33 = vmul.f32 0.044715, %v1622_v4  ;;  %v6829_v18 = vadd.f32 %v1220_v58, %v6396_v26 }
 0x17d   : > { %4916 = vtanh.f32 %v1996_v19  ;;  %v1623_v31 = vmul.f32 %v1497_v24, %v6813_v8  ;;  %v1498_v59 = vmul.f32 %v6823_v16, %v6823_v16  ;;  %v1222_v25 = vpop.f32.mrf.mxu0  ;;  %v6837_v9 = vpop.eup %4904  ;;  %v1862_v45 = vadd.f32 %v6724_v51, %v6677_v11 }
 0x17e   : > { %v1999_v52 = vmul.f32 0.7978846, %v1873_v41  ;;  %v1874_v44 = vadd.f32 %v1748_v33, %v6802_v40  ;;  %v1499_v35 = vmul.f32 %v6829_v18, %v6829_v18  ;;  %v6842_v5 = vpop.eup %4906  ;;  %4918 = vtanh.f32 %v1997_v0 }
 0x17f   : > { %v1749_v54 = vmul.f32 0.044715, %v1623_v31  ;;  %v1624_v27 = vmul.f32 %v1498_v59, %v6823_v16  ;;  %v6846_v10 = vadd.f32 %v1222_v25, %v6440_v47  ;;  %v1226_v12 = vpop.f32.mrf.mxu0  ;;  %1465 = vmatmul.mubr.bf16.gmra.mxu0 %v1013_v36  ;;  %v6851_v17 = vpop.eup %4908  ;;  %4920 = vtanh.f32 %v1998_v46 }
 0x180   : > { %v2000_v14 = vmul.f32 0.7978846, %v1874_v44  ;;  %v1625_v55 = vmul.f32 %v1499_v35, %v6829_v18  ;;  %v6855_v63 = vadd.f32 %v1226_v12, %v6396_v26  ;;  %2838 = vmatprep.mubr.bf16.mxu0 %v2608_v60  ;;  %4922 = vtanh.f32 %v1999_v52 }
 0x181   : > { %v6857_v4 = vpop.eup %4910  ;;  %v1875_v19 = vadd.f32 %v1749_v54, %v6813_v8  ;;  %v1750_v0 = vmul.f32 0.044715, %v1624_v27  ;;  %v1500_v24 = vmul.f32 %v6846_v10, %v6846_v10  ;;  %v1228_v36 = vpop.f32.mrf.mxu0  ;;  %v1986_v41 = vmul.f32 0.7978846, %v6708_v62 }
 0x182   : > { %9893 = vst [vmem:[#allocation12_spill] sm:$0xff] %v6855_v63  ;;  %v1751_v58 = vmul.f32 0.044715, %v1625_v55  ;;  %v1501_v46 = vmul.f32 %v6855_v63, %v6855_v63  ;;  %v1988_v25 = vmul.f32 0.7978846, %v1862_v45  ;;  %v6874_v52 = vadd.f32 %v1228_v36, %v6440_v47 }
 0x183   : > { %v2001_v33 = vmul.f32 0.7978846, %v1875_v19  ;;  %v1876_v31 = vadd.f32 %v1750_v0, %v6823_v16  ;;  %v1626_v59 = vmul.f32 %v1500_v24, %v6846_v10  ;;  %v1230_v44 = vpop.f32.mrf.mxu0  ;;  %4924 = vtanh.f32 %v1986_v41 }
 0x184   : > { %v6869_v35 = vpop.eup %4912  ;;  %v1877_v60 = vadd.f32 %v1751_v58, %v6829_v18  ;;  %v1627_v51 = vmul.f32 %v1501_v46, %v6855_v63  ;;  %9894 = vst [vmem:[#allocation13_spill] sm:$0xff] %v6874_v52  ;;  %4926 = vtanh.f32 %v2000_v14  ;;  %v2237_v27 = vadd.f32 1.0, %v6783_v39 }
 0x185   : > { %v2002_v54 = vmul.f32 0.7978846, %v1876_v31  ;;  %v1752_v62 = vmul.f32 0.044715, %v1626_v59  ;;  %v1232_v12 = vpop.f32.mrf.mxu0  ;;  %v6879_v55 = vmul.f32 %v6761_v48, %v6595_v57  ;;  %4928 = vtanh.f32 %v1988_v25 }
 0x186   : > { %v1753_v19 = vmul.f32 0.044715, %v1627_v51  ;;  %v1502_v0 = vmul.f32 %v6874_v52, %v6874_v52  ;;  %v6883_v24 = vpop.eup %4914  ;;  %v2003_v45 = vmul.f32 0.7978846, %v1877_v60  ;;  %v2239_v14 = vadd.f32 1.0, %v6816_v38 }
 0x187   : > { %v1878_v36 = vadd.f32 %v1752_v62, %v6846_v10  ;;  %v2363_v58 = vmul.f32 0.5, %v2237_v27  ;;  %v1236_v46 = vpop.f32.mrf.mxu0  ;;  %2839 = vmatmul.mubr.bf16.vlgmr.msra.gmra.mxu0 %v2607_v30  ;;  %4930 = vtanh.f32 %v2001_v33  ;;  %v6893_v39 = vadd.f32 %v1230_v44, %v6396_v26 }
 0x188   : > { %v1879_v57 = vadd.f32 %v1753_v19, %v6855_v63  ;;  %v1628_v48 = vmul.f32 %v1502_v0, %v6874_v52  ;;  %v6897_v41 = vmul.f32 %v6832_v3, %v6632_v34  ;;  %4932 = vtanh.f32 %v2002_v54 }
 0x189   : > { %v2004_v38 = vmul.f32 0.7978846, %v1878_v36  ;;  %v6900_v31 = vadd.f32 %v1232_v12, %v6440_v47  ;;  %v1238_v59 = vpop.f32.mrf.mxu0  ;;  %v2365_v30 = vmul.f32 0.5, %v2239_v14  ;;  %v1503_v33 = vmul.f32 %v6893_v39, %v6893_v39 }
 0x18a   : > { %v6902_v61 = vpop.eup %4916  ;;  %v1754_v56 = vmul.f32 0.044715, %v1628_v48  ;;  %v6907_v25 = vadd.f32 %v1236_v46, %v6396_v26  ;;  %4934 = vtanh.f32 %v2003_v45  ;;  %v6910_v34 = vmul.f32 %v2363_v58, %v6653_v22 }
 0x18b   : > { %v1504_v3 = vmul.f32 %v6900_v31, %v6900_v31  ;;  %v2234_v44 = vadd.f32 1.0, %v6757_v20  ;;  %v1240_v60 = vpop.f32.mrf.mxu0  ;;  %v6915_v51 = vpop.eup %4918  ;;  %v2005_v54 = vmul.f32 0.7978846, %v1879_v57  ;;  %v1629_v27 = vmul.f32 %v1503_v33, %v6893_v39 }
 0x18c   : > { %v1880_v62 = vadd.f32 %v1754_v56, %v6874_v52  ;;  %v1505_v12 = vmul.f32 %v6907_v25, %v6907_v25  ;;  %v6921_v19 = vpop.eup %4920  ;;  %4936 = vtanh.f32 %v2004_v38  ;;  %v2236_v0 = vadd.f32 1.0, %v6771_v37 }
 0x18d   : > { %v1630_v22 = vmul.f32 %v1504_v3, %v6900_v31  ;;  %v2360_v45 = vmul.f32 0.5, %v2234_v44  ;;  %v1242_v20 = vpop.f32.mrf.mxu0  ;;  %v6926_v36 = vmul.f32 %v2365_v30, %v6669_v1  ;;  %v1755_v14 = vmul.f32 0.044715, %v1629_v27  ;;  %v6930_v57 = vpop.eup %4922 }
 0x18e   : > { %v1631_v58 = vmul.f32 %v1505_v12, %v6907_v25  ;;  %v2242_v46 = vadd.f32 1.0, %v6837_v9  ;;  %v2006_v48 = vmul.f32 0.7978846, %v1880_v62  ;;  %v2362_v33 = vmul.f32 0.5, %v2236_v0 }
 0x18f   : > { %v1756_v56 = vmul.f32 0.044715, %v1630_v22  ;;  %v2244_v38 = vadd.f32 1.0, %v6851_v17  ;;  %v1246_v3 = vpop.f32.mrf.mxu0  ;;  %v1881_v37 = vadd.f32 %v1755_v14, %v6893_v39  ;;  %v2486_v63 = vmul.f32 %v2360_v45, %v6611_v21 }
 0x190   : > { %v1757_v44 = vmul.f32 0.044715, %v1631_v58  ;;  %v2368_v1 = vmul.f32 0.5, %v2242_v46  ;;  %v4925_v30 = vpop.eup %4924  ;;  %v2488_v12 = vmul.f32 %v2362_v33, %v6638_v15  ;;  %v6938_v52 = vadd.f32 %v1238_v59, %v6440_v47 }
 0x191   : > { %v1882_v27 = vadd.f32 %v1756_v56, %v6900_v31  ;;  %v2370_v9 = vmul.f32 0.5, %v2244_v38  ;;  %v1248_v62 = vpop.f32.mrf.mxu0  ;;  %v6940_v22 = vpop.eup %4926  ;;  %4938 = vtanh.f32 %v2005_v54  ;;  %v2238_v17 = vadd.f32 1.0, %v4925_v30 }
 0x192   : > { %v2007_v0 = vmul.f32 0.7978846, %v1881_v37  ;;  %v1883_v14 = vadd.f32 %v1757_v44, %v6907_v25  ;;  %v4929_v58 = vpop.eup %4928  ;;  %v2611_v21 = vpack.c.bf16 %v6926_v36, %v6910_v34  ;;  %v2610_v46 = vpack.c.bf16 %v2488_v12, %v2486_v63 }
 0x193   : > { %v2008_v45 = vmul.f32 0.7978846, %v1882_v27  ;;  %v1506_v15 = vmul.f32 %v6938_v52, %v6938_v52  ;;  %v6947_v56 = vpop.f32.mrf.mxu0  ;;  %v2240_v59 = vadd.f32 1.0, %v4929_v58  ;;  %v2364_v33 = vmul.f32 0.5, %v2238_v17 }
 0x194   : > { %4940 = vtanh.f32 %v2006_v48  ;;  %v2494_v54 = vmul.f32 %v2368_v1, %v6705_v53  ;;  %v6950_v38 = vpop.eup %4930  ;;  %2846 = vmatprep.mubr.bf16.mxu0 %v2610_v46  ;;  %v2496_v37 = vmul.f32 %v2370_v9, %v6722_v43  ;;  %v2241_v63 = vadd.f32 1.0, %v6825_v49 }
 0x195   : > { %4942 = vtanh.f32 %v2007_v0  ;;  %v1632_v34 = vmul.f32 %v1506_v15, %v6938_v52  ;;  %v6955_v36 = vpop.f32.mrf.mxu0  ;;  %v6957_v44 = vpop.eup %4932  ;;  %v2366_v30 = vmul.f32 0.5, %v2240_v59  ;;  %v2009_v27 = vmul.f32 0.7978846, %v1883_v14 }
 0x196   : > { %4944 = vtanh.f32 %v2008_v45  ;;  %v2243_v48 = vadd.f32 1.0, %v6842_v5  ;;  %v2367_v1 = vmul.f32 0.5, %v2241_v63  ;;  %v6961_v12 = vadd.f32 %v1240_v60, %v6396_v26 }
 0x197   : > { %v1758_v53 = vmul.f32 0.044715, %v1632_v34  ;;  %v6964_v43 = vadd.f32 %v1242_v20, %v6440_v47  ;;  %v6966_v9 = vpop.f32.mrf.mxu0  ;;  %v6968_v49 = vpop.eup %4934  ;;  %v2490_v17 = vmul.f32 %v2364_v33, %v6662_v28  ;;  %v2492_v0 = vmul.f32 %v2366_v30, %v6677_v11 }
 0x198   : > { %v6973_v14 = vadd.f32 %v1246_v3, %v6396_v26  ;;  %v2609_v5 = vpack.c.bf16 %v6897_v41, %v6879_v55  ;;  %v2369_v58 = vmul.f32 0.5, %v2243_v48  ;;  %v1507_v20 = vmul.f32 %v6961_v12, %v6961_v12 }
 0x199   : > { %v1884_v60 = vadd.f32 %v1758_v53, %v6938_v52  ;;  %v1508_v45 = vmul.f32 %v6964_v43, %v6964_v43  ;;  %v6982_v46 = vpop.f32.mrf.mxu0  ;;  %v6984_v28 = vpop.eup %4936  ;;  %v2612_v11 = vpack.c.bf16 %v2492_v0, %v2490_v17  ;;  %v2614_v15 = vpack.c.bf16 %v2496_v37, %v2494_v54 }
 0x19a   : > { %v1509_v3 = vmul.f32 %v6973_v14, %v6973_v14  ;;  %2847 = vmatmul.mubr.bf16.gmra.mxu0 %v2609_v5  ;;  %v2246_v55 = vadd.f32 1.0, %v6869_v35  ;;  %v2493_v41 = vmul.f32 %v2367_v1, %v6692_v23  ;;  %v1633_v59 = vmul.f32 %v1507_v20, %v6961_v12 }
 0x19b   : > { %v1634_v33 = vmul.f32 %v1508_v45, %v6964_v43  ;;  %v2248_v34 = vadd.f32 1.0, %v6902_v61  ;;  %v6993_v63 = vpop.f32.mrf.mxu0  ;;  %2854 = vmatprep.mubr.bf16.mxu1 %v2612_v11  ;;  %v2010_v30 = vmul.f32 0.7978846, %v1884_v60  ;;  %v6997_v48 = vadd.f32 %v1248_v62, %v6440_v47 }
 0x19c   : > { %v1635_v54 = vmul.f32 %v1509_v3, %v6973_v14  ;;  %v2372_v37 = vmul.f32 0.5, %v2246_v55  ;;  %2855 = vmatmul.mubr.bf16.vlgmr.msra.gmra.mxu1 %v2611_v21  ;;  %v2495_v35 = vmul.f32 %v2369_v58, %v6711_v29  ;;  %v1759_v23 = vmul.f32 0.044715, %v1633_v59 }
 0x19d   : > { %v1760_v53 = vmul.f32 0.044715, %v1634_v33  ;;  %v2374_v1 = vmul.f32 0.5, %v2248_v34  ;;  %v7000_v17 = vpop.f32.mrf.mxu0  ;;  %2862 = vmatprep.mubr.bf16.mxu1 %v2614_v15  ;;  %v1510_v5 = vmul.f32 %v6997_v48, %v6997_v48  ;;  %v2245_v60 = vadd.f32 1.0, %v6857_v4 }
 0x19e   : > { %v1761_v61 = vmul.f32 0.044715, %v1635_v54  ;;  %v2498_v0 = vmul.f32 %v2372_v37, %v6747_v7  ;;  %v7006_v20 = vpop.eup %4938  ;;  %v1885_v62 = vadd.f32 %v1759_v23, %v6961_v12  ;;  %v2247_v58 = vadd.f32 1.0, %v6883_v24 }
 0x19f   : > { %v1886_v29 = vadd.f32 %v1760_v53, %v6964_v43  ;;  %v2500_v21 = vmul.f32 %v2374_v1, %v6774_v6  ;;  %v7012_v45 = vpop.f32.mrf.mxu0  ;;  %v1636_v7 = vmul.f32 %v1510_v5, %v6997_v48  ;;  %v2371_v15 = vmul.f32 0.5, %v2245_v60 }
 0x1a0   : > { %v1887_v11 = vadd.f32 %v1761_v61, %v6973_v14  ;;  %v7018_v4 = vadd.f32 %v6947_v56, %v6396_v26  ;;  %4946 = vtanh.f32 %v2009_v27  ;;  %v2613_v55 = vpack.c.bf16 %v2495_v35, %v2493_v41 }
 0x1a1   : > { %v7020_v3 = vpop.eup %4940  ;;  %v2011_v59 = vmul.f32 0.7978846, %v1885_v62  ;;  %v2373_v33 = vmul.f32 0.5, %v2247_v58  ;;  %v7022_v6 = vpop.f32.mrf.mxu0  ;;  %v2012_v34 = vmul.f32 0.7978846, %v1886_v29  ;;  %v2616_v54 = vpack.c.bf16 %v2500_v21, %v2498_v0 }
 0x1a2   : > { %v7024_v24 = vpop.eup %4942  ;;  %v1762_v37 = vmul.f32 0.044715, %v1636_v7  ;;  %v1511_v23 = vmul.f32 %v7018_v4, %v7018_v4  ;;  %4948 = vtanh.f32 %v2010_v30  ;;  %v2013_v56 = vmul.f32 0.7978846, %v1887_v11 }
 0x1a3   : > { %v7028_v53 = vpop.eup %4944  ;;  %v7032_v27 = vadd.f32 %v6955_v36, %v6440_v47  ;;  %v7036_v41 = vadd.f32 %v6966_v9, %v6396_v26  ;;  %v7038_v35 = vpop.f32.mrf.mxu0  ;;  %v2497_v61 = vmul.f32 %v2371_v15, %v6732_v13  ;;  %v2250_v5 = vadd.f32 1.0, %v6921_v19 }
 0x1a4   : > { %v1888_v1 = vadd.f32 %v1762_v37, %v6997_v48  ;;  %v1637_v0 = vmul.f32 %v1511_v23, %v7018_v4  ;;  %2863 = vmatmul.mubr.bf16.gmra.mxu1 %v2613_v55  ;;  %4950 = vtanh.f32 %v2011_v59  ;;  %v2499_v30 = vmul.f32 %v2373_v33, %v6755_v42 }
 0x1a5   : > { %v1512_v36 = vmul.f32 %v7032_v27, %v7032_v27  ;;  %v1513_v9 = vmul.f32 %v7036_v41, %v7036_v41  ;;  %v7049_v60 = vpop.f32.mrf.mxu0  ;;  %4952 = vtanh.f32 %v2012_v34  ;;  %2870 = vmatprep.mubr.bf16.mxu1 %v2616_v54  ;;  %v2252_v13 = vadd.f32 1.0, %v6940_v22 }
 0x1a6   : > { %v1763_v62 = vmul.f32 0.044715, %v1637_v0  ;;  %v2376_v29 = vmul.f32 0.5, %v2250_v5  ;;  %v7056_v42 = vadd.f32 %v6982_v46, %v6440_v47  ;;  %v2249_v58 = vadd.f32 1.0, %v6915_v51 }
 0x1a7   : > { %v1638_v19 = vmul.f32 %v1512_v36, %v7032_v27  ;;  %v1639_v21 = vmul.f32 %v1513_v9, %v7036_v41  ;;  %v7059_v11 = vpop.f32.mrf.mxu0  ;;  %4954 = vtanh.f32 %v2013_v56  ;;  %v2014_v7 = vmul.f32 0.7978846, %v1888_v1 }
 0x1a8   : > { %v1889_v15 = vadd.f32 %v1763_v62, %v7018_v4  ;;  %v2378_v55 = vmul.f32 0.5, %v2252_v13  ;;  %v1514_v33 = vmul.f32 %v7056_v42, %v7056_v42  ;;  %v2251_v34 = vadd.f32 1.0, %v6930_v57 }
 0x1a9   : > { %v1764_v59 = vmul.f32 0.044715, %v1638_v19  ;;  %v1765_v22 = vmul.f32 0.044715, %v1639_v21  ;;  %v7065_v54 = vpop.f32.mrf.mxu0  ;;  %v2615_v46 = vpack.c.bf16 %v2499_v30, %v2497_v61  ;;  %v2502_v37 = vmul.f32 %v2376_v29, %v6781_v50 }
 0x1aa   : > { %v2504_v51 = vmul.f32 %v2378_v55, %v6802_v40  ;;  %v7071_v23 = vadd.f32 %v6993_v63, %v6396_v26  ;;  %v2015_v56 = vmul.f32 0.7978846, %v1889_v15  ;;  %v1640_v1 = vmul.f32 %v1514_v33, %v7056_v42 }
 0x1ab   : > { %v2375_v0 = vmul.f32 0.5, %v2249_v58  ;;  %v2377_v5 = vmul.f32 0.5, %v2251_v34  ;;  %v7074_v36 = vpop.f32.mrf.mxu0  ;;  %v1890_v57 = vadd.f32 %v1764_v59, %v7032_v27  ;;  %v1891_v9 = vadd.f32 %v1765_v22, %v7036_v41 }
 0x1ac   : > { %v2618_v61 = vpack.c.bf16 %v2504_v51, %v2502_v37  ;;  %v1515_v50 = vmul.f32 %v7071_v23, %v7071_v23  ;;  %4956 = vtanh.f32 %v2014_v7  ;;  %2871 = vmatmul.mubr.bf16.gmra.mxu1 %v2615_v46  ;;  %v1766_v40 = vmul.f32 0.044715, %v1640_v1 }
 0x1ad   : > { %v7080_v63 = vpop.f32.mrf.mxu0  ;;  %v7082_v30 = vpop.eup %4946  ;;  %v7087_v13 = vadd.f32 %v7000_v17, %v6440_v47  ;;  %v7091_v29 = vadd.f32 %v7012_v45, %v6396_v26  ;;  %v2254_v19 = vadd.f32 1.0, %v6957_v44  ;;  %4958 = vtanh.f32 %v2015_v56 }
 0x1ae   : > { %2878 = vmatprep.mubr.bf16.mxu1 %v2618_v61  ;;  %v1641_v62 = vmul.f32 %v1515_v50, %v7071_v23  ;;  %v2501_v21 = vmul.f32 %v2375_v0, %v6777_v2  ;;  %v2503_v58 = vmul.f32 %v2377_v5, %v6793_v32  ;;  %v2256_v7 = vadd.f32 1.0, %v6984_v28 }
 0x1af   : > { %v7097_v15 = vpop.f32.mrf.mxu0  ;;  %v7099_v55 = vpop.eup %4948  ;;  %v2016_v59 = vmul.f32 0.7978846, %v1890_v57  ;;  %v2017_v17 = vmul.f32 0.7978846, %v1891_v9  ;;  %v1516_v22 = vmul.f32 %v7087_v13, %v7087_v13  ;;  %v1517_v45 = vmul.f32 %v7091_v29, %v7091_v29 }
 0x1b0   : > { %v1892_v44 = vadd.f32 %v1766_v40, %v7056_v42  ;;  %v2380_v33 = vmul.f32 0.5, %v2254_v19  ;;  %v2382_v2 = vmul.f32 0.5, %v2256_v7  ;;  %v7108_v32 = vadd.f32 %v7022_v6, %v6440_v47 }
 0x1b1   : > { %v7110_v28 = vpop.f32.mrf.mxu0  ;;  %v7112_v34 = vpop.eup %4950  ;;  %v1767_v46 = vmul.f32 0.044715, %v1641_v62  ;;  %v1642_v37 = vmul.f32 %v1516_v22, %v7087_v13  ;;  %v1643_v51 = vmul.f32 %v1517_v45, %v7091_v29  ;;  %v2253_v56 = vadd.f32 1.0, %v6950_v38 }
 0x1b2   : > { %v7117_v1 = vpop.eup %4952  ;;  %v2617_v0 = vpack.c.bf16 %v2503_v58, %v2501_v21  ;;  %v2506_v5 = vmul.f32 %v2380_v33, %v6823_v16  ;;  %v2508_v57 = vmul.f32 %v2382_v2, %v6846_v10  ;;  %v1518_v6 = vmul.f32 %v7108_v32, %v7108_v32 }
 0x1b3   : > { %v7123_v9 = vpop.f32.mrf.mxu0  ;;  %4960 = vtanh.f32 %v2016_v59  ;;  %v1768_v61 = vmul.f32 0.044715, %v1642_v37  ;;  %v1769_v50 = vmul.f32 0.044715, %v1643_v51  ;;  %v7127_v40 = vadd.f32 %v7038_v35, %v6396_v26 }
 0x1b4   : > { %v7129_v38 = vpop.eup %4954  ;;  %2879 = vmatmul.mubr.bf16.gmra.mxu1 %v2617_v0  ;;  %v2620_v62 = vpack.c.bf16 %v2508_v57, %v2506_v5  ;;  %v1644_v16 = vmul.f32 %v1518_v6, %v7108_v32  ;;  %v2255_v10 = vadd.f32 1.0, %v6968_v49  ;;  %v2379_v19 = vmul.f32 0.5, %v2253_v56 }
 0x1b5   : > { %v7133_v21 = vpop.f32.mrf.mxu0  ;;  %4962 = vtanh.f32 %v2017_v17  ;;  %v1893_v58 = vadd.f32 %v1767_v46, %v7071_v23  ;;  %v1519_v7 = vmul.f32 %v7127_v40, %v7127_v40  ;;  %v2018_v59 = vmul.f32 0.7978846, %v1892_v44 }
 0x1b6   : > { %v1894_v35 = vadd.f32 %v1768_v61, %v7087_v13  ;;  %2886 = vmatprep.mubr.bf16.mxu1 %v2620_v62  ;;  %v2381_v22 = vmul.f32 0.5, %v2255_v10  ;;  %v7141_v45 = vadd.f32 %v7049_v60, %v6440_v47  ;;  %v1895_v49 = vadd.f32 %v1769_v50, %v7091_v29 }
 0x1b7   : > { %v7143_v33 = vpop.f32.mrf.mxu0  ;;  %v1770_v2 = vmul.f32 0.044715, %v1644_v16  ;;  %v1645_v17 = vmul.f32 %v1519_v7, %v7127_v40  ;;  %v7149_v46 = vadd.f32 %v7059_v11, %v6396_v26  ;;  %v2505_v44 = vmul.f32 %v2379_v19, %v6813_v8 }
 0x1b8   : > { %v2507_v37 = vmul.f32 %v2381_v22, %v6829_v18  ;;  %v1520_v51 = vmul.f32 %v7141_v45, %v7141_v45  ;;  %v2258_v60 = vadd.f32 1.0, %v7020_v3  ;;  %v2019_v5 = vmul.f32 0.7978846, %v1893_v58 }
 0x1b9   : > { %v7156_v56 = vpop.f32.mrf.mxu0  ;;  %v7158_v0 = vpop.eup %4956  ;;  %v1771_v57 = vmul.f32 0.044715, %v1645_v17  ;;  %v1521_v6 = vmul.f32 %v7149_v46, %v7149_v46  ;;  %v2260_v11 = vadd.f32 1.0, %v7028_v53  ;;  %4964 = vtanh.f32 %v2018_v59 }
 0x1ba   : > { %v2020_v8 = vmul.f32 0.7978846, %v1894_v35  ;;  %v2619_v61 = vpack.c.bf16 %v2507_v37, %v2505_v44  ;;  %v1646_v18 = vmul.f32 %v1520_v51, %v7141_v45  ;;  %v7166_v62 = vpop.eup %4958  ;;  %v2021_v3 = vmul.f32 0.7978846, %v1895_v49  ;;  %v9895_v49 = vld [vmem:[#allocation13_spill] sm:$0xff] }
 0x1bb   : > { %v7164_v50 = vpop.f32.mrf.mxu0  ;;  %v1647_v16 = vmul.f32 %v1521_v6, %v7149_v46  ;;  %v2384_v10 = vmul.f32 0.5, %v2258_v60  ;;  %v2386_v19 = vmul.f32 0.5, %v2260_v11  ;;  %v1896_v58 = vadd.f32 %v1770_v2, %v7108_v32 }
 0x1bc   : > { %2887 = vmatmul.mubr.bf16.gmra.mxu1 %v2619_v61  ;;  %v1897_v7 = vadd.f32 %v1771_v57, %v7127_v40  ;;  %v7173_v53 = vadd.f32 %v7065_v54, %v6440_v47  ;;  %v2257_v59 = vadd.f32 1.0, %v7006_v20  ;;  %4966 = vtanh.f32 %v2019_v5 }
 0x1bd   : > { %v7176_v35 = vpop.f32.mrf.mxu0  ;;  %v1772_v22 = vmul.f32 0.044715, %v1646_v18  ;;  %v2510_v17 = vmul.f32 %v2384_v10, %v9895_v49  ;;  %v2512_v44 = vmul.f32 %v2386_v19, %v6900_v31  ;;  %4968 = vtanh.f32 %v2020_v8  ;;  %v9897_v19 = vld [vmem:[#allocation12_spill] sm:$0xff] }
 0x1be   : > { %v1522_v2 = vmul.f32 %v7173_v53, %v7173_v53  ;;  %v2259_v37 = vadd.f32 1.0, %v7024_v24  ;;  %v2383_v51 = vmul.f32 0.5, %v2257_v59  ;;  %4970 = vtanh.f32 %v2021_v3 }
 0x1bf   : > { %v7183_v60 = vpop.f32.mrf.mxu0  ;;  %v1773_v54 = vmul.f32 0.044715, %v1647_v16  ;;  %v2622_v20 = vpack.c.bf16 %v2512_v44, %v2510_v17  ;;  %v7187_v5 = vadd.f32 %v7074_v36, %v6396_v26  ;;  %v2022_v6 = vmul.f32 0.7978846, %v1896_v58 }
 0x1c0   : > { %v7189_v57 = vpop.eup %4960  ;;  %v2023_v31 = vmul.f32 0.7978846, %v1897_v7  ;;  %v1648_v11 = vmul.f32 %v1522_v2, %v7173_v53  ;;  %v2385_v8 = vmul.f32 0.5, %v2259_v37  ;;  %v1898_v24 = vadd.f32 %v1772_v22, %v7141_v45 }
 0x1c1   : > { %v7192_v61 = vpop.f32.mrf.mxu0  ;;  %2894 = vmatprep.mubr.bf16.mxu1 %v2622_v20  ;;  %v1523_v18 = vmul.f32 %v7187_v5, %v7187_v5  ;;  %v7199_v3 = vadd.f32 %v7080_v63, %v6440_v47  ;;  %v7203_v36 = vadd.f32 %v7097_v15, %v6396_v26  ;;  %v2509_v58 = vmul.f32 %v2383_v51, %v9897_v19 }
 0x1c2   : > { %v7205_v16 = vpop.eup %4962  ;;  %v1774_v10 = vmul.f32 0.044715, %v1648_v11  ;;  %v2511_v7 = vmul.f32 %v2385_v8, %v6893_v39  ;;  %v2262_v59 = vadd.f32 1.0, %v7099_v55  ;;  %v1899_v49 = vadd.f32 %v1773_v54, %v7149_v46 }
 0x1c3   : > { %9896 = vst [vmem:[#allocation13_spill] sm:$0xff] %v7203_v36  ;;  %v7210_v22 = vpop.f32.mrf.mxu0  ;;  %v1649_v63 = vmul.f32 %v1523_v18, %v7187_v5  ;;  %v1524_v17 = vmul.f32 %v7199_v3, %v7199_v3  ;;  %v1525_v15 = vmul.f32 %v7203_v36, %v7203_v36  ;;  %4972 = vtanh.f32 %v2022_v6 }
 0x1c4   : > { %v2621_v44 = vpack.c.bf16 %v2511_v7, %v2509_v58  ;;  %v2264_v2 = vadd.f32 1.0, %v7117_v1  ;;  %v2388_v37 = vmul.f32 0.5, %v2262_v59  ;;  %v2024_v55 = vmul.f32 0.7978846, %v1898_v24 }
 0x1c5   : > { %v7219_v39 = vpop.f32.mrf.mxu0  ;;  %v1900_v51 = vadd.f32 %v1774_v10, %v7173_v53  ;;  %v1775_v20 = vmul.f32 0.044715, %v1649_v63  ;;  %v7224_v54 = vadd.f32 %v7110_v28, %v6440_v47  ;;  %4974 = vtanh.f32 %v2023_v31 }
 0x1c6   : > { %2895 = vmatmul.mubr.bf16.gmra.mxu1 %v2621_v44  ;;  %v2390_v11 = vmul.f32 0.5, %v2264_v2  ;;  %v2261_v8 = vadd.f32 1.0, %v7082_v30  ;;  %v7229_v18 = vpop.eup %4964  ;;  %v2025_v1 = vmul.f32 0.7978846, %v1899_v49  ;;  %v1650_v19 = vmul.f32 %v1524_v17, %v7199_v3 }
 0x1c7   : > { %v7227_v6 = vpop.f32.mrf.mxu0  ;;  %v1651_v24 = vmul.f32 %v1525_v15, %v7203_v36  ;;  %v1526_v10 = vmul.f32 %v7224_v54, %v7224_v54  ;;  %v2514_v28 = vmul.f32 %v2388_v37, %v6938_v52  ;;  %v2263_v58 = vadd.f32 1.0, %v7112_v34 }
 0x1c8   : > { %v2516_v31 = vmul.f32 %v2390_v11, %v6964_v43  ;;  %v2387_v7 = vmul.f32 0.5, %v2261_v8  ;;  %4976 = vtanh.f32 %v2024_v55  ;;  %v2026_v59 = vmul.f32 0.7978846, %v1900_v51 }
 0x1c9   : > { %v7238_v30 = vpop.f32.mrf.mxu0  ;;  %v1901_v49 = vadd.f32 %v1775_v20, %v7187_v5  ;;  %v7241_v63 = vpop.eup %4966  ;;  %v1652_v15 = vmul.f32 %v1526_v10, %v7224_v54  ;;  %v2389_v44 = vmul.f32 0.5, %v2263_v58  ;;  %v7246_v52 = vadd.f32 %v7123_v9, %v6396_v26 }
 0x1ca   : > { %v2624_v17 = vpack.c.bf16 %v2516_v31, %v2514_v28  ;;  %v7250_v34 = vpop.eup %4968  ;;  %4978 = vtanh.f32 %v2025_v1  ;;  %v1776_v2 = vmul.f32 0.044715, %v1650_v19  ;;  %v1777_v37 = vmul.f32 0.044715, %v1651_v24 }
 0x1cb   : > { %v7248_v43 = vpop.f32.mrf.mxu0  ;;  %v2513_v55 = vmul.f32 %v2387_v7, %v6907_v25  ;;  %v7253_v51 = vpop.eup %4970  ;;  %v2515_v20 = vmul.f32 %v2389_v44, %v6961_v12  ;;  %v1527_v11 = vmul.f32 %v7246_v52, %v7246_v52  ;;  %v7260_v9 = vadd.f32 %v7133_v21, %v6440_v47 }
 0x1cc   : > { %2902 = vmatprep.mubr.bf16.mxu1 %v2624_v17  ;;  %v7264_v8 = vadd.f32 %v7143_v33, %v6396_v26  ;;  %4980 = vtanh.f32 %v2026_v59  ;;  %v2027_v25 = vmul.f32 0.7978846, %v1901_v49  ;;  %v2266_v19 = vadd.f32 1.0, %v7158_v0 }
 0x1cd   : > { %v7266_v1 = vpop.f32.mrf.mxu0  ;;  %v2268_v24 = vadd.f32 1.0, %v7189_v57  ;;  %v1778_v12 = vmul.f32 0.044715, %v1652_v15  ;;  %v2623_v10 = vpack.c.bf16 %v2515_v20, %v2513_v55  ;;  %v1653_v28 = vmul.f32 %v1527_v11, %v7246_v52 }
 0x1ce   : > { %v1528_v21 = vmul.f32 %v7260_v9, %v7260_v9  ;;  %v1902_v33 = vadd.f32 %v1776_v2, %v7199_v3  ;;  %v1529_v58 = vmul.f32 %v7264_v8, %v7264_v8  ;;  %v2392_v7 = vmul.f32 0.5, %v2266_v19 }
 0x1cf   : > { %v7273_v31 = vpop.f32.mrf.mxu0  ;;  %v2394_v59 = vmul.f32 0.5, %v2268_v24  ;;  %2903 = vmatmul.mubr.bf16.gmra.mxu1 %v2623_v10  ;;  %v1779_v0 = vmul.f32 0.044715, %v1653_v28  ;;  %v7281_v49 = vadd.f32 %v7156_v56, %v6440_v47  ;;  %v2265_v17 = vadd.f32 1.0, %v7129_v38 }
 0x1d0   : > { %v1654_v57 = vmul.f32 %v1528_v21, %v7260_v9  ;;  %v7286_v44 = vpop.eup %4972  ;;  %v1903_v2 = vadd.f32 %v1777_v37, %v7203_v36  ;;  %v1655_v55 = vmul.f32 %v1529_v58, %v7264_v8  ;;  %v2518_v20 = vmul.f32 %v2392_v7, %v6997_v48 }
 0x1d1   : > { %v7284_v15 = vpop.f32.mrf.mxu0  ;;  %v2520_v11 = vmul.f32 %v2394_v59, %v7032_v27  ;;  %v1904_v19 = vadd.f32 %v1778_v12, %v7224_v54  ;;  %v1530_v56 = vmul.f32 %v7281_v49, %v7281_v49  ;;  %v2267_v38 = vadd.f32 1.0, %v7166_v62 }
 0x1d2   : > { %v1780_v24 = vmul.f32 0.044715, %v1654_v57  ;;  %v7298_v28 = vpop.eup %4974  ;;  %v1781_v21 = vmul.f32 0.044715, %v1655_v55  ;;  %v2391_v36 = vmul.f32 0.5, %v2265_v17  ;;  %v7302_v48 = vadd.f32 %v7164_v50, %v6396_v26 }
 0x1d3   : > { %v7296_v10 = vpop.f32.mrf.mxu0  ;;  %v2626_v37 = vpack.c.bf16 %v2520_v11, %v2518_v20  ;;  %4982 = vtanh.f32 %v2027_v25  ;;  %v1905_v27 = vadd.f32 %v1779_v0, %v7246_v52  ;;  %v1656_v12 = vmul.f32 %v1530_v56, %v7281_v49 }
 0x1d4   : > { %v2393_v58 = vmul.f32 0.5, %v2267_v38  ;;  %v2028_v62 = vmul.f32 0.7978846, %v1902_v33  ;;  %v1906_v59 = vadd.f32 %v1780_v24, %v7260_v9  ;;  %v1531_v57 = vmul.f32 %v7302_v48, %v7302_v48 }
 0x1d5   : > { %v7306_v7 = vpop.f32.mrf.mxu0  ;;  %2910 = vmatprep.mubr.bf16.mxu1 %v2626_v37  ;;  %v7313_v17 = vadd.f32 %v7176_v35, %v6440_v47  ;;  %v7315_v50 = vpop.eup %4976  ;;  %v2029_v25 = vmul.f32 0.7978846, %v1903_v2  ;;  %v2030_v0 = vmul.f32 0.7978846, %v1904_v19  ;;  %v2517_v55 = vmul.f32 %v2391_v36, %v6973_v14 }
 0x1d6   : > { %v2519_v20 = vmul.f32 %v2393_v58, %v7018_v4  ;;  %v1907_v33 = vadd.f32 %v1781_v21, %v7264_v8  ;;  %v1782_v24 = vmul.f32 0.044715, %v1656_v12  ;;  %v7326_v35 = vadd.f32 %v7183_v60, %v6396_v26 }
 0x1d7   : > { %v7319_v11 = vpop.f32.mrf.mxu0  ;;  %v1532_v56 = vmul.f32 %v7313_v17, %v7313_v17  ;;  %v7328_v38 = vpop.eup %4978  ;;  %v2031_v2 = vmul.f32 0.7978846, %v1905_v27  ;;  %v1657_v14 = vmul.f32 %v1531_v57, %v7302_v48  ;;  %v2270_v4 = vadd.f32 1.0, %v7229_v18 }
 0x1d8   : > { %9898 = vst [vmem:[#allocation12_spill] sm:$0xff] %v7326_v35  ;;  %v2625_v19 = vpack.c.bf16 %v2519_v20, %v2517_v55  ;;  %4984 = vtanh.f32 %v2028_v62  ;;  %v2032_v21 = vmul.f32 0.7978846, %v1906_v59  ;;  %v1533_v12 = vmul.f32 %v7326_v35, %v7326_v35 }
 0x1d9   : > { %v7332_v36 = vpop.f32.mrf.mxu0  ;;  %v1658_v37 = vmul.f32 %v1532_v56, %v7313_v17  ;;  %v7337_v58 = vpop.eup %4980  ;;  %4986 = vtanh.f32 %v2029_v25  ;;  %v2272_v60 = vadd.f32 1.0, %v7250_v34  ;;  %v2396_v27 = vmul.f32 0.5, %v2270_v4 }
 0x1da   : > { %2911 = vmatmul.mubr.bf16.gmra.mxu1 %v2625_v19  ;;  %v7342_v57 = vadd.f32 %v7192_v61, %v6440_v47  ;;  %4988 = vtanh.f32 %v2030_v0  ;;  %v2033_v62 = vmul.f32 0.7978846, %v1907_v33  ;;  %v1908_v59 = vadd.f32 %v1782_v24, %v7281_v49 }
 0x1db   : > { %v7344_v18 = vpop.f32.mrf.mxu0  ;;  %v2269_v55 = vadd.f32 1.0, %v7205_v16  ;;  %4990 = vtanh.f32 %v2031_v2  ;;  %v1783_v20 = vmul.f32 0.044715, %v1657_v14  ;;  %v2398_v56 = vmul.f32 0.5, %v2272_v60 }
 0x1dc   : > { %v1534_v25 = vmul.f32 %v7342_v57, %v7342_v57  ;;  %4992 = vtanh.f32 %v2032_v21  ;;  %v1784_v19 = vmul.f32 0.044715, %v1658_v37  ;;  %v1659_v61 = vmul.f32 %v1533_v12, %v7326_v35 }
 0x1dd   : > { %v7350_v34 = vpop.f32.mrf.mxu0  ;;  %v2271_v4 = vadd.f32 1.0, %v7241_v63  ;;  %v2522_v0 = vmul.f32 %v2396_v27, %v7056_v42  ;;  %v2524_v33 = vmul.f32 %v2398_v56, %v7087_v13  ;;  %v2395_v24 = vmul.f32 0.5, %v2269_v55 }
 0x1de   : > { %v7358_v16 = vadd.f32 %v7210_v22, %v6396_v26  ;;  %4994 = vtanh.f32 %v2033_v62  ;;  %v2034_v14 = vmul.f32 0.7978846, %v1908_v59  ;;  %v1909_v21 = vadd.f32 %v1783_v20, %v7302_v48 }
 0x1df   : > { %v7360_v2 = vpop.f32.mrf.mxu0  ;;  %v2397_v60 = vmul.f32 0.5, %v2271_v4  ;;  %v2628_v37 = vpack.c.bf16 %v2524_v33, %v2522_v0  ;;  %v1660_v12 = vmul.f32 %v1534_v25, %v7342_v57  ;;  %v1910_v22 = vadd.f32 %v1784_v19, %v7313_v17 }
 0x1e0   : > { %v1535_v42 = vmul.f32 %v7358_v16, %v7358_v16  ;;  %v7368_v13 = vpop.eup %4982  ;;  %v2521_v27 = vmul.f32 %v2395_v24, %v7036_v41  ;;  %v7375_v59 = vadd.f32 %v7219_v39, %v6440_v47  ;;  %v1785_v55 = vmul.f32 0.044715, %v1659_v61 }
 0x1e1   : > { %v7366_v63 = vpop.f32.mrf.mxu0  ;;  %v2523_v62 = vmul.f32 %v2397_v60, %v7071_v23  ;;  %2918 = vmatprep.mubr.bf16.mxu1 %v2628_v37  ;;  %v7380_v56 = vadd.f32 %v7227_v6, %v6396_v26  ;;  %v2274_v25 = vadd.f32 1.0, %v7286_v44  ;;  %4996 = vtanh.f32 %v2034_v14 }
 0x1e2   : > { %v1661_v20 = vmul.f32 %v1535_v42, %v7358_v16  ;;  %v1536_v23 = vmul.f32 %v7375_v59, %v7375_v59  ;;  %v2276_v39 = vadd.f32 1.0, %v7315_v50  ;;  %v2035_v19 = vmul.f32 0.7978846, %v1909_v21 }
 0x1e3   : > { %v7383_v4 = vpop.f32.mrf.mxu0  ;;  %v2627_v41 = vpack.c.bf16 %v2523_v62, %v2521_v27  ;;  %v1786_v61 = vmul.f32 0.044715, %v1660_v12  ;;  %v1537_v0 = vmul.f32 %v7380_v56, %v7380_v56  ;;  %v2400_v33 = vmul.f32 0.5, %v2274_v25 }
 0x1e4   : > { %v1662_v6 = vmul.f32 %v1536_v23, %v7375_v59  ;;  %v2402_v44 = vmul.f32 0.5, %v2276_v39  ;;  %v7395_v14 = vadd.f32 %v7238_v30, %v6440_v47  ;;  %v2273_v60 = vadd.f32 1.0, %v7253_v51 }
 0x1e5   : > { %v7390_v24 = vpop.f32.mrf.mxu0  ;;  %2919 = vmatmul.mubr.bf16.gmra.mxu1 %v2627_v41  ;;  %v4985_v37 = vpop.eup %4984  ;;  %v2036_v50 = vmul.f32 0.7978846, %v1910_v22  ;;  %v1911_v21 = vadd.f32 %v1785_v55, %v7326_v35  ;;  %v1787_v12 = vmul.f32 0.044715, %v1661_v20  ;;  %v1663_v42 = vmul.f32 %v1537_v0, %v7380_v56 }
 0x1e6   : > { %v7402_v62 = vpop.eup %4986  ;;  %v2526_v25 = vmul.f32 %v2400_v33, %v7108_v32  ;;  %v2528_v41 = vmul.f32 %v2402_v44, %v7141_v45  ;;  %v1538_v30 = vmul.f32 %v7395_v14, %v7395_v14  ;;  %v2275_v51 = vadd.f32 1.0, %v7298_v28 }
 0x1e7   : > { %v7400_v27 = vpop.f32.mrf.mxu0  ;;  %v7409_v23 = vpop.eup %4988  ;;  %4998 = vtanh.f32 %v2035_v19  ;;  %v1788_v22 = vmul.f32 0.044715, %v1662_v6  ;;  %v2399_v55 = vmul.f32 0.5, %v2273_v60  ;;  %v7413_v20 = vadd.f32 %v7248_v43, %v6396_v26 }
 0x1e8   : > { %v7417_v0 = vpop.eup %4990  ;;  %v1912_v32 = vadd.f32 %v1786_v61, %v7342_v57  ;;  %v2630_v45 = vpack.c.bf16 %v2528_v41, %v2526_v25  ;;  %v1664_v33 = vmul.f32 %v1538_v30, %v7395_v14  ;;  %v2401_v44 = vmul.f32 0.5, %v2275_v51 }
 0x1e9   : > { %v7415_v39 = vpop.f32.mrf.mxu0  ;;  %v7421_v28 = vpop.eup %4992  ;;  %5000 = vtanh.f32 %v2036_v50  ;;  %v2037_v19 = vmul.f32 0.7978846, %v1911_v21  ;;  %v1913_v6 = vadd.f32 %v1787_v12, %v7358_v16  ;;  %v1539_v43 = vmul.f32 %v7413_v20, %v7413_v20 }
 0x1ea   : > { %9899 = vst [vmem:[#allocation14_spill] sm:$0xff] %v7415_v39  ;;  %v1789_v35 = vmul.f32 0.044715, %v1663_v42  ;;  %2926 = vmatprep.mubr.bf16.mxu1 %v2630_v45  ;;  %v2525_v39 = vmul.f32 %v2399_v55, %v7091_v29  ;;  %v2527_v61 = vmul.f32 %v2401_v44, %v7127_v40  ;;  %v7432_v25 = vadd.f32 %v7266_v1, %v6440_v47 }
 0x1eb   : > { %v7426_v60 = vpop.f32.mrf.mxu0  ;;  %v7434_v41 = vpop.eup %4994  ;;  %v1914_v50 = vadd.f32 %v1788_v22, %v7375_v59  ;;  %v1665_v21 = vmul.f32 %v1539_v43, %v7413_v20  ;;  %v7440_v12 = vadd.f32 %v7273_v31, %v6396_v26  ;;  %v2278_v42 = vadd.f32 1.0, %v7337_v58 }
 0x1ec   : > { %v2038_v29 = vmul.f32 0.7978846, %v1912_v32  ;;  %v1790_v40 = vmul.f32 0.044715, %v1664_v33  ;;  %v2629_v51 = vpack.c.bf16 %v2527_v61, %v2525_v39  ;;  %v1540_v1 = vmul.f32 %v7432_v25, %v7432_v25 }
 0x1ed   : > { %9900 = vst [vmem:[#allocation15_spill] sm:$0xff] %v7440_v12  ;;  %v7443_v30 = vpop.f32.mrf.mxu0  ;;  %5002 = vtanh.f32 %v2037_v19  ;;  %v2039_v55 = vmul.f32 0.7978846, %v1913_v6  ;;  %v1541_v22 = vmul.f32 %v7440_v12, %v7440_v12  ;;  %v2280_v45 = vadd.f32 1.0, %v4985_v37 }
 0x1ee   : > { %2927 = vmatmul.mubr.bf16.gmra.mxu1 %v2629_v51  ;;  %v1791_v31 = vmul.f32 0.044715, %v1665_v21  ;;  %v1666_v58 = vmul.f32 %v1540_v1, %v7432_v25  ;;  %v2404_v43 = vmul.f32 0.5, %v2278_v42  ;;  %v7454_v32 = vadd.f32 %v7284_v15, %v6440_v47  ;;  %v7456_v39 = vpop.eup %4996 }
 0x1ef   : > { %v7449_v44 = vpop.f32.mrf.mxu0  ;;  %v2040_v33 = vmul.f32 0.7978846, %v1914_v50  ;;  %v1915_v19 = vadd.f32 %v1789_v35, %v7380_v56  ;;  %v2406_v6 = vmul.f32 0.5, %v2280_v45  ;;  %v2277_v61 = vadd.f32 1.0, %v7328_v38 }
 0x1f0   : > { %9901 = vst [vmem:[#allocation16_spill] sm:$0xff] %v7449_v44  ;;  %5004 = vtanh.f32 %v2038_v29  ;;  %v1916_v21 = vadd.f32 %v1790_v40, %v7395_v14  ;;  %v1792_v51 = vmul.f32 0.044715, %v1666_v58  ;;  %v1667_v42 = vmul.f32 %v1541_v22, %v7440_v12 }
 0x1f1   : > { %v7460_v37 = vpop.f32.mrf.mxu0  ;;  %5006 = vtanh.f32 %v2039_v55  ;;  %v2530_v15 = vmul.f32 %v2404_v43, %v7173_v53  ;;  %v2532_v1 = vmul.f32 %v2406_v6, %v7199_v3  ;;  %v2279_v50 = vadd.f32 1.0, %v7368_v13 }
 0x1f2   : > { %v1917_v35 = vadd.f32 %v1791_v31, %v7413_v20  ;;  %v1542_v38 = vmul.f32 %v7454_v32, %v7454_v32  ;;  %v2403_v29 = vmul.f32 0.5, %v2277_v61  ;;  %v7474_v40 = vadd.f32 %v7296_v10, %v6396_v26 }
 0x1f3   : > { %v7467_v44 = vpop.f32.mrf.mxu0  ;;  %5008 = vtanh.f32 %v2040_v33  ;;  %v2041_v55 = vmul.f32 0.7978846, %v1915_v19  ;;  %v2632_v22 = vpack.c.bf16 %v2532_v1, %v2530_v15  ;;  %v2405_v53 = vmul.f32 0.5, %v2279_v50 }
 0x1f4   : > { %v7478_v3 = vpop.eup %4998  ;;  %v2042_v13 = vmul.f32 0.7978846, %v1916_v21  ;;  %v1918_v58 = vadd.f32 %v1792_v51, %v7432_v25  ;;  %v1793_v31 = vmul.f32 0.044715, %v1667_v42  ;;  %v1543_v43 = vmul.f32 %v7474_v40, %v7474_v40 }
 0x1f5   : > { %v7476_v45 = vpop.f32.mrf.mxu0  ;;  %2934 = vmatprep.mubr.bf16.mxu1 %v2632_v22  ;;  %v2529_v6 = vmul.f32 %v2403_v29, %v7149_v46  ;;  %v2531_v10 = vmul.f32 %v2405_v53, %v7187_v5  ;;  %v7487_v33 = vadd.f32 %v7306_v7, %v6440_v47  ;;  %v7491_v19 = vadd.f32 %v7319_v11, %v6396_v26 }
 0x1f6   : > { %v5001_v21 = vpop.eup %5000  ;;  %v2043_v51 = vmul.f32 0.7978846, %v1917_v35  ;;  %v1668_v42 = vmul.f32 %v1542_v38, %v7454_v32  ;;  %v1669_v15 = vmul.f32 %v1543_v43, %v7474_v40  ;;  %v2282_v46 = vadd.f32 1.0, %v7409_v23 }
 0x1f7   : > { %v7493_v61 = vpop.f32.mrf.mxu0  ;;  %5010 = vtanh.f32 %v2041_v55  ;;  %v2631_v5 = vpack.c.bf16 %v2531_v10, %v2529_v6  ;;  %v1544_v7 = vmul.f32 %v7487_v33, %v7487_v33  ;;  %v1545_v1 = vmul.f32 %v7491_v19, %v7491_v19 }
 0x1f8   : > { %5012 = vtanh.f32 %v2042_v13  ;;  %v2284_v50 = vadd.f32 1.0, %v7421_v28  ;;  %v2408_v35 = vmul.f32 0.5, %v2282_v46  ;;  %v2044_v29 = vmul.f32 0.7978846, %v1918_v58 }
 0x1f9   : > { %v7502_v11 = vpop.f32.mrf.mxu0  ;;  %v1919_v38 = vadd.f32 %v1793_v31, %v7440_v12  ;;  %2935 = vmatmul.mubr.bf16.gmra.mxu1 %v2631_v5  ;;  %v7508_v23 = vadd.f32 %v7332_v36, %v6440_v47  ;;  %v2281_v55 = vadd.f32 1.0, %v7402_v62  ;;  %5014 = vtanh.f32 %v2043_v51 }
 0x1fa   : > { %v7513_v53 = vpop.eup %5002  ;;  %v1794_v43 = vmul.f32 0.044715, %v1668_v42  ;;  %v1795_v13 = vmul.f32 0.044715, %v1669_v15  ;;  %v2410_v6 = vmul.f32 0.5, %v2284_v50  ;;  %v1670_v28 = vmul.f32 %v1544_v7, %v7487_v33 }
 0x1fb   : > { %v7511_v22 = vpop.f32.mrf.mxu0  ;;  %v1671_v58 = vmul.f32 %v1545_v1, %v7491_v19  ;;  %v1546_v31 = vmul.f32 %v7508_v23, %v7508_v23  ;;  %v2283_v36 = vadd.f32 1.0, %v7417_v0  ;;  %v2534_v62 = vmul.f32 %v2408_v35, %v7224_v54 }
 0x1fc   : > { %v2536_v46 = vmul.f32 %v2410_v6, %v7260_v9  ;;  %v2407_v5 = vmul.f32 0.5, %v2281_v55  ;;  %v7526_v51 = vadd.f32 %v7344_v18, %v6396_v26  ;;  %5016 = vtanh.f32 %v2044_v29  ;;  %v9903_v55 = vld [vmem:[#allocation13_spill] sm:$0xff] }
 0x1fd   : > { %v7520_v10 = vpop.f32.mrf.mxu0  ;;  %v7528_v42 = vpop.eup %5004  ;;  %v2045_v15 = vmul.f32 0.7978846, %v1919_v38  ;;  %v2409_v7 = vmul.f32 0.5, %v2283_v36  ;;  %v1920_v0 = vadd.f32 %v1794_v43, %v7454_v32  ;;  %v1672_v54 = vmul.f32 %v1546_v31, %v7508_v23 }
 0x1fe   : > { %v7532_v50 = vpop.eup %5006  ;;  %v2634_v12 = vpack.c.bf16 %v2536_v46, %v2534_v62  ;;  %v1547_v9 = vmul.f32 %v7526_v51, %v7526_v51  ;;  %v1921_v18 = vadd.f32 %v1795_v13, %v7474_v40  ;;  %v1796_v35 = vmul.f32 0.044715, %v1670_v28 }
 0x1ff   : > { %v7530_v1 = vpop.f32.mrf.mxu0  ;;  %v2533_v6 = vmul.f32 %v2407_v5, %v9903_v55  ;;  %v2535_v29 = vmul.f32 %v2409_v7, %v7246_v52  ;;  %v7547_v43 = vadd.f32 %v7350_v34, %v6440_v47  ;;  %v7551_v31 = vadd.f32 %v7360_v2, %v6396_v26 }
 0x200   : > { %9902 = vst [vmem:[#allocation17_spill] sm:$0xff] %v7530_v1  ;;  %v7543_v36 = vpop.eup %5008  ;;  %v1797_v1 = vmul.f32 0.044715, %v1671_v58  ;;  %2942 = vmatprep.mubr.bf16.mxu1 %v2634_v12  ;;  %v2286_v13 = vadd.f32 1.0, %v7456_v39  ;;  %5018 = vtanh.f32 %v2045_v15  ;;  %v2288_v62 = vadd.f32 1.0, %v5001_v21 }
 0x201   : > { %v7541_v38 = vpop.f32.mrf.mxu0  ;;  %v2633_v28 = vpack.c.bf16 %v2535_v29, %v2533_v6  ;;  %v2046_v46 = vmul.f32 0.7978846, %v1920_v0  ;;  %v1798_v5 = vmul.f32 0.044715, %v1672_v54  ;;  %v1673_v58 = vmul.f32 %v1547_v9, %v7526_v51 }
 0x202   : > { %v1548_v12 = vmul.f32 %v7547_v43, %v7547_v43  ;;  %v2047_v34 = vmul.f32 0.7978846, %v1921_v18  ;;  %v2412_v7 = vmul.f32 0.5, %v2286_v13  ;;  %v2414_v55 = vmul.f32 0.5, %v2288_v62 }
 0x203   : > { %v7554_v52 = vpop.f32.mrf.mxu0  ;;  %2943 = vmatmul.mubr.bf16.gmra.mxu1 %v2633_v28  ;;  %v7561_v2 = vadd.f32 %v7366_v63, %v6440_v47  ;;  %v1922_v15 = vadd.f32 %v1796_v35, %v7487_v33  ;;  %v1923_v0 = vadd.f32 %v1797_v1, %v7491_v19  ;;  %v1549_v54 = vmul.f32 %v7551_v31, %v7551_v31 }
 0x204   : > { %v7565_v21 = vpop.eup %5010  ;;  %v2285_v9 = vadd.f32 1.0, %v7434_v41  ;;  %v1674_v6 = vmul.f32 %v1548_v12, %v7547_v43  ;;  %v2538_v63 = vmul.f32 %v2412_v7, %v7281_v49  ;;  %v2540_v29 = vmul.f32 %v2414_v55, %v7313_v17 }
 0x205   : > { %v7563_v39 = vpop.f32.mrf.mxu0  ;;  %v7572_v18 = vpop.eup %5012  ;;  %v1550_v13 = vmul.f32 %v7561_v2, %v7561_v2  ;;  %5020 = vtanh.f32 %v2046_v46  ;;  %v1924_v1 = vadd.f32 %v1798_v5, %v7508_v23  ;;  %v1799_v35 = vmul.f32 0.044715, %v1673_v58 }
 0x206   : > { %9904 = vst [vmem:[#allocation13_spill] sm:$0xff] %v7563_v39  ;;  %v7584_v41 = vadd.f32 %v7383_v4, %v6396_v26  ;;  %v7586_v62 = vpop.eup %5014  ;;  %5022 = vtanh.f32 %v2047_v34  ;;  %v2636_v12 = vpack.c.bf16 %v2540_v29, %v2538_v63  ;;  %v2287_v49 = vadd.f32 1.0, %v7478_v3 }
 0x207   : > { %v7579_v28 = vpop.f32.mrf.mxu0  ;;  %v2411_v17 = vmul.f32 0.5, %v2285_v9  ;;  %v2048_v55 = vmul.f32 0.7978846, %v1922_v15  ;;  %v2049_v39 = vmul.f32 0.7978846, %v1923_v0  ;;  %v1675_v46 = vmul.f32 %v1549_v54, %v7551_v31 }
 0x208   : > { %9905 = vst [vmem:[#allocation18_spill] sm:$0xff] %v7579_v28  ;;  %v1551_v5 = vmul.f32 %v7584_v41, %v7584_v41  ;;  %v1800_v58 = vmul.f32 0.044715, %v1674_v6  ;;  %2950 = vmatprep.mubr.bf16.mxu1 %v2636_v12  ;;  %v1676_v4 = vmul.f32 %v1550_v13, %v7561_v2  ;;  %v2413_v28 = vmul.f32 0.5, %v2287_v49 }
 0x209   : > { %v7589_v7 = vpop.f32.mrf.mxu0  ;;  %v7597_v34 = vadd.f32 %v7390_v24, %v6440_v47  ;;  %v7601_v9 = vpop.eup %5016  ;;  %v2050_v15 = vmul.f32 0.7978846, %v1924_v1  ;;  %v1925_v0 = vadd.f32 %v1799_v35, %v7526_v51  ;;  %v2537_v54 = vmul.f32 %v2411_v17, %v7264_v8 }
 0x20a   : > { %v7607_v6 = vadd.f32 %v7400_v27, %v6396_v26  ;;  %v2539_v63 = vmul.f32 %v2413_v28, %v7302_v48  ;;  %v1677_v29 = vmul.f32 %v1551_v5, %v7584_v41  ;;  %v2290_v13 = vadd.f32 1.0, %v7528_v42 }
 0x20b   : > { %v7599_v3 = vpop.f32.mrf.mxu0  ;;  %v1552_v24 = vmul.f32 %v7597_v34, %v7597_v34  ;;  %5024 = vtanh.f32 %v2048_v55  ;;  %v1801_v1 = vmul.f32 0.044715, %v1675_v46  ;;  %v2292_v35 = vadd.f32 1.0, %v7543_v36 }
 0x20c   : > { %9906 = vst [vmem:[#allocation19_spill] sm:$0xff] %v7599_v3  ;;  %9907 = vst [vmem:[#allocation20_spill] sm:$0xff] %v7607_v6  ;;  %v1553_v8 = vmul.f32 %v7607_v6, %v7607_v6  ;;  %5026 = vtanh.f32 %v2049_v39  ;;  %v1926_v27 = vadd.f32 %v1800_v58, %v7547_v43  ;;  %v1802_v48 = vmul.f32 0.044715, %v1676_v4  ;;  %v9909_v3 = vld [vmem:[#allocation14_spill] sm:$0xff] }
 0x20d   : > { %v7614_v12 = vpop.f32.mrf.mxu0  ;;  %v2635_v28 = vpack.c.bf16 %v2539_v63, %v2537_v54  ;;  %v7622_v17 = vpop.eup %5018  ;;  %5028 = vtanh.f32 %v2050_v15  ;;  %v1678_v42 = vmul.f32 %v1552_v24, %v7597_v34  ;;  %v2416_v5 = vmul.f32 0.5, %v2290_v13 }
 0x20e   : > { %9908 = vst [vmem:[#allocation21_spill] sm:$0xff] %v7614_v12  ;;  %v2418_v55 = vmul.f32 0.5, %v2292_v35  ;;  %v2051_v46 = vmul.f32 0.7978846, %v1925_v0  ;;  %v1803_v12 = vmul.f32 0.044715, %v1677_v29  ;;  %v7627_v36 = vadd.f32 %v9909_v3, %v6440_v47 }
 0x20f   : > { %v7620_v49 = vpop.f32.mrf.mxu0  ;;  %2951 = vmatmul.mubr.bf16.gmra.mxu1 %v2635_v28  ;;  %v2289_v39 = vadd.f32 1.0, %v7513_v53  ;;  %v1927_v4 = vadd.f32 %v1801_v1, %v7551_v31  ;;  %v1679_v54 = vmul.f32 %v1553_v8, %v7607_v6  ;;  %v2542_v15 = vmul.f32 %v2416_v5, %v7342_v57 }
 0x210   : > { %v2544_v63 = vmul.f32 %v2418_v55, %v7375_v59  ;;  %v2052_v24 = vmul.f32 0.7978846, %v1926_v27  ;;  %v1928_v0 = vadd.f32 %v1802_v48, %v7561_v2  ;;  %v2291_v29 = vadd.f32 1.0, %v7532_v50  ;;  %v9911_v55 = vld [vmem:[#allocation12_spill] sm:$0xff] }
 0x211   : > { %v7630_v58 = vpop.f32.mrf.mxu0  ;;  %v2415_v13 = vmul.f32 0.5, %v2289_v39  ;;  %v1804_v35 = vmul.f32 0.044715, %v1678_v42  ;;  %v1554_v28 = vmul.f32 %v7627_v36, %v7627_v36  ;;  %v7644_v1 = vadd.f32 %v7426_v60, %v6396_v26 }
 0x212   : > { %v2638_v53 = vpack.c.bf16 %v2544_v63, %v2542_v15  ;;  %v7646_v57 = vpop.eup %5020  ;;  %5030 = vtanh.f32 %v2051_v46  ;;  %v1929_v59 = vadd.f32 %v1803_v12, %v7584_v41  ;;  %v2417_v8 = vmul.f32 0.5, %v2291_v29  ;;  %v9912_v12 = vld [vmem:[#allocation16_spill] sm:$0xff] }
 0x213   : > { %v7638_v3 = vpop.f32.mrf.mxu0  ;;  %v7651_v50 = vpop.eup %5022  ;;  %v2053_v48 = vmul.f32 0.7978846, %v1927_v4  ;;  %v1805_v42 = vmul.f32 0.044715, %v1679_v54  ;;  %v1555_v5 = vmul.f32 %v7644_v1, %v7644_v1  ;;  %v7657_v60 = vadd.f32 %v7443_v30, %v6440_v47 }
 0x214   : > { %2958 = vmatprep.mubr.bf16.mxu1 %v2638_v53  ;;  %v2541_v39 = vmul.f32 %v2415_v13, %v9911_v55  ;;  %v2543_v46 = vmul.f32 %v2417_v8, %v7358_v16  ;;  %v7663_v15 = vadd.f32 %v9912_v12, %v6396_v26  ;;  %v2294_v63 = vadd.f32 1.0, %v7572_v18 }
 0x215   : > { %v7649_v27 = vpop.f32.mrf.mxu0  ;;  %5032 = vtanh.f32 %v2052_v24  ;;  %v2054_v54 = vmul.f32 0.7978846, %v1928_v0  ;;  %v1930_v29 = vadd.f32 %v1804_v35, %v7597_v34  ;;  %v1680_v53 = vmul.f32 %v1554_v28, %v7627_v36 }
 0x216   : > { %9910 = vst [vmem:[#allocation14_spill] sm:$0xff] %v7649_v27  ;;  %v2055_v30 = vmul.f32 0.7978846, %v1929_v59  ;;  %v2637_v27 = vpack.c.bf16 %v2543_v46, %v2541_v39  ;;  %v2296_v13 = vadd.f32 1.0, %v7601_v9  ;;  %v2420_v55 = vmul.f32 0.5, %v2294_v63 }
 0x217   : > { %v7666_v4 = vpop.f32.mrf.mxu0  ;;  %v1931_v8 = vadd.f32 %v1805_v42, %v7607_v6  ;;  %v1681_v12 = vmul.f32 %v1555_v5, %v7644_v1  ;;  %v1556_v18 = vmul.f32 %v7657_v60, %v7657_v60  ;;  %v7679_v24 = vadd.f32 %v7460_v37, %v6440_v47 }
 0x218   : > { %9913 = vst [vmem:[#allocation12_spill] sm:$0xff] %v7666_v4  ;;  %v5025_v0 = vpop.eup %5024  ;;  %5034 = vtanh.f32 %v2053_v48  ;;  %2959 = vmatmul.mubr.bf16.gmra.mxu1 %v2637_v27  ;;  %v1557_v9 = vmul.f32 %v7663_v15, %v7663_v15  ;;  %v2422_v35 = vmul.f32 0.5, %v2296_v13  ;;  %v2293_v28 = vadd.f32 1.0, %v7565_v21 }
 0x219   : > { %v7671_v16 = vpop.f32.mrf.mxu0  ;;  %v7686_v42 = vpop.eup %5026  ;;  %5036 = vtanh.f32 %v2054_v54  ;;  %v2056_v5 = vmul.f32 0.7978846, %v1930_v29  ;;  %v1806_v39 = vmul.f32 0.044715, %v1680_v53  ;;  %v1558_v37 = vmul.f32 %v7679_v24, %v7679_v24 }
 0x21a   : > { %9914 = vst [vmem:[#allocation16_spill] sm:$0xff] %v7671_v16  ;;  %v7690_v46 = vpop.eup %5028  ;;  %v2546_v27 = vmul.f32 %v2420_v55, %v7395_v14  ;;  %v2548_v48 = vmul.f32 %v2422_v35, %v7432_v25  ;;  %v2295_v63 = vadd.f32 1.0, %v7586_v62  ;;  %v2419_v13 = vmul.f32 0.5, %v2293_v28 }
 0x21b   : > { %v7684_v59 = vpop.f32.mrf.mxu0  ;;  %5038 = vtanh.f32 %v2055_v30  ;;  %v1807_v16 = vmul.f32 0.044715, %v1681_v12  ;;  %v1682_v54 = vmul.f32 %v1556_v18, %v7657_v60  ;;  %v1683_v29 = vmul.f32 %v1557_v9, %v7663_v15 }
 0x21c   : > { %9915 = vst [vmem:[#allocation22_spill] sm:$0xff] %v7684_v59  ;;  %v2057_v59 = vmul.f32 0.7978846, %v1931_v8  ;;  %v2640_v53 = vpack.c.bf16 %v2548_v48, %v2546_v27  ;;  %v2421_v4 = vmul.f32 0.5, %v2295_v63  ;;  %v7701_v6 = vadd.f32 %v7467_v44, %v6396_v26 }
 0x21d   : > { %v7695_v21 = vpop.f32.mrf.mxu0  ;;  %5040 = vtanh.f32 %v2056_v5  ;;  %v1932_v25 = vadd.f32 %v1806_v39, %v7627_v36  ;;  %v1684_v62 = vmul.f32 %v1558_v37, %v7679_v24  ;;  %v2545_v30 = vmul.f32 %v2419_v13, %v7380_v56 }
 0x21e   : > { %2966 = vmatprep.mubr.bf16.mxu1 %v2640_v53  ;;  %v2547_v55 = vmul.f32 %v2421_v4, %v7413_v20  ;;  %v1559_v8 = vmul.f32 %v7701_v6, %v7701_v6  ;;  %v7713_v12 = vadd.f32 %v7476_v45, %v6440_v47  ;;  %v7717_v44 = vadd.f32 %v7493_v61, %v6396_v26 }
 0x21f   : > { %v7703_v14 = vpop.f32.mrf.mxu0  ;;  %v7721_v9 = vpop.eup %5030  ;;  %v1933_v56 = vadd.f32 %v1807_v16, %v7644_v1  ;;  %v1808_v35 = vmul.f32 0.044715, %v1682_v54  ;;  %v2298_v20 = vadd.f32 1.0, %v7646_v57  ;;  %v2300_v4 = vadd.f32 1.0, %v5025_v0 }
 0x220   : > { %v1809_v28 = vmul.f32 0.044715, %v1683_v29  ;;  %v2639_v5 = vpack.c.bf16 %v2547_v55, %v2545_v30  ;;  %v1685_v39 = vmul.f32 %v1559_v8, %v7701_v6  ;;  %v1560_v45 = vmul.f32 %v7713_v12, %v7713_v12 }
 0x221   : > { %v7719_v18 = vpop.f32.mrf.mxu0  ;;  %v2058_v61 = vmul.f32 0.7978846, %v1932_v25  ;;  %v1561_v27 = vmul.f32 %v7717_v44, %v7717_v44  ;;  %v2424_v48 = vmul.f32 0.5, %v2298_v20  ;;  %v2426_v63 = vmul.f32 0.5, %v2300_v4 }
 0x222   : > { %v5033_v16 = vpop.eup %5032  ;;  %v1810_v13 = vmul.f32 0.044715, %v1684_v62  ;;  %2967 = vmatmul.mubr.bf16.gmra.mxu1 %v2639_v5  ;;  %v1686_v57 = vmul.f32 %v1560_v45, %v7713_v12  ;;  %v7735_v0 = vadd.f32 %v7502_v11, %v6440_v47  ;;  %v2297_v54 = vadd.f32 1.0, %v7622_v17 }
 0x223   : > { %v7728_v37 = vpop.f32.mrf.mxu0  ;;  %v1934_v53 = vadd.f32 %v1808_v35, %v7657_v60  ;;  %v1811_v25 = vmul.f32 0.044715, %v1685_v39  ;;  %v2550_v30 = vmul.f32 %v2424_v48, %v7454_v32  ;;  %v2552_v55 = vmul.f32 %v2426_v63, %v7487_v33 }
 0x224   : > { %v2059_v8 = vmul.f32 0.7978846, %v1933_v56  ;;  %v1935_v62 = vadd.f32 %v1809_v28, %v7663_v15  ;;  %v1687_v20 = vmul.f32 %v1561_v27, %v7717_v44  ;;  %v2299_v4 = vadd.f32 1.0, %v7651_v50 }
 0x225   : > { %v7738_v29 = vpop.f32.mrf.mxu0  ;;  %v7748_v5 = vpop.eup %5034  ;;  %v1812_v17 = vmul.f32 0.044715, %v1686_v57  ;;  %v2642_v45 = vpack.c.bf16 %v2552_v55, %v2550_v30  ;;  %v1562_v35 = vmul.f32 %v7735_v0, %v7735_v0  ;;  %v2423_v39 = vmul.f32 0.5, %v2297_v54  ;;  %v9918_v55 = vld [vmem:[#allocation17_spill] sm:$0xff] }
 0x226   : > { %v7752_v32 = vpop.eup %5036  ;;  %5042 = vtanh.f32 %v2057_v59  ;;  %v1936_v33 = vadd.f32 %v1810_v13, %v7679_v24  ;;  %v2425_v56 = vmul.f32 0.5, %v2299_v4  ;;  %v7757_v28 = vadd.f32 %v7511_v22, %v6396_v26  ;;  %v9917_v13 = vld [vmem:[#allocation15_spill] sm:$0xff] }
 0x227   : > { %v7746_v11 = vpop.f32.mrf.mxu0  ;;  %5044 = vtanh.f32 %v2058_v61  ;;  %v2060_v27 = vmul.f32 0.7978846, %v1934_v53  ;;  %v1937_v48 = vadd.f32 %v1811_v25, %v7701_v6  ;;  %2974 = vmatprep.mubr.bf16.mxu1 %v2642_v45  ;;  %v7764_v63 = vadd.f32 %v7520_v10, %v6440_v47 }
 0x228   : > { %v7766_v57 = vpop.eup %5038  ;;  %5046 = vtanh.f32 %v2059_v8  ;;  %v2061_v59 = vmul.f32 0.7978846, %v1935_v62  ;;  %v2549_v54 = vmul.f32 %v2423_v39, %v9917_v13  ;;  %v2551_v22 = vmul.f32 %v2425_v56, %v7474_v40 }
 0x229   : > { %v7759_v50 = vpop.f32.mrf.mxu0  ;;  %v1938_v61 = vadd.f32 %v1812_v17, %v7713_v12  ;;  %v1813_v53 = vmul.f32 0.044715, %v1687_v20  ;;  %v1688_v25 = vmul.f32 %v1562_v35, %v7735_v0  ;;  %v7776_v4 = vadd.f32 %v9918_v55, %v6396_v26 }
 0x22a   : > { %9916 = vst [vmem:[#allocation23_spill] sm:$0xff] %v7759_v50  ;;  %v5041_v10 = vpop.eup %5040  ;;  %v2062_v45 = vmul.f32 0.7978846, %v1936_v33  ;;  %v2641_v50 = vpack.c.bf16 %v2551_v22, %v2549_v54  ;;  %v1563_v8 = vmul.f32 %v7757_v28, %v7757_v28  ;;  %v2302_v62 = vadd.f32 1.0, %v7690_v46 }
 0x22b   : > { %v7770_v30 = vpop.f32.mrf.mxu0  ;;  %5048 = vtanh.f32 %v2060_v27  ;;  %v2063_v39 = vmul.f32 0.7978846, %v1937_v48  ;;  %v1564_v20 = vmul.f32 %v7764_v63, %v7764_v63  ;;  %v1565_v17 = vmul.f32 %v7776_v4, %v7776_v4 }
 0x22c   : > { %5050 = vtanh.f32 %v2061_v59  ;;  %2975 = vmatmul.mubr.bf16.gmra.mxu1 %v2641_v50  ;;  %v2304_v35 = vadd.f32 1.0, %v5033_v16  ;;  %v2428_v33 = vmul.f32 0.5, %v2302_v62  ;;  %v7789_v56 = vadd.f32 %v7541_v38, %v6440_v47 }
 0x22d   : > { %v7781_v40 = vpop.f32.mrf.mxu0  ;;  %v2064_v46 = vmul.f32 0.7978846, %v1938_v61  ;;  %v1939_v27 = vadd.f32 %v1813_v53, %v7717_v44  ;;  %v1814_v48 = vmul.f32 0.044715, %v1688_v25  ;;  %v2301_v54 = vadd.f32 1.0, %v7686_v42 }
 0x22e   : > { %5052 = vtanh.f32 %v2062_v45  ;;  %v1689_v22 = vmul.f32 %v1563_v8, %v7757_v28  ;;  %v2430_v55 = vmul.f32 0.5, %v2304_v35  ;;  %v1566_v16 = vmul.f32 %v7789_v56, %v7789_v56 }
 0x22f   : > { %v7791_v13 = vpop.f32.mrf.mxu0  ;;  %5054 = vtanh.f32 %v2063_v39  ;;  %v1690_v38 = vmul.f32 %v1564_v20, %v7764_v63  ;;  %v1691_v59 = vmul.f32 %v1565_v17, %v7776_v4  ;;  %v2303_v61 = vadd.f32 1.0, %v7721_v9 }
 0x230   : > { %v2554_v53 = vmul.f32 %v2428_v33, %v7508_v23  ;;  %v2556_v42 = vmul.f32 %v2430_v55, %v7547_v43  ;;  %v2427_v25 = vmul.f32 0.5, %v2301_v54  ;;  %v7807_v45 = vadd.f32 %v7554_v52, %v6396_v26 }
 0x231   : > { %v7798_v50 = vpop.f32.mrf.mxu0  ;;  %5056 = vtanh.f32 %v2064_v46  ;;  %v2065_v62 = vmul.f32 0.7978846, %v1939_v27  ;;  %v1940_v39 = vadd.f32 %v1814_v48, %v7735_v0  ;;  %v2429_v20 = vmul.f32 0.5, %v2303_v61  ;;  %v9922_v27 = vld [vmem:[#allocation13_spill] sm:$0xff]  ;;  %v9923_v61 = vld [vmem:[#allocation18_spill] sm:$0xff] }
 0x232   : > { %9919 = vst [vmem:[#allocation15_spill] sm:$0xff] %v7798_v50  ;;  %v1815_v35 = vmul.f32 0.044715, %v1689_v22  ;;  %v2644_v17 = vpack.c.bf16 %v2556_v42, %v2554_v53  ;;  %v1692_v9 = vmul.f32 %v1566_v16, %v7789_v56  ;;  %v1567_v23 = vmul.f32 %v7807_v45, %v7807_v45 }
 0x233   : > { %v7809_v8 = vpop.f32.mrf.mxu0  ;;  %v7817_v33 = vpop.eup %5042  ;;  %v1816_v52 = vmul.f32 0.044715, %v1690_v38  ;;  %v2553_v54 = vmul.f32 %v2427_v25, %v7491_v19  ;;  %v2555_v46 = vmul.f32 %v2429_v20, %v7526_v51  ;;  %v7823_v48 = vadd.f32 %v9922_v27, %v6440_v47 }
 0x234   : > { %9920 = vst [vmem:[#allocation17_spill] sm:$0xff] %v7809_v8  ;;  %v5045_v22 = vpop.eup %5044  ;;  %v1817_v55 = vmul.f32 0.044715, %v1691_v59  ;;  %2982 = vmatprep.mubr.bf16.mxu1 %v2644_v17  ;;  %v1693_v16 = vmul.f32 %v1567_v23, %v7807_v45  ;;  %v7828_v53 = vadd.f32 %v9923_v61, %v6396_v26  ;;  %v2306_v42 = vadd.f32 1.0, %v7752_v32 }
 0x235   : > { %v7815_v43 = vpop.f32.mrf.mxu0  ;;  %v7833_v19 = vpop.eup %5046  ;;  %5058 = vtanh.f32 %v2065_v62  ;;  %v2643_v51 = vpack.c.bf16 %v2555_v46, %v2553_v54  ;;  %v1568_v25 = vmul.f32 %v7823_v48, %v7823_v48  ;;  %v2308_v20 = vadd.f32 1.0, %v5041_v10 }
 0x236   : > { %9921 = vst [vmem:[#allocation24_spill] sm:$0xff] %v7815_v43  ;;  %v1941_v59 = vadd.f32 %v1815_v35, %v7757_v28  ;;  %v1818_v17 = vmul.f32 0.044715, %v1692_v9  ;;  %v1569_v23 = vmul.f32 %v7828_v53, %v7828_v53  ;;  %v2432_v27 = vmul.f32 0.5, %v2306_v42 }
 0x237   : > { %v7831_v38 = vpop.f32.mrf.mxu0  ;;  %2983 = vmatmul.mubr.bf16.gmra.mxu1 %v2643_v51  ;;  %v1694_v32 = vmul.f32 %v1568_v25, %v7823_v48  ;;  %v2434_v43 = vmul.f32 0.5, %v2308_v20  ;;  %v7845_v62 = vadd.f32 %v7589_v7, %v6440_v47  ;;  %v2305_v54 = vadd.f32 1.0, %v7748_v5 }
 0x238   : > { %9924 = vst [vmem:[#allocation13_spill] sm:$0xff] %v7831_v38  ;;  %v5049_v10 = vpop.eup %5048  ;;  %v2066_v46 = vmul.f32 0.7978846, %v1940_v39  ;;  %v1942_v35 = vadd.f32 %v1816_v52, %v7764_v63  ;;  %v1943_v9 = vadd.f32 %v1817_v55, %v7776_v4  ;;  %v1819_v38 = vmul.f32 0.044715, %v1693_v16  ;;  %v9927_v55 = vld [vmem:[#allocation19_spill] sm:$0xff] }
 0x239   : > { %v7840_v61 = vpop.f32.mrf.mxu0  ;;  %v2558_v51 = vmul.f32 %v2432_v27, %v7561_v2  ;;  %v2560_v25 = vmul.f32 %v2434_v43, %v7597_v34  ;;  %v1570_v7 = vmul.f32 %v7845_v62, %v7845_v62  ;;  %v2307_v5 = vadd.f32 1.0, %v7766_v57 }
 0x23a   : > { %9925 = vst [vmem:[#allocation18_spill] sm:$0xff] %v7840_v61  ;;  %v7852_v61 = vpop.eup %5050  ;;  %v2067_v20 = vmul.f32 0.7978846, %v1941_v59  ;;  %v1944_v39 = vadd.f32 %v1818_v17, %v7789_v56  ;;  %v2431_v52 = vmul.f32 0.5, %v2305_v54  ;;  %v7862_v16 = vadd.f32 %v9927_v55, %v6396_v26 }
 0x23b   : > { %v7850_v42 = vpop.f32.mrf.mxu0  ;;  %v7866_v8 = vpop.eup %5052  ;;  %v1820_v2 = vmul.f32 0.044715, %v1694_v32  ;;  %v1695_v34 = vmul.f32 %v1569_v23, %v7828_v53  ;;  %v2646_v43 = vpack.c.bf16 %v2560_v25, %v2558_v51  ;;  %v2433_v27 = vmul.f32 0.5, %v2307_v5 }
 0x23c   : > { %9926 = vst [vmem:[#allocation25_spill] sm:$0xff] %v7850_v42  ;;  %v7869_v50 = vpop.eup %5054  ;;  %5060 = vtanh.f32 %v2066_v46  ;;  %v2068_v57 = vmul.f32 0.7978846, %v1942_v35  ;;  %v1945_v59 = vadd.f32 %v1819_v38, %v7807_v45  ;;  %v1571_v17 = vmul.f32 %v7862_v16, %v7862_v16  ;;  %v9930_v35 = vld [vmem:[#allocation21_spill] sm:$0xff] }
 0x23d   : > { %v7864_v42 = vpop.f32.mrf.mxu0  ;;  %v2069_v55 = vmul.f32 0.7978846, %v1943_v9  ;;  %2990 = vmatprep.mubr.bf16.mxu1 %v2646_v43  ;;  %v2557_v32 = vmul.f32 %v2431_v52, %v7551_v31  ;;  %v2559_v23 = vmul.f32 %v2433_v27, %v7584_v41  ;;  %5062 = vtanh.f32 %v2067_v20 }
 0x23e   : > { %9928 = vst [vmem:[#allocation19_spill] sm:$0xff] %v7864_v42  ;;  %v1696_v42 = vmul.f32 %v1570_v7, %v7845_v62  ;;  %v7879_v51 = vpop.eup %5056  ;;  %v2070_v46 = vmul.f32 0.7978846, %v1944_v39  ;;  %v7883_v38 = vadd.f32 %v9930_v35, %v6440_v47  ;;  %v2310_v25 = vadd.f32 1.0, %v5045_v22 }
 0x23f   : > { %v7874_v54 = vpop.f32.mrf.mxu0  ;;  %v1946_v9 = vadd.f32 %v1820_v2, %v7823_v48  ;;  %v1821_v43 = vmul.f32 0.044715, %v1695_v34  ;;  %v1697_v7 = vmul.f32 %v1571_v17, %v7862_v16  ;;  %5064 = vtanh.f32 %v2068_v57 }
 0x240   : > { %9929 = vst [vmem:[#allocation26_spill] sm:$0xff] %v7874_v54  ;;  %v2645_v54 = vpack.c.bf16 %v2559_v23, %v2557_v32  ;;  %v2071_v31 = vmul.f32 0.7978846, %v1945_v59  ;;  %v2312_v41 = vadd.f32 1.0, %v5049_v10  ;;  %5066 = vtanh.f32 %v2069_v55 }
 0x241   : > { %v7885_v5 = vpop.f32.mrf.mxu0  ;;  %v1822_v20 = vmul.f32 0.044715, %v1696_v42  ;;  %v7891_v39 = vadd.f32 %v7620_v49, %v6396_v26  ;;  %v2436_v22 = vmul.f32 0.5, %v2310_v25  ;;  %v1572_v2 = vmul.f32 %v7883_v38, %v7883_v38 }
 0x242   : > { %2991 = vmatmul.mubr.bf16.gmra.mxu1 %v2645_v54  ;;  %v7893_v27 = vpop.eup %5058  ;;  %v2438_v34 = vmul.f32 0.5, %v2312_v41  ;;  %v7899_v57 = vadd.f32 %v7630_v58, %v6440_v47  ;;  %v2309_v10 = vadd.f32 1.0, %v7817_v33  ;;  %5068 = vtanh.f32 %v2070_v46 }
 0x243   : > { %v1470_v52 = vpop.f32.mrf.mxu0  ;;  %v2072_v42 = vmul.f32 0.7978846, %v1946_v9  ;;  %v1947_v17 = vadd.f32 %v1821_v43, %v7828_v53  ;;  %v1823_v49 = vmul.f32 0.044715, %v1697_v7  ;;  %5070 = vtanh.f32 %v2071_v31  ;;  %v9931_v31 = vld [vmem:[#allocation20_spill] sm:$0xff] }
 0x244   : > { %v2562_v54 = vmul.f32 %v2436_v22, %v7627_v36  ;;  %v2564_v55 = vmul.f32 %v2438_v34, %v7657_v60  ;;  %v2311_v32 = vadd.f32 1.0, %v7833_v19  ;;  %v1948_v58 = vadd.f32 %v1822_v20, %v7845_v62  ;;  %v9933_v22 = vld [vmem:[#allocation12_spill] sm:$0xff] }
 0x245   : > { %v1471_v59 = vpop.f32.mrf.mxu0  ;;  %v1573_v33 = vmul.f32 %v7891_v39, %v7891_v39  ;;  %v2435_v35 = vmul.f32 0.5, %v2309_v10  ;;  %v7913_v46 = vadd.f32 %v7638_v3, %v6396_v26  ;;  %v1698_v25 = vmul.f32 %v1572_v2, %v7883_v38  ;;  %v9932_v3 = vld [vmem:[#allocation14_spill] sm:$0xff] }
 0x246   : > { %v2648_v9 = vpack.c.bf16 %v2564_v55, %v2562_v54  ;;  %v1574_v36 = vmul.f32 %v7899_v57, %v7899_v57  ;;  %v2437_v60 = vmul.f32 0.5, %v2311_v32  ;;  %5072 = vtanh.f32 %v2072_v42 }
 0x247   : > { %v7906_v23 = vpop.f32.mrf.mxu0  ;;  %v2073_v43 = vmul.f32 0.7978846, %v1947_v17  ;;  %v1949_v7 = vadd.f32 %v1823_v49, %v7862_v16  ;;  %v2561_v41 = vmul.f32 %v2435_v35, %v9931_v31  ;;  %v7923_v20 = vadd.f32 %v9932_v3, %v6440_v47 }
 0x248   : > { %2998 = vmatprep.mubr.bf16.mxu1 %v2648_v9  ;;  %v2563_v52 = vmul.f32 %v2437_v60, %v7644_v1  ;;  %v7927_v2 = vadd.f32 %v9933_v22, %v6396_v26  ;;  %v2074_v59 = vmul.f32 0.7978846, %v1948_v58  ;;  %v1699_v42 = vmul.f32 %v1573_v33, %v7891_v39 }
 0x249   : > { %v2842_v19 = vpop.f32.mrf.mxu0  ;;  %v5061_v10 = vpop.eup %5060  ;;  %v1575_v17 = vmul.f32 %v7913_v46, %v7913_v46  ;;  %v2314_v49 = vadd.f32 1.0, %v7866_v8  ;;  %v1824_v1 = vmul.f32 0.044715, %v1698_v25  ;;  %v1700_v54 = vmul.f32 %v1574_v36, %v7899_v57  ;;  %v9934_v8 = vld [vmem:[#allocation16_spill] sm:$0xff] }
 0x24a   : > { %v2647_v55 = vpack.c.bf16 %v2563_v52, %v2561_v41  ;;  %v1576_v32 = vmul.f32 %v7923_v20, %v7923_v20  ;;  %v7938_v9 = vpop.eup %5062  ;;  %5074 = vtanh.f32 %v2073_v43  ;;  %v2316_v58 = vadd.f32 1.0, %v7879_v51 }
 0x24b   : > { %v7929_v34 = vpop.f32.mrf.mxu0  ;;  %v2440_v60 = vmul.f32 0.5, %v2314_v49  ;;  %v2075_v33 = vmul.f32 0.7978846, %v1949_v7  ;;  %v1577_v19 = vmul.f32 %v7927_v2, %v7927_v2  ;;  %v7945_v25 = vadd.f32 %v9934_v8, %v6440_v47 }
 0x24c   : > { %2999 = vmatmul.mubr.bf16.gmra.mxu1 %v2647_v55  ;;  %v2313_v36 = vadd.f32 1.0, %v7852_v61  ;;  %v5065_v31 = vpop.eup %5064  ;;  %5076 = vtanh.f32 %v2074_v59  ;;  %v1825_v41 = vmul.f32 0.044715, %v1699_v42  ;;  %v1701_v52 = vmul.f32 %v1575_v17, %v7913_v46  ;;  %v9935_v59 = vld [vmem:[#allocation22_spill] sm:$0xff] }
 0x24d   : > { %v2845_v35 = vpop.f32.mrf.mxu0  ;;  %v2442_v43 = vmul.f32 0.5, %v2316_v58  ;;  %v7949_v3 = vpop.eup %5066  ;;  %v1950_v51 = vadd.f32 %v1824_v1, %v7883_v38  ;;  %v1826_v7 = vmul.f32 0.044715, %v1700_v54  ;;  %v1702_v22 = vmul.f32 %v1576_v32, %v7923_v20 }
 0x24e   : > { %v2315_v49 = vadd.f32 1.0, %v7869_v50  ;;  %v2566_v55 = vmul.f32 %v2440_v60, %v7679_v24  ;;  %v2439_v61 = vmul.f32 0.5, %v2313_v36  ;;  %v7958_v42 = vadd.f32 %v9935_v59, %v6396_v26 }
 0x24f   : > { %v2568_v35 = vmul.f32 %v2442_v43, %v7713_v12  ;;  %v7960_v17 = vpop.eup %5068  ;;  %5078 = vtanh.f32 %v2075_v33  ;;  %v1703_v58 = vmul.f32 %v1577_v19, %v7927_v2  ;;  %v1578_v1 = vmul.f32 %v7945_v25, %v7945_v25 }
 0x250   : > { %v2441_v54 = vmul.f32 0.5, %v2315_v49  ;;  %v7965_v32 = vpop.eup %5070  ;;  %v1951_v24 = vadd.f32 %v1825_v41, %v7891_v39  ;;  %v1827_v50 = vmul.f32 0.044715, %v1701_v52  ;;  %v1579_v60 = vmul.f32 %v7958_v42, %v7958_v42 }
 0x251   : > { %v2650_v12 = vpack.c.bf16 %v2568_v35, %v2566_v55  ;;  %v2076_v8 = vmul.f32 0.7978846, %v1950_v51  ;;  %v1952_v36 = vadd.f32 %v1826_v7, %v7899_v57  ;;  %v2565_v33 = vmul.f32 %v2439_v61, %v7663_v15 }
 0x252   : > { %v2567_v19 = vmul.f32 %v2441_v54, %v7701_v6  ;;  %v1828_v43 = vmul.f32 0.044715, %v1702_v22  ;;  %v7975_v49 = vadd.f32 %v7695_v21, %v6440_v47  ;;  %v7979_v41 = vadd.f32 %v7703_v14, %v6396_v26 }
 0x253   : > { %3006 = vmatprep.mubr.bf16.mxu1 %v2650_v12  ;;  %v2318_v52 = vadd.f32 1.0, %v5061_v10  ;;  %v5073_v55 = vpop.eup %5072  ;;  %v1829_v35 = vmul.f32 0.044715, %v1703_v58  ;;  %v1704_v51 = vmul.f32 %v1578_v1, %v7945_v25  ;;  %v2320_v59 = vadd.f32 1.0, %v5065_v31 }
 0x254   : > { %v2649_v7 = vpack.c.bf16 %v2567_v19, %v2565_v33  ;;  %v2077_v15 = vmul.f32 0.7978846, %v1951_v24  ;;  %v1953_v6 = vadd.f32 %v1827_v50, %v7913_v46  ;;  %v1705_v22 = vmul.f32 %v1579_v60, %v7958_v42 }
 0x255   : > { %v1580_v21 = vmul.f32 %v7975_v49, %v7975_v49  ;;  %5080 = vtanh.f32 %v2076_v8  ;;  %v1581_v14 = vmul.f32 %v7979_v41, %v7979_v41  ;;  %v2444_v10 = vmul.f32 0.5, %v2318_v52 }
 0x256   : > { %3007 = vmatmul.mubr.bf16.gmra.mxu1 %v2649_v7  ;;  %v2446_v61 = vmul.f32 0.5, %v2320_v59  ;;  %v2078_v58 = vmul.f32 0.7978846, %v1952_v36  ;;  %v1954_v1 = vadd.f32 %v1828_v43, %v7923_v20  ;;  %v7991_v31 = vadd.f32 %v7719_v18, %v6440_v47 }
 0x257   : > { %v2317_v54 = vadd.f32 1.0, %v7893_v27  ;;  %v7996_v50 = vpop.eup %5074  ;;  %v1955_v12 = vadd.f32 %v1829_v35, %v7927_v2  ;;  %v1830_v60 = vmul.f32 0.044715, %v1704_v51  ;;  %v2570_v8 = vmul.f32 %v2444_v10, %v7735_v0 }
 0x258   : > { %v2572_v33 = vmul.f32 %v2446_v61, %v7764_v63  ;;  %v2079_v36 = vmul.f32 0.7978846, %v1953_v6  ;;  %v1831_v19 = vmul.f32 0.044715, %v1705_v22  ;;  %v1706_v43 = vmul.f32 %v1580_v21, %v7975_v49 }
 0x259   : > { %v8004_v18 = vadd.f32 %v7728_v37, %v6396_v26  ;;  %v8006_v52 = vpop.eup %5076  ;;  %v1707_v7 = vmul.f32 %v1581_v14, %v7979_v41  ;;  %v2319_v35 = vadd.f32 1.0, %v7938_v9  ;;  %v2443_v51 = vmul.f32 0.5, %v2317_v54 }
 0x25a   : > { %v7994_v24 = vpop.f32.mrf.mxu0  ;;  %v2652_v59 = vpack.c.bf16 %v2572_v33, %v2570_v8  ;;  %5082 = vtanh.f32 %v2077_v15  ;;  %v2080_v63 = vmul.f32 0.7978846, %v1954_v1  ;;  %v1582_v6 = vmul.f32 %v7991_v31, %v7991_v31 }
 0x25b   : > { %5084 = vtanh.f32 %v2078_v58  ;;  %v2081_v37 = vmul.f32 0.7978846, %v1955_v12  ;;  %v1956_v21 = vadd.f32 %v1830_v60, %v7945_v25  ;;  %v2445_v10 = vmul.f32 0.5, %v2319_v35 }
 0x25c   : > { %v2850_v27 = vpop.f32.mrf.mxu0  ;;  %v8010_v0 = vpop.f32.mrf.mxu1  ;;  %3014 = vmatprep.mubr.bf16.mxu1 %v2652_v59  ;;  %5086 = vtanh.f32 %v2079_v36  ;;  %v1957_v9 = vadd.f32 %v1831_v19, %v7958_v42  ;;  %v1832_v54 = vmul.f32 0.044715, %v1706_v43  ;;  %v1583_v15 = vmul.f32 %v8004_v18, %v8004_v18 }
 0x25d   : > { %v8017_v61 = vpop.eup %5078  ;;  %v1833_v8 = vmul.f32 0.044715, %v1707_v7  ;;  %v2569_v33 = vmul.f32 %v2443_v51, %v7717_v44  ;;  %v2571_v58 = vmul.f32 %v2445_v10, %v7757_v28  ;;  %v2322_v12 = vadd.f32 1.0, %v7960_v17 }
 0x25e   : > { %v8014_v22 = vpop.f32.mrf.mxu0  ;;  %v2858_v14 = vpop.f32.mrf.mxu1  ;;  %5088 = vtanh.f32 %v2080_v63  ;;  %v1708_v27 = vmul.f32 %v1582_v6, %v7991_v31  ;;  %v2324_v36 = vadd.f32 1.0, %v5073_v55  ;;  %v2082_v19 = vmul.f32 0.7978846, %v1956_v21 }
 0x25f   : > { %5090 = vtanh.f32 %v2081_v37  ;;  %v2651_v43 = vpack.c.bf16 %v2571_v58, %v2569_v33  ;;  %v1709_v35 = vmul.f32 %v1583_v15, %v8004_v18  ;;  %v8031_v7 = vadd.f32 %v7738_v29, %v6440_v47  ;;  %v9936_v33 = vld [vmem:[#allocation23_spill] sm:$0xff] }
 0x260   : > { %v2853_v1 = vpop.f32.mrf.mxu0  ;;  %v8025_v60 = vpop.f32.mrf.mxu1  ;;  %v2448_v44 = vmul.f32 0.5, %v2322_v12  ;;  %v2450_v28 = vmul.f32 0.5, %v2324_v36  ;;  %v2083_v51 = vmul.f32 0.7978846, %v1957_v9  ;;  %v1958_v17 = vadd.f32 %v1832_v54, %v7975_v49 }
 0x261   : > { %v1959_v63 = vadd.f32 %v1833_v8, %v7979_v41  ;;  %3015 = vmatmul.mubr.bf16.gmra.mxu1 %v2651_v43  ;;  %v2321_v55 = vadd.f32 1.0, %v7949_v3  ;;  %v1834_v21 = vmul.f32 0.044715, %v1708_v27  ;;  %v8040_v10 = vadd.f32 %v7746_v11, %v6396_v26 }
 0x262   : > { %v2861_v59 = vpop.f32.mrf.mxu1  ;;  %v5081_v37 = vpop.eup %5080  ;;  %v2574_v29 = vmul.f32 %v2448_v44, %v7789_v56  ;;  %v2576_v14 = vmul.f32 %v2450_v28, %v7823_v48  ;;  %5092 = vtanh.f32 %v2082_v19  ;;  %v2323_v9 = vadd.f32 1.0, %v7965_v32 }
 0x263   : > { %v2447_v54 = vmul.f32 0.5, %v2321_v55  ;;  %v1835_v1 = vmul.f32 0.044715, %v1709_v35  ;;  %v1584_v3 = vmul.f32 %v8031_v7, %v8031_v7  ;;  %v8049_v58 = vadd.f32 %v9936_v33, %v6440_v47 }
 0x264   : > { %v8036_v6 = vpop.f32.mrf.mxu1  ;;  %v2654_v8 = vpack.c.bf16 %v2576_v14, %v2574_v29  ;;  %5094 = vtanh.f32 %v2083_v51  ;;  %v2084_v11 = vmul.f32 0.7978846, %v1958_v17  ;;  %v2449_v12 = vmul.f32 0.5, %v2323_v9 }
 0x265   : > { %v2085_v48 = vmul.f32 0.7978846, %v1959_v63  ;;  %v1960_v27 = vadd.f32 %v1834_v21, %v7991_v31  ;;  %v1585_v32 = vmul.f32 %v8040_v10, %v8040_v10  ;;  %v8058_v36 = vadd.f32 %v7770_v30, %v6396_v26 }
 0x266   : > { %v2866_v15 = vpop.f32.mrf.mxu1  ;;  %3022 = vmatprep.mubr.bf16.mxu1 %v2654_v8  ;;  %v2573_v43 = vmul.f32 %v2447_v54, %v7776_v4  ;;  %v2575_v59 = vmul.f32 %v2449_v12, %v7807_v45  ;;  %v8066_v35 = vadd.f32 %v7781_v40, %v6440_v47  ;;  %v2326_v44 = vadd.f32 1.0, %v8006_v52  ;;  %v9937_v54 = vld [vmem:[#allocation15_spill] sm:$0xff] }
 0x267   : > { %v8060_v19 = vpop.eup %5082  ;;  %v1961_v17 = vadd.f32 %v1835_v1, %v8004_v18  ;;  %v1710_v63 = vmul.f32 %v1584_v3, %v8031_v7  ;;  %v1586_v30 = vmul.f32 %v8049_v58, %v8049_v58  ;;  %v8075_v4 = vadd.f32 %v7791_v13, %v6396_v26 }
 0x268   : > { %v8051_v56 = vpop.f32.mrf.mxu1  ;;  %v5085_v51 = vpop.eup %5084  ;;  %5096 = vtanh.f32 %v2084_v11  ;;  %v2653_v40 = vpack.c.bf16 %v2575_v59, %v2573_v43  ;;  %v2328_v55 = vadd.f32 1.0, %v5081_v37  ;;  %v2452_v21 = vmul.f32 0.5, %v2326_v44 }
 0x269   : > { %v8077_v45 = vpop.eup %5086  ;;  %v2086_v29 = vmul.f32 0.7978846, %v1960_v27  ;;  %v1711_v14 = vmul.f32 %v1585_v32, %v8040_v10  ;;  %v1587_v9 = vmul.f32 %v8058_v36, %v8058_v36  ;;  %v8086_v15 = vadd.f32 %v9937_v54, %v6440_v47 }
 0x26a   : > { %v2869_v28 = vpop.f32.mrf.mxu1  ;;  %5098 = vtanh.f32 %v2085_v48  ;;  %3023 = vmatmul.mubr.bf16.gmra.mxu1 %v2653_v40  ;;  %v1588_v1 = vmul.f32 %v8066_v35, %v8066_v35  ;;  %v2454_v37 = vmul.f32 0.5, %v2328_v55  ;;  %v2325_v3 = vadd.f32 1.0, %v7996_v50 }
 0x26b   : > { %v5089_v13 = vpop.eup %5088  ;;  %v2087_v11 = vmul.f32 0.7978846, %v1961_v17  ;;  %v1836_v12 = vmul.f32 0.044715, %v1710_v63  ;;  %v1712_v27 = vmul.f32 %v1586_v30, %v8049_v58  ;;  %v1589_v32 = vmul.f32 %v8075_v4, %v8075_v4 }
 0x26c   : > { %v8079_v52 = vpop.f32.mrf.mxu1  ;;  %v8091_v33 = vpop.eup %5090  ;;  %v2578_v43 = vmul.f32 %v2452_v21, %v7845_v62  ;;  %v2580_v48 = vmul.f32 %v2454_v37, %v7883_v38  ;;  %v2327_v59 = vadd.f32 1.0, %v8017_v61  ;;  %v2451_v44 = vmul.f32 0.5, %v2325_v3  ;;  %v9939_v62 = vld [vmem:[#allocation17_spill] sm:$0xff] }
 0x26d   : > { %5100 = vtanh.f32 %v2086_v29  ;;  %v1837_v50 = vmul.f32 0.044715, %v1711_v14  ;;  %v1713_v40 = vmul.f32 %v1587_v9, %v8058_v36  ;;  %v1590_v17 = vmul.f32 %v8086_v15, %v8086_v15  ;;  %v9940_v3 = vld [vmem:[#allocation13_spill] sm:$0xff] }
 0x26e   : > { %v2874_v8 = vpop.f32.mrf.mxu1  ;;  %v1714_v63 = vmul.f32 %v1588_v1, %v8066_v35  ;;  %v2656_v30 = vpack.c.bf16 %v2580_v48, %v2578_v43  ;;  %v2453_v55 = vmul.f32 0.5, %v2327_v59  ;;  %v8107_v21 = vadd.f32 %v9939_v62, %v6396_v26 }
 0x26f   : > { %v8109_v61 = vpop.eup %5092  ;;  %5102 = vtanh.f32 %v2087_v11  ;;  %v1962_v29 = vadd.f32 %v1836_v12, %v8031_v7  ;;  %v1838_v14 = vmul.f32 0.044715, %v1712_v27  ;;  %v1715_v9 = vmul.f32 %v1589_v32, %v8075_v4  ;;  %v9942_v27 = vld [vmem:[#allocation24_spill] sm:$0xff] }
 0x270   : > { %v8099_v28 = vpop.f32.mrf.mxu1  ;;  %3030 = vmatprep.mubr.bf16.mxu1 %v2656_v30  ;;  %v2577_v54 = vmul.f32 %v2451_v44, %v7828_v53  ;;  %v2579_v1 = vmul.f32 %v2453_v55, %v7862_v16  ;;  %v1591_v37 = vmul.f32 %v8107_v21, %v8107_v21  ;;  %v8119_v8 = vadd.f32 %v9940_v3, %v6396_v26 }
 0x271   : > { %9938 = vst [vmem:[#allocation21_spill] sm:$0xff] %v8099_v28  ;;  %v8123_v11 = vpop.eup %5094  ;;  %v1716_v12 = vmul.f32 %v1590_v17, %v8086_v15  ;;  %v8128_v32 = vadd.f32 %v9942_v27, %v6440_v47  ;;  %v2330_v53 = vadd.f32 1.0, %v5085_v51  ;;  %v2332_v48 = vadd.f32 1.0, %v5089_v13 }
 0x272   : > { %v2877_v38 = vpop.f32.mrf.mxu1  ;;  %v1963_v16 = vadd.f32 %v1837_v50, %v8040_v10  ;;  %v1839_v59 = vmul.f32 0.044715, %v1713_v40  ;;  %v1840_v44 = vmul.f32 0.044715, %v1714_v63  ;;  %v2655_v30 = vpack.c.bf16 %v2579_v1, %v2577_v54 }
 0x273   : > { %v2088_v62 = vmul.f32 0.7978846, %v1962_v29  ;;  %v1593_v38 = vmul.f32 %v8119_v8, %v8119_v8  ;;  %v2456_v3 = vmul.f32 0.5, %v2330_v53  ;;  %v1964_v17 = vadd.f32 %v1838_v14, %v8049_v58 }
 0x274   : > { %v8121_v43 = vpop.f32.mrf.mxu1  ;;  %v1841_v28 = vmul.f32 0.044715, %v1715_v9  ;;  %3031 = vmatmul.mubr.bf16.gmra.mxu1 %v2655_v30  ;;  %v1717_v27 = vmul.f32 %v1591_v37, %v8107_v21  ;;  %v2329_v51 = vadd.f32 1.0, %v8060_v19  ;;  %v1842_v40 = vmul.f32 0.044715, %v1716_v12 }
 0x275   : > { %9941 = vst [vmem:[#allocation20_spill] sm:$0xff] %v8121_v43  ;;  %v2458_v43 = vmul.f32 0.5, %v2332_v48  ;;  %v5097_v50 = vpop.eup %5096  ;;  %v1592_v63 = vmul.f32 %v8128_v32, %v8128_v32  ;;  %v2582_v29 = vmul.f32 %v2456_v3, %v7899_v57  ;;  %v2089_v1 = vmul.f32 0.7978846, %v1963_v16 }
 0x276   : > { %v2882_v55 = vpop.f32.mrf.mxu1  ;;  %v1965_v14 = vadd.f32 %v1839_v59, %v8058_v36  ;;  %v1966_v9 = vadd.f32 %v1840_v44, %v8066_v35  ;;  %v2331_v37 = vadd.f32 1.0, %v8077_v45  ;;  %v1719_v48 = vmul.f32 %v1593_v38, %v8119_v8 }
 0x277   : > { %v2584_v54 = vmul.f32 %v2458_v43, %v7923_v20  ;;  %v8145_v19 = vpop.eup %5098  ;;  %v2455_v30 = vmul.f32 0.5, %v2329_v51  ;;  %v9944_v55 = vld [vmem:[#allocation25_spill] sm:$0xff]  ;;  %5104 = vtanh.f32 %v2088_v62  ;;  %v1967_v57 = vadd.f32 %v1841_v28, %v8075_v4 }
 0x278   : > { %v8136_v13 = vpop.f32.mrf.mxu1  ;;  %v1843_v20 = vmul.f32 0.044715, %v1717_v27  ;;  %v2457_v43 = vmul.f32 0.5, %v2331_v37  ;;  %v2090_v59 = vmul.f32 0.7978846, %v1964_v17  ;;  %v1968_v45 = vadd.f32 %v1842_v40, %v8086_v15  ;;  %v9945_v17 = vld [vmem:[#allocation18_spill] sm:$0xff] }
 0x279   : > { %9943 = vst [vmem:[#allocation14_spill] sm:$0xff] %v8136_v13  ;;  %v2658_v12 = vpack.c.bf16 %v2584_v54, %v2582_v29  ;;  %v8150_v13 = vadd.f32 %v9944_v55, %v6396_v26  ;;  %v1718_v44 = vmul.f32 %v1592_v63, %v8128_v32  ;;  %5106 = vtanh.f32 %v2089_v1 }
 0x27a   : > { %v2885_v53 = vpop.f32.mrf.mxu1  ;;  %v8159_v3 = vpop.eup %5100  ;;  %v2091_v51 = vmul.f32 0.7978846, %v1965_v14  ;;  %v2581_v62 = vmul.f32 %v2455_v30, %v7891_v39  ;;  %v2583_v28 = vmul.f32 %v2457_v43, %v7913_v46  ;;  %v2092_v29 = vmul.f32 0.7978846, %v1966_v9  ;;  %v8175_v39 = vld [vmem:[%s9748_s4] ss:$0 sm:$0xff] }
 0x27b   : > { %3038 = vmatprep.mubr.bf16.mxu1 %v2658_v12  ;;  %v1595_v38 = vmul.f32 %v8150_v13, %v8150_v13  ;;  %v1845_v54 = vmul.f32 0.044715, %v1719_v48  ;;  %v8165_v40 = vadd.f32 %v9945_v17, %v6440_v47  ;;  %v2093_v53 = vmul.f32 0.7978846, %v1967_v57  ;;  %v9946_v30 = vld [vmem:[#allocation19_spill] sm:$0xff] }
 0x27c   : > { %v8153_v16 = vpop.f32.mrf.mxu1  ;;  %v8168_v37 = vpop.eup %5102  ;;  %v1969_v12 = vadd.f32 %v1843_v20, %v8107_v21  ;;  %v2657_v1 = vpack.c.bf16 %v2583_v28, %v2581_v62  ;;  %v2334_v14 = vadd.f32 1.0, %v8109_v61  ;;  %5108 = vtanh.f32 %v2090_v59  ;;  %v9947_v28 = vld [vmem:[#allocation26_spill] sm:$0xff] }
 0x27d   : > { %v1721_v63 = vmul.f32 %v1595_v38, %v8150_v13  ;;  %v2094_v9 = vmul.f32 0.7978846, %v1968_v45  ;;  %v1844_v48 = vmul.f32 0.044715, %v1718_v44  ;;  %v8181_v55 = vadd.f32 %v9946_v30, %v6440_v47 }
 0x27e   : > { %v2890_v27 = vpop.f32.mrf.mxu1  ;;  %5110 = vtanh.f32 %v2091_v51  ;;  %3039 = vmatmul.mubr.bf16.gmra.mxu1 %v2657_v1  ;;  %v2336_v20 = vadd.f32 1.0, %v5097_v50  ;;  %v2460_v43 = vmul.f32 0.5, %v2334_v14  ;;  %v1971_v38 = vadd.f32 %v1845_v54, %v8119_v8 }
 0x27f   : > { %v1847_v57 = vmul.f32 0.044715, %v1721_v63  ;;  %5112 = vtanh.f32 %v2092_v29  ;;  %v1594_v62 = vmul.f32 %v8165_v40, %v8165_v40  ;;  %v8188_v59 = vadd.f32 %v8175_v39, %v8010_v0 }
 0x280   : > { %v8177_v46 = vpop.f32.mrf.mxu1  ;;  %5114 = vtanh.f32 %v2093_v53  ;;  %v2095_v45 = vmul.f32 0.7978846, %v1969_v12  ;;  %v2462_v44 = vmul.f32 0.5, %v2336_v20  ;;  %v1970_v51 = vadd.f32 %v1844_v48, %v8128_v32 }
 0x281   : > { %5116 = vtanh.f32 %v2094_v9  ;;  %v1596_v50 = vmul.f32 %v8181_v55, %v8181_v55  ;;  %v8195_v27 = vadd.f32 %v9947_v28, %v6396_v26  ;;  %v1973_v29 = vadd.f32 %v1847_v57, %v8150_v13 }
 0x282   : > { %v2893_v61 = vpop.f32.mrf.mxu1  ;;  %v2586_v54 = vmul.f32 %v2460_v43, %v7945_v25  ;;  %v2588_v0 = vmul.f32 %v2462_v44, %v7975_v49  ;;  %v3287_v17 = vand.u32 2147483647, %v8188_v59  ;;  %v2097_v53 = vmul.f32 0.7978846, %v1971_v38 }
 0x283   : > { %v1720_v12 = vmul.f32 %v1594_v62, %v8165_v40  ;;  %v8206_v1 = vadd.f32 %v7885_v5, %v6440_v47  ;;  %v2333_v26 = vadd.f32 1.0, %v8091_v33  ;;  %5118 = vtanh.f32 %v2095_v45 }
 0x284   : > { %v2660_v14 = vpack.c.bf16 %v2588_v0, %v2586_v54  ;;  %v3350_v9 = vsub.f32 0.0, %v3287_v17  ;;  %v2335_v25 = vadd.f32 1.0, %v8123_v11  ;;  %v5105_v49 = vpop.eup %5104  ;;  %v1722_v30 = vmul.f32 %v1596_v50, %v8181_v55 }
 0x285   : > { %v1597_v57 = vmul.f32 %v8195_v27, %v8195_v27  ;;  %v2459_v20 = vmul.f32 0.5, %v2333_v26  ;;  %v8215_v43 = vadd.f32 %v8175_v39, %v8025_v60  ;;  %v2099_v47 = vmul.f32 0.7978846, %v1973_v29 }
 0x286   : > { %v8201_v63 = vpop.f32.mrf.mxu1  ;;  %3046 = vmatprep.mubr.bf16.mxu1 %v2660_v14  ;;  %v3417_v5 = vmul.f32 1.442695, %v3350_v9  ;;  %v2461_v33 = vmul.f32 0.5, %v2335_v25  ;;  %v8219_v61 = vadd.f32 %v8175_v39, %v7906_v23  ;;  %v8223_v38 = vpop.eup %5106  ;;  %v2096_v62 = vmul.f32 0.7978846, %v1970_v51 }
 0x287   : > { %5120 = vtanh.f32 %v2097_v53  ;;  %v1846_v45 = vmul.f32 0.044715, %v1720_v12  ;;  %v1598_v44 = vmul.f32 %v8206_v1, %v8206_v1  ;;  %v2585_v60 = vmul.f32 %v2459_v20, %v7927_v2 }
 0x288   : > { %v2898_v48 = vpop.f32.mrf.mxu1  ;;  %5122 = vpow2.f32 %v3417_v5  ;;  %v2587_v50 = vmul.f32 %v2461_v33, %v7958_v42  ;;  %v3288_v28 = vand.u32 2147483647, %v8215_v43  ;;  %v1848_v23 = vmul.f32 0.044715, %v1722_v30 }
 0x289   : > { %v1723_v54 = vmul.f32 %v1597_v57, %v8195_v27  ;;  %v3283_v0 = vand.u32 2147483647, %v8219_v61  ;;  %v2338_v51 = vadd.f32 1.0, %v8159_v3  ;;  %v5109_v17 = vpop.eup %5108  ;;  %5124 = vtanh.f32 %v2099_v47 }
 0x28a   : > { %v8221_v11 = vpop.f32.mrf.mxu1  ;;  %v2659_v53 = vpack.c.bf16 %v2587_v50, %v2585_v60  ;;  %v3351_v12 = vsub.f32 0.0, %v3288_v28  ;;  %v2340_v26 = vadd.f32 1.0, %v5105_v49  ;;  %v1724_v2 = vmul.f32 %v1598_v44, %v8206_v1 }
 0x28b   : > { %v8233_v14 = vpop.eup %5110  ;;  %v3346_v42 = vsub.f32 0.0, %v3283_v0  ;;  %v2464_v9 = vmul.f32 0.5, %v2338_v51  ;;  %v8238_v25 = vadd.f32 %v8175_v39, %v8036_v6  ;;  %v2337_v3 = vadd.f32 1.0, %v8145_v19 }
 0x28c   : > { %v2901_v29 = vpop.f32.mrf.mxu1  ;;  %v5113_v48 = vpop.eup %5112  ;;  %3047 = vmatmul.mubr.bf16.gmra.mxu1 %v2659_v53  ;;  %v3419_v30 = vmul.f32 1.442695, %v3351_v12  ;;  %v2466_v57 = vmul.f32 0.5, %v2340_v26  ;;  %v2339_v20 = vadd.f32 1.0, %v8168_v37  ;;  %v1972_v5 = vadd.f32 %v1846_v45, %v8165_v40 }
 0x28d   : > { %v8244_v49 = vpop.eup %5114  ;;  %v1974_v33 = vadd.f32 %v1848_v23, %v8181_v55  ;;  %v1849_v44 = vmul.f32 0.044715, %v1723_v54  ;;  %v3409_v60 = vmul.f32 1.442695, %v3346_v42  ;;  %v2590_v50 = vmul.f32 %v2464_v9, %v7991_v31 }
 0x28e   : > { %v8248_v6 = vpop.eup %5116  ;;  %5126 = vpow2.f32 %v3419_v30  ;;  %v2592_v28 = vmul.f32 %v2466_v57, %v8031_v7  ;;  %v3289_v19 = vand.u32 2147483647, %v8238_v25  ;;  %v1850_v29 = vmul.f32 0.044715, %v1724_v2 }
 0x28f   : > { %v8242_v47 = vpop.f32.mrf.mxu1  ;;  %5128 = vpow2.f32 %v3409_v60  ;;  %v2463_v0 = vmul.f32 0.5, %v2337_v3  ;;  %v2465_v51 = vmul.f32 0.5, %v2339_v20  ;;  %v8255_v23 = vadd.f32 %v8175_v39, %v7929_v34 }
 0x290   : > { %v2662_v53 = vpack.c.bf16 %v2592_v28, %v2590_v50  ;;  %v3352_v45 = vsub.f32 0.0, %v3289_v19  ;;  %v8259_v54 = vadd.f32 %v8175_v39, %v8051_v56  ;;  %v8263_v7 = vpop.eup %5118  ;;  %v2098_v12 = vmul.f32 0.7978846, %v1972_v5 }
 0x291   : > { %v2906_v37 = vpop.f32.mrf.mxu1  ;;  %v2589_v26 = vmul.f32 %v2463_v0, %v7979_v41  ;;  %v2591_v2 = vmul.f32 %v2465_v51, %v8004_v18  ;;  %v8269_v42 = vadd.f32 %v8175_v39, %v7994_v24  ;;  %v2100_v9 = vmul.f32 0.7978846, %v1974_v33 }
 0x292   : > { %v1975_v34 = vadd.f32 %v1849_v44, %v8195_v27  ;;  %3054 = vmatprep.mubr.bf16.mxu1 %v2662_v53  ;;  %v3421_v30 = vmul.f32 1.442695, %v3352_v45  ;;  %v3284_v56 = vand.u32 2147483647, %v8255_v23  ;;  %5130 = vtanh.f32 %v2096_v62 }
 0x293   : > { %v8261_v31 = vpop.f32.mrf.mxu1  ;;  %v2661_v3 = vpack.c.bf16 %v2591_v2, %v2589_v26  ;;  %v1976_v5 = vadd.f32 %v1850_v29, %v8206_v1  ;;  %v3290_v18 = vand.u32 2147483647, %v8259_v54  ;;  %v3285_v24 = vand.u32 2147483647, %v8269_v42 }
 0x294   : > { %v5121_v20 = vpop.eup %5120  ;;  %5132 = vpow2.f32 %v3421_v30  ;;  %v3347_v41 = vsub.f32 0.0, %v3284_v56  ;;  %v2342_v33 = vadd.f32 1.0, %v5109_v17  ;;  %v2101_v44 = vmul.f32 0.7978846, %v1975_v34 }
 0x295   : > { %v2909_v57 = vpop.f32.mrf.mxu1  ;;  %v8275_v60 = vpop.eup %5122  ;;  %5134 = vtanh.f32 %v2098_v12  ;;  %3055 = vmatmul.mubr.bf16.gmra.mxu1 %v2661_v3  ;;  %v3353_v37 = vsub.f32 0.0, %v3290_v18  ;;  %v3348_v29 = vsub.f32 0.0, %v3285_v24  ;;  %v2344_v0 = vadd.f32 1.0, %v5113_v48 }
 0x296   : > { %5136 = vtanh.f32 %v2100_v9  ;;  %v3571_v50 = vadd.f32 1.0, %v8275_v60  ;;  %v3411_v62 = vmul.f32 1.442695, %v3347_v41  ;;  %v5125_v19 = vpop.eup %5124  ;;  %v2468_v51 = vmul.f32 0.5, %v2342_v33 }
 0x297   : > { %v2349_v53 = vadd.f32 1.0, %v5121_v20  ;;  %v2102_v45 = vmul.f32 0.7978846, %v1976_v5  ;;  %v8283_v12 = vadd.f32 %v8175_v39, %v8079_v52  ;;  %v3423_v26 = vmul.f32 1.442695, %v3353_v37 }
 0x298   : > { %5138 = vlog2.f32 %v3571_v50  ;;  %v3413_v2 = vmul.f32 1.442695, %v3348_v29  ;;  %v2470_v9 = vmul.f32 0.5, %v2344_v0  ;;  %v2351_v34 = vadd.f32 1.0, %v5125_v19 }
 0x299   : > { %5140 = vpow2.f32 %v3411_v62  ;;  %v2594_v3 = vmul.f32 %v2468_v51, %v8049_v58  ;;  %v3291_v20 = vand.u32 2147483647, %v8283_v12  ;;  %v2341_v24 = vadd.f32 1.0, %v8223_v38 }
 0x29a   : > { %v8279_v28 = vpop.f32.mrf.mxu1  ;;  %5142 = vtanh.f32 %v2101_v44  ;;  %v2596_v52 = vmul.f32 %v2470_v9, %v8066_v35  ;;  %v8299_v44 = vmul.f32 0.5, %v2349_v53  ;;  %v3574_v35 = vmul.f32 -0.5, %v8275_v60 }
 0x29b   : > { %v8289_v57 = vpop.eup %5126  ;;  %5144 = vpow2.f32 %v3423_v26  ;;  %v3354_v19 = vsub.f32 0.0, %v3291_v20  ;;  %v8304_v37 = vmul.f32 0.5, %v2351_v34  ;;  %v2343_v38 = vadd.f32 1.0, %v8233_v14 }
 0x29c   : > { %v2914_v17 = vpop.f32.mrf.mxu1  ;;  %v8294_v5 = vpop.eup %5128  ;;  %v3580_v41 = vadd.f32 1.0, %v8289_v57  ;;  %5146 = vpow2.f32 %v3413_v2  ;;  %v2664_v58 = vpack.c.bf16 %v2596_v52, %v2594_v3  ;;  %v3583_v51 = vmul.f32 -0.5, %v8289_v57 }
 0x29d   : > { %5148 = vtanh.f32 %v2102_v45  ;;  %v3535_v50 = vadd.f32 1.0, %v8294_v5  ;;  %v3425_v53 = vmul.f32 1.442695, %v3354_v19  ;;  %v2467_v45 = vmul.f32 0.5, %v2341_v24 }
 0x29e   : > { %v8287_v48 = vpop.f32.mrf.mxu1  ;;  %5150 = vlog2.f32 %v3580_v41  ;;  %3062 = vmatprep.mubr.bf16.mxu1 %v2664_v58  ;;  %v8311_v17 = vadd.f32 %v8175_v39, %v8014_v22  ;;  %v3577_v2 = vand.u32 2147483647, %v8275_v60  ;;  %v3586_v9 = vand.u32 2147483647, %v8289_v57  ;;  %v9950_v22 = vld [vmem:[#allocation21_spill] sm:$0xff] }
 0x29f   : > { %9948 = vst [vmem:[#allocation12_spill] sm:$0xff] %v8287_v48  ;;  %5152 = vlog2.f32 %v3535_v50  ;;  %v5131_v0 = vpop.eup %5130  ;;  %v2469_v3 = vmul.f32 0.5, %v2343_v38  ;;  %vm3161_vm15 = vcmp.ne.f32.partialorder %v8188_v59, %v8188_v59  ;;  %v3575_v20 = vadd.f32 1.0, %v3574_v35 }
 0x2a0   : > { %v2917_v33 = vpop.f32.mrf.mxu1  ;;  %5154 = vpow2.f32 %v3425_v53  ;;  %v8324_v24 = vadd.f32 %v8175_v39, %v9950_v22  ;;  %v3538_v50 = vmul.f32 -0.5, %v8294_v5  ;;  %v2593_v19 = vmul.f32 %v2467_v45, %v8040_v10 }
 0x2a1   : > { %v5133_v26 = vpop.eup %5132  ;;  %v2595_v38 = vmul.f32 %v2469_v3, %v8058_v36  ;;  %v3584_v29 = vadd.f32 1.0, %v3583_v51  ;;  %v3541_v62 = vand.u32 2147483647, %v8294_v5  ;;  %v3286_v35 = vand.u32 2147483647, %v8311_v17 }
 0x2a2   : > { %v8318_v14 = vpop.eup %5134  ;;  %v3589_v41 = vadd.f32 1.0, %v5133_v26  ;;  %v3592_v58 = vmul.f32 -0.5, %v5133_v26  ;;  %vm8334_vm0 = vcmp.lt.f32.partialorder %v3577_v2, 0.0004427343  ;;  %vm8338_vm1 = vcmp.lt.f32.partialorder %v3586_v9, 0.0004427343 }
 0x2a3   : > { %v8326_v33 = vpop.eup %5136  ;;  %v2663_v36 = vpack.c.bf16 %v2595_v38, %v2593_v19  ;;  %v3576_v3 = vmul.f32 %v8275_v60, %v3575_v20  ;;  %v3292_v2 = vand.u32 2147483647, %v8324_v24  ;;  %v3539_v30 = vadd.f32 1.0, %v3538_v50 }
 0x2a4   : > { %5156 = vlog2.f32 %v3589_v41  ;;  %v3349_v41 = vsub.f32 0.0, %v3286_v35  ;;  %v3593_v9 = vadd.f32 1.0, %v3592_v58  ;;  %vm3162_vm2 = vcmp.ne.f32.partialorder %v8215_v43, %v8215_v43 }
 0x2a5   : > { %v8316_v52 = vpop.f32.mrf.mxu1  ;;  %v5139_v53 = vpop.eup %5138  ;;  %3063 = vmatmul.mubr.bf16.gmra.mxu1 %v2663_v36  ;;  %v3585_v60 = vmul.f32 %v8289_v57, %v3584_v29  ;;  %vm8359_vm3 = vcmp.lt.f32.partialorder %v3541_v62, 0.0004427343  ;;  %v2346_v50 = vadd.f32 1.0, %v8248_v6  ;;  %v9958_v35 = vmax.f32 %v8188_v59, 0.0 }
 0x2a6   : > { %9949 = vst [vmem:[#allocation16_spill] sm:$0xff] %v8316_v52  ;;  %v8345_v51 = vpop.eup %5140  ;;  %v3595_v52 = vand.u32 2147483647, %v5133_v26  ;;  %vm3157_vm4 = vcmp.ne.f32.partialorder %v8219_v61, %v8219_v61  ;;  %v3415_v6 = vmul.f32 1.442695, %v3349_v41  ;;  %v3355_v36 = vsub.f32 0.0, %v3292_v2 }
 0x2a7   : > { %v2922_v34 = vpop.f32.mrf.mxu1  ;;  %v8349_v56 = vpop.eup %5142  ;;  %v3544_v48 = vadd.f32 1.0, %v8345_v51  ;;  %v3547_v22 = vmul.f32 -0.5, %v8345_v51  ;;  %v3550_v2 = vand.u32 2147483647, %v8345_v51  ;;  %vm3163_vm6 = vcmp.ne.f32.partialorder %v8238_v25, %v8238_v25 }
 0x2a8   : > { %v3573_v34 = vmul.f32 0.6931472, %v5139_v53  ;;  %v8352_v19 = vpop.eup %5144  ;;  %vm8380_vm5 = vcmp.lt.f32.partialorder %v3595_v52, 0.0004427343  ;;  %vm3158_vm8 = vcmp.ne.f32.partialorder %v8255_v23, %v8255_v23  ;;  %vm3164_vm11 = vcmp.ne.f32.partialorder %v8259_v54, %v8259_v54 }
 0x2a9   : > { %v8343_v45 = vpop.f32.mrf.mxu1  ;;  %v8364_v58 = vpop.eup %5146  ;;  %5158 = vlog2.f32 %v3544_v48  ;;  %v3598_v62 = vadd.f32 1.0, %v8352_v19  ;;  %v3594_v48 = vmul.f32 %v5133_v26, %v3593_v9  ;;  %v3601_v9 = vmul.f32 -0.5, %v8352_v19 }
 0x2aa   : > { %9955 = vst [vmem:[#allocation22_spill] sm:$0xff] %v8343_v45  ;;  %v3579_v38 = vsel %vm8334_vm0, %v3576_v3, %v3573_v34  ;;  %v8371_v57 = vpop.eup %5148  ;;  %v3553_v29 = vadd.f32 1.0, %v8364_v58  ;;  %v3556_v18 = vmul.f32 -0.5, %v8364_v58  ;;  %vm8409_vm7 = vcmp.lt.f32.partialorder %v3550_v2, 0.0004427343 }
 0x2ab   : > { %v2925_v10 = vpop.f32.mrf.mxu1  ;;  %v4106_v53 = vadd.f32 %v3579_v38, %v9958_v35  ;;  %v5151_v34 = vpop.eup %5150  ;;  %v3540_v38 = vmul.f32 %v8294_v5, %v3539_v30  ;;  %5160 = vlog2.f32 %v3598_v62  ;;  %v3548_v30 = vadd.f32 1.0, %v3547_v22 }
 0x2ac   : > { %v2348_v10 = vadd.f32 1.0, %v5131_v0  ;;  %v5153_v45 = vpop.eup %5152  ;;  %v3582_v41 = vmul.f32 0.6931472, %v5151_v34  ;;  %5162 = vlog2.f32 %v3553_v29  ;;  %v9961_v62 = vmax.f32 %v8215_v43, 0.0 }
 0x2ad   : > { %v4169_v3 = vsel %vm3161_vm15, %v8188_v59, %v4106_v53  ;;  %v2472_v59 = vmul.f32 0.5, %v2346_v50  ;;  %v3537_v53 = vmul.f32 0.6931472, %v5153_v45  ;;  %5164 = vpow2.f32 %v3415_v6  ;;  %v8397_v34 = vpop.eup %5154 }
 0x2ae   : > { %v8384_v0 = vpop.f32.mrf.mxu1  ;;  %4232 = vst [vmem:[%s8388_s8 + $0x20] sm:$0xff] %v4169_v3  ;;  %v2474_v5 = vmul.f32 0.5, %v2348_v10  ;;  %v3588_v52 = vsel %vm8338_vm1, %v3585_v60, %v3582_v41  ;;  %v3427_v3 = vmul.f32 1.442695, %v3355_v36  ;;  %v3604_v22 = vand.u32 2147483647, %v8352_v19 }
 0x2af   : > { %v4107_v50 = vadd.f32 %v3588_v52, %v9961_v62  ;;  %v3543_v45 = vsel %vm8359_vm3, %v3540_v38, %v3537_v53  ;;  %v9962_v10 = vmax.f32 %v8219_v61, 0.0  ;;  %v3559_v36 = vand.u32 2147483647, %v8364_v58  ;;  %v9965_v52 = vld [vmem:[#allocation20_spill] sm:$0xff] }
 0x2b0   : > { %v2930_v26 = vpop.f32.mrf.mxu1  ;;  %v3607_v20 = vadd.f32 1.0, %v8397_v34  ;;  %v2598_v38 = vmul.f32 %v2472_v59, %v8086_v15  ;;  %5166 = vpow2.f32 %v3427_v3  ;;  %v8423_v2 = vadd.f32 %v8175_v39, %v9965_v52 }
 0x2b1   : > { %v4102_v29 = vadd.f32 %v3543_v45, %v9962_v10  ;;  %v5157_v41 = vpop.eup %5156  ;;  %v4170_v53 = vsel %vm3162_vm2, %v8215_v43, %v4107_v50  ;;  %v2600_v26 = vmul.f32 %v2474_v5, %v8128_v32  ;;  %v3602_v45 = vadd.f32 1.0, %v3601_v9 }
 0x2b2   : > { %v8405_v60 = vpop.f32.mrf.mxu1  ;;  %4233 = vst [vmem:[%s8388_s8 + $0x28] sm:$0xff] %v4170_v53  ;;  %v3591_v59 = vmul.f32 0.6931472, %v5157_v41  ;;  %5168 = vlog2.f32 %v3607_v20  ;;  %v3549_v32 = vmul.f32 %v8345_v51, %v3548_v30  ;;  %vm8434_vm9 = vcmp.lt.f32.partialorder %v3604_v22, 0.0004427343  ;;  %v9971_v22 = vld [vmem:[#allocation14_spill] sm:$0xff] }
 0x2b3   : > { %v4165_v15 = vsel %vm3157_vm4, %v8219_v61, %v4102_v29  ;;  %v3557_v5 = vadd.f32 1.0, %v3556_v18  ;;  %v2666_v3 = vpack.c.bf16 %v2600_v26, %v2598_v38  ;;  %vm8440_vm10 = vcmp.lt.f32.partialorder %v3559_v36, 0.0004427343 }
 0x2b4   : > { %v2933_v62 = vpop.f32.mrf.mxu1  ;;  %4228 = vst [vmem:[%s8388_s8] sm:$0xff] %v4165_v15  ;;  %v3597_v50 = vsel %vm8380_vm5, %v3594_v48, %v3591_v59  ;;  %v3293_v9 = vand.u32 2147483647, %v8423_v2  ;;  %v2345_v10 = vadd.f32 1.0, %v8244_v49  ;;  %v9970_v29 = vmax.f32 %v8238_v25, 0.0 }
 0x2b5   : > { %3070 = vmatprep.mubr.bf16.mxu1 %v2666_v3  ;;  %v2347_v30 = vadd.f32 1.0, %v8263_v7  ;;  %v8451_v18 = vadd.f32 %v8175_v39, %v9971_v22  ;;  %v2350_v48 = vadd.f32 1.0, %v8318_v14  ;;  %v3603_v36 = vmul.f32 %v8352_v19, %v3602_v45 }
 0x2b6   : > { %v4108_v51 = vadd.f32 %v3597_v50, %v9970_v29  ;;  %v5159_v35 = vpop.eup %5158  ;;  %v3356_v49 = vsub.f32 0.0, %v3293_v9  ;;  %v2471_v20 = vmul.f32 0.5, %v2345_v10  ;;  %v2352_v38 = vadd.f32 1.0, %v8326_v33 }
 0x2b7   : > { %v3546_v53 = vmul.f32 0.6931472, %v5159_v35  ;;  %v3610_v14 = vmul.f32 -0.5, %v8397_v34  ;;  %v2473_v26 = vmul.f32 0.5, %v2347_v30  ;;  %v3558_v52 = vmul.f32 %v8364_v58, %v3557_v5 }
 0x2b8   : > { %v4171_v7 = vsel %vm3163_vm6, %v8238_v25, %v4108_v51  ;;  %v3429_v62 = vmul.f32 1.442695, %v3356_v49  ;;  %v2597_v19 = vmul.f32 %v2471_v20, %v8075_v4  ;;  %v3294_v15 = vand.u32 2147483647, %v8451_v18  ;;  %v5161_v59 = vpop.eup %5160 }
 0x2b9   : > { %v8458_v41 = vpop.f32.mrf.mxu1  ;;  %4234 = vst [vmem:[%s8388_s8 + $0x30] sm:$0xff] %v4171_v7  ;;  %v3552_v45 = vsel %vm8409_vm7, %v3549_v32, %v3546_v53  ;;  %v2599_v3 = vmul.f32 %v2473_v26, %v8107_v21  ;;  %v2476_v25 = vmul.f32 0.5, %v2350_v48  ;;  %v2478_v50 = vmul.f32 0.5, %v2352_v38  ;;  %v5163_v9 = vpop.eup %5162 }
 0x2ba   : > { %v9972_v10 = vmax.f32 %v8255_v23, 0.0  ;;  %v3600_v58 = vmul.f32 0.6931472, %v5161_v59  ;;  %5170 = vpow2.f32 %v3429_v62  ;;  %v3357_v5 = vsub.f32 0.0, %v3294_v15  ;;  %v8476_v51 = vpop.eup %5164 }
 0x2bb   : > { %v2938_v33 = vpop.f32.mrf.mxu1  ;;  %v3555_v30 = vmul.f32 0.6931472, %v5163_v9  ;;  %v3611_v22 = vadd.f32 1.0, %v3610_v14  ;;  %v2665_v6 = vpack.c.bf16 %v2599_v3, %v2597_v19  ;;  %v2604_v32 = vmul.f32 %v2478_v50, %v8181_v55 }
 0x2bc   : > { %v4103_v29 = vadd.f32 %v3552_v45, %v9972_v10  ;;  %v3606_v48 = vsel %vm8434_vm9, %v3603_v36, %v3600_v58  ;;  %v3562_v35 = vadd.f32 1.0, %v8476_v51  ;;  %v2602_v49 = vmul.f32 %v2476_v25, %v8165_v40 }
 0x2bd   : > { %v8474_v4 = vpop.f32.mrf.mxu1  ;;  %v9973_v38 = vmax.f32 %v8259_v54, 0.0  ;;  %v3561_v55 = vsel %vm8440_vm10, %v3558_v52, %v3555_v30  ;;  %v3613_v53 = vand.u32 2147483647, %v8397_v34  ;;  %3071 = vmatmul.mubr.bf16.gmra.mxu1 %v2665_v6  ;;  %v8497_v43 = vpop.eup %5166  ;;  %v9974_v40 = vmax.f32 %v8269_v42, 0.0 }
 0x2be   : > { %v4166_v21 = vsel %vm3158_vm8, %v8255_v23, %v4103_v29  ;;  %v8495_v23 = vadd.f32 %v8175_v39, %v8153_v16  ;;  %5172 = vlog2.f32 %v3562_v35  ;;  %v3431_v14 = vmul.f32 1.442695, %v3357_v5 }
 0x2bf   : > { %v2941_v20 = vpop.f32.mrf.mxu1  ;;  %4229 = vst [vmem:[%s8388_s8 + $0x8] sm:$0xff] %v4166_v21  ;;  %v4109_v7 = vadd.f32 %v3606_v48, %v9973_v38  ;;  %v4104_v36 = vadd.f32 %v3561_v55, %v9974_v40  ;;  %v2668_v26 = vpack.c.bf16 %v2604_v32, %v2602_v49  ;;  %v5169_v62 = vpop.eup %5168  ;;  %v2603_v61 = vmul.f32 %v8304_v37, %v8150_v13 }
 0x2c0   : > { %vm3159_vm12 = vcmp.ne.f32.partialorder %v8269_v42, %v8269_v42  ;;  %v3616_v16 = vadd.f32 1.0, %v8497_v43  ;;  %v3609_v15 = vmul.f32 0.6931472, %v5169_v62  ;;  %v3612_v33 = vmul.f32 %v8397_v34, %v3611_v22 }
 0x2c1   : > { %v4172_v52 = vsel %vm3164_vm11, %v8259_v54, %v4109_v7  ;;  %v4167_v19 = vsel %vm3159_vm12, %v8269_v42, %v4104_v36  ;;  %3078 = vmatprep.mubr.bf16.mxu1 %v2668_v26  ;;  %v2601_v13 = vmul.f32 %v8299_v44, %v8119_v8  ;;  %v3102_v54 = vmax.f32 %v8283_v12, 0.0 }
 0x2c2   : > { %4235 = vst [vmem:[%s8388_s8 + $0x38] sm:$0xff] %v4172_v52  ;;  %4230 = vst [vmem:[%s8388_s8 + $0x10] sm:$0xff] %v4167_v19  ;;  %vm3614_vm13 = vcmp.lt.f32.partialorder %v3613_v53, 0.0004427343  ;;  %5174 = vlog2.f32 %v3616_v16  ;;  %v3295_v45 = vand.u32 2147483647, %v8495_v23  ;;  %vm3165_vm14 = vcmp.ne.f32.partialorder %v8283_v12, %v8283_v12 }
 0x2c3   : > { %v8513_v59 = vpop.f32.mrf.mxu1  ;;  %v3615_v37 = vsel %vm3614_vm13, %v3612_v33, %v3609_v15  ;;  %5176 = vpow2.f32 %v3431_v14  ;;  %v3565_v34 = vmul.f32 -0.5, %v8476_v51  ;;  %v2667_v25 = vpack.c.bf16 %v2603_v61, %v2601_v13 }
 0x2c4   : > { %v4110_v3 = vadd.f32 %v3615_v37, %v3102_v54  ;;  %v2354_v50 = vadd.f32 1.0, %v8371_v57  ;;  %v3358_v8 = vsub.f32 0.0, %v3295_v45  ;;  %v8526_v44 = vadd.f32 %v8175_v39, %v8177_v46 }
 0x2c5   : > { %v2946_v42 = vpop.f32.mrf.mxu1  ;;  %v8530_v9 = vadd.f32 %v8175_v39, %v8201_v63  ;;  %3079 = vmatmul.mubr.bf16.gmra.mxu1 %v2667_v25  ;;  %v2353_v57 = vadd.f32 1.0, %v8349_v56  ;;  %v3619_v5 = vmul.f32 -0.5, %v8497_v43  ;;  %v3566_v32 = vadd.f32 1.0, %v3565_v34 }
 0x2c6   : > { %v4173_v29 = vsel %vm3165_vm14, %v8283_v12, %v4110_v3  ;;  %v2480_v58 = vmul.f32 0.5, %v2354_v50  ;;  %v3433_v30 = vmul.f32 1.442695, %v3358_v8  ;;  %v3296_v22 = vand.u32 2147483647, %v8526_v44 }
 0x2c7   : > { %v8532_v10 = vpop.f32.mrf.mxu1  ;;  %4236 = vst [vmem:[%s8388_s8 + $0x40] sm:$0xff] %v4173_v29  ;;  %v8539_v6 = vpop.eup %5170  ;;  %v3568_v63 = vand.u32 2147483647, %v8476_v51  ;;  %v3297_v12 = vand.u32 2147483647, %v8530_v9  ;;  %v8547_v56 = vadd.f32 %v8175_v39, %v8221_v11  ;;  %v8551_v35 = vadd.f32 %v8175_v39, %v8242_v47 }
 0x2c8   : > { %v2606_v21 = vmul.f32 %v2480_v58, %v8206_v1  ;;  %v3625_v48 = vadd.f32 1.0, %v8539_v6  ;;  %5178 = vpow2.f32 %v3433_v30  ;;  %v3359_v20 = vsub.f32 0.0, %v3296_v22 }
 0x2c9   : > { %v2949_v46 = vpop.f32.mrf.mxu1  ;;  %v3360_v38 = vsub.f32 0.0, %v3297_v12  ;;  %v2479_v7 = vmul.f32 0.5, %v2353_v57  ;;  %v3097_v55 = vmax.f32 %v8311_v17, 0.0  ;;  %vm3160_vm15 = vcmp.ne.f32.partialorder %v8311_v17, %v8311_v17  ;;  %v9975_v12 = vld [vmem:[#allocation12_spill] sm:$0xff] }
 0x2ca   : > { %v2670_v49 = vpack.c.bf16 %v2606_v21, %v2606_v21  ;;  %v3620_v1 = vadd.f32 1.0, %v3619_v5  ;;  %5180 = vlog2.f32 %v3625_v48  ;;  %v3103_v40 = vmax.f32 %v8324_v24, 0.0 }
 0x2cb   : > { %v5173_v53 = vpop.eup %5172  ;;  %v3435_v11 = vmul.f32 1.442695, %v3359_v20  ;;  %v3437_v36 = vmul.f32 1.442695, %v3360_v38  ;;  %v2605_v47 = vmul.f32 %v2479_v7, %v8195_v27  ;;  %v3567_v26 = vmul.f32 %v8476_v51, %v3566_v32 }
 0x2cc   : > { %3086 = vmatprep.mubr.bf16.mxu1 %v2670_v49  ;;  %v3564_v14 = vmul.f32 0.6931472, %v5173_v53  ;;  %v3622_v62 = vand.u32 2147483647, %v8497_v43  ;;  %v3298_v61 = vand.u32 2147483647, %v8547_v56  ;;  %v3621_v13 = vmul.f32 %v8497_v43, %v3620_v1 }
 0x2cd   : > { %vm3569_vm0 = vcmp.lt.f32.partialorder %v3568_v63, 0.0004427343  ;;  %5182 = vpow2.f32 %v3435_v11  ;;  %v2669_v16 = vpack.c.bf16 %v2605_v47, %v2605_v47  ;;  %v3299_v19 = vand.u32 2147483647, %v8551_v35 }
 0x2ce   : > { %v3570_v33 = vsel %vm3569_vm0, %v3567_v26, %v3564_v14  ;;  %5184 = vpow2.f32 %v3437_v36  ;;  %v3361_v27 = vsub.f32 0.0, %v3298_v61  ;;  %v8569_v3 = vadd.f32 %v8175_v39, %v8261_v31 }
 0x2cf   : > { %v8561_v52 = vpop.f32.mrf.mxu1  ;;  %v5175_v15 = vpop.eup %5174  ;;  %v4105_v37 = vadd.f32 %v3570_v33, %v3097_v55  ;;  %3087 = vmatmul.mubr.bf16.gmra.mxu1 %v2669_v16  ;;  %v3362_v42 = vsub.f32 0.0, %v3299_v19  ;;  %vm3623_vm1 = vcmp.lt.f32.partialorder %v3622_v62, 0.0004427343  ;;  %v3628_v34 = vmul.f32 -0.5, %v8539_v6  ;;  %v9976_v55 = vld [vmem:[#allocation16_spill] sm:$0xff] }
 0x2d0   : > { %v8565_v51 = vpop.eup %5176  ;;  %v3618_v45 = vmul.f32 0.6931472, %v5175_v15  ;;  %v3439_v43 = vmul.f32 1.442695, %v3361_v27  ;;  %v8581_v31 = vadd.f32 %v8175_v39, %v8279_v28  ;;  %vm3166_vm2 = vcmp.ne.f32.partialorder %v8324_v24, %v8324_v24 }
 0x2d1   : > { %v2954_v54 = vpop.f32.mrf.mxu1  ;;  %v3634_v25 = vadd.f32 1.0, %v8565_v51  ;;  %v4168_v8 = vsel %vm3160_vm15, %v8311_v17, %v4105_v37  ;;  %v3441_v58 = vmul.f32 1.442695, %v3362_v42  ;;  %v3300_v30 = vand.u32 2147483647, %v8569_v3 }
 0x2d2   : > { %v3624_v29 = vsel %vm3623_vm1, %v3621_v13, %v3618_v45  ;;  %4231 = vst [vmem:[%s8388_s8 + $0x18] sm:$0xff] %v4168_v8  ;;  %v3629_v46 = vadd.f32 1.0, %v3628_v34  ;;  %v3631_v28 = vand.u32 2147483647, %v8539_v6  ;;  %v3301_v63 = vand.u32 2147483647, %v8581_v31 }
 0x2d3   : > { %v8573_v50 = vpop.f32.mrf.mxu1  ;;  %v4111_v57 = vadd.f32 %v3624_v29, %v3103_v40  ;;  %5186 = vlog2.f32 %v3634_v25  ;;  %v3363_v32 = vsub.f32 0.0, %v3300_v30  ;;  %v8596_v48 = vadd.f32 %v8175_v39, %v9975_v12  ;;  %v9977_v54 = vld [vmem:[#allocation22_spill] sm:$0xff] }
 0x2d4   : > { %5188 = vpow2.f32 %v3439_v43  ;;  %v3364_v7 = vsub.f32 0.0, %v3301_v63  ;;  %v8603_v1 = vadd.f32 %v8175_v39, %v9976_v55  ;;  %v3630_v40 = vmul.f32 %v8539_v6, %v3629_v46 }
 0x2d5   : > { %v2957_v5 = vpop.f32.mrf.mxu1  ;;  %v4174_v22 = vsel %vm3166_vm2, %v8324_v24, %v4111_v57  ;;  %5190 = vpow2.f32 %v3441_v58  ;;  %v8588_v17 = vpop.eup %5178  ;;  %v3637_v24 = vmul.f32 -0.5, %v8565_v51  ;;  %v3443_v38 = vmul.f32 1.442695, %v3363_v32 }
 0x2d6   : > { %4237 = vst [vmem:[%s8388_s8 + $0x48] sm:$0xff] %v4174_v22  ;;  %v3643_v21 = vadd.f32 1.0, %v8588_v17  ;;  %v3104_v36 = vmax.f32 %v8423_v2, 0.0  ;;  %vm3632_vm3 = vcmp.lt.f32.partialorder %v3631_v28, 0.0004427343  ;;  %vm3167_vm4 = vcmp.ne.f32.partialorder %v8423_v2, %v8423_v2 }
 0x2d7   : > { %v5181_v20 = vpop.eup %5180  ;;  %v3445_v47 = vmul.f32 1.442695, %v3364_v7  ;;  %v3302_v62 = vand.u32 2147483647, %v8596_v48  ;;  %v3638_v19 = vadd.f32 1.0, %v3637_v24  ;;  %v3646_v13 = vmul.f32 -0.5, %v8588_v17 }
 0x2d8   : > { %v8598_v49 = vpop.f32.mrf.mxu1  ;;  %v3627_v53 = vmul.f32 0.6931472, %v5181_v20  ;;  %5192 = vlog2.f32 %v3643_v21  ;;  %v3303_v33 = vand.u32 2147483647, %v8603_v1  ;;  %v8622_v37 = vadd.f32 %v8175_v39, %v9977_v54 }
 0x2d9   : > { %5194 = vpow2.f32 %v3443_v38  ;;  %v3640_v34 = vand.u32 2147483647, %v8565_v51  ;;  %v3105_v25 = vmax.f32 %v8451_v18, 0.0  ;;  %v3365_v43 = vsub.f32 0.0, %v3302_v62 }
 0x2da   : > { %v2962_v11 = vpop.f32.mrf.mxu1  ;;  %v8607_v14 = vpop.eup %5182  ;;  %v3633_v26 = vsel %vm3632_vm3, %v3630_v40, %v3627_v53  ;;  %5196 = vpow2.f32 %v3445_v47  ;;  %vm3168_vm5 = vcmp.ne.f32.partialorder %v8451_v18, %v8451_v18  ;;  %v3106_v29 = vmax.f32 %v8495_v23, 0.0 }
 0x2db   : > { %v8614_v16 = vpop.eup %5184  ;;  %v4112_v6 = vadd.f32 %v3633_v26, %v3104_v36  ;;  %v3652_v15 = vadd.f32 1.0, %v8607_v14  ;;  %v3107_v39 = vmax.f32 %v8526_v44, 0.0  ;;  %v3366_v58 = vsub.f32 0.0, %v3303_v33 }
 0x2dc   : > { %v8612_v61 = vpop.f32.mrf.mxu1  ;;  %v3661_v27 = vadd.f32 1.0, %v8614_v16  ;;  %v3639_v5 = vmul.f32 %v8565_v51, %v3638_v19  ;;  %v3647_v30 = vadd.f32 1.0, %v3646_v13  ;;  %v3304_v22 = vand.u32 2147483647, %v8622_v37  ;;  %v8660_v19 = vld [vmem:[%s9748_s4] ss:$0 sm:$0xff] }
 0x2dd   : > { %v4175_v42 = vsel %vm3167_vm4, %v8423_v2, %v4112_v6  ;;  %5198 = vlog2.f32 %v3652_v15  ;;  %vm3641_vm6 = vcmp.lt.f32.partialorder %v3640_v34, 0.0004427343  ;;  %v3108_v32 = vmax.f32 %v8530_v9, 0.0 }
 0x2de   : > { %v2965_v45 = vpop.f32.mrf.mxu1  ;;  %4238 = vst [vmem:[%s8388_s8 + $0x50] sm:$0xff] %v4175_v42  ;;  %5200 = vlog2.f32 %v3661_v27  ;;  %v3447_v21 = vmul.f32 1.442695, %v3365_v43  ;;  %vm3169_vm7 = vcmp.ne.f32.partialorder %v8495_v23, %v8495_v23  ;;  %v3655_v20 = vmul.f32 -0.5, %v8607_v14 }
 0x2df   : > { %v3449_v24 = vmul.f32 1.442695, %v3366_v58  ;;  %v3649_v55 = vand.u32 2147483647, %v8588_v17  ;;  %v3664_v53 = vmul.f32 -0.5, %v8614_v16  ;;  %v3648_v40 = vmul.f32 %v8588_v17, %v3647_v30 }
 0x2e0   : > { %v5187_v8 = vpop.eup %5186  ;;  %v3109_v11 = vmax.f32 %v8547_v56, 0.0  ;;  %v3367_v36 = vsub.f32 0.0, %v3304_v22  ;;  %v3658_v6 = vand.u32 2147483647, %v8607_v14  ;;  %v8664_v17 = vadd.f32 %v8660_v19, %v8384_v0 }
 0x2e1   : > { %v8632_v57 = vpop.eup %5188  ;;  %v3636_v2 = vmul.f32 0.6931472, %v5187_v8  ;;  %v3656_v13 = vadd.f32 1.0, %v3655_v20  ;;  %vm3650_vm8 = vcmp.lt.f32.partialorder %v3649_v55, 0.0004427343  ;;  %vm3170_vm9 = vcmp.ne.f32.partialorder %v8526_v44, %v8526_v44 }
 0x2e2   : > { %v8636_v46 = vpop.f32.mrf.mxu1  ;;  %v8638_v28 = vpop.eup %5190  ;;  %v3670_v63 = vadd.f32 1.0, %v8632_v57  ;;  %v3451_v27 = vmul.f32 1.442695, %v3367_v36  ;;  %v3665_v54 = vadd.f32 1.0, %v3664_v53  ;;  %v3110_v45 = vmax.f32 %v8551_v35, 0.0 }
 0x2e3   : > { %v3642_v12 = vsel %vm3641_vm6, %v3639_v5, %v3636_v2  ;;  %v3679_v51 = vadd.f32 1.0, %v8638_v28  ;;  %vm3171_vm10 = vcmp.ne.f32.partialorder %v8530_v9, %v8530_v9  ;;  %v3667_v0 = vand.u32 2147483647, %v8614_v16 }
 0x2e4   : > { %v2970_v38 = vpop.f32.mrf.mxu1  ;;  %v4113_v7 = vadd.f32 %v3642_v12, %v3105_v25  ;;  %5202 = vlog2.f32 %v3670_v63  ;;  %v3305_v25 = vand.u32 2147483647, %v8664_v17  ;;  %vm8679_vm11 = vcmp.lt.f32.partialorder %v3658_v6, 0.0004427343 }
 0x2e5   : > { %5204 = vlog2.f32 %v3679_v51  ;;  %v5193_v26 = vpop.eup %5192  ;;  %v3673_v2 = vmul.f32 -0.5, %v8632_v57  ;;  %v3657_v30 = vmul.f32 %v8607_v14, %v3656_v13  ;;  %v3682_v22 = vmul.f32 -0.5, %v8638_v28 }
 0x2e6   : > { %v8650_v47 = vpop.f32.mrf.mxu1  ;;  %v4176_v62 = vsel %vm3168_vm5, %v8451_v18, %v4113_v7  ;;  %5206 = vpow2.f32 %v3447_v21  ;;  %v8666_v15 = vpop.eup %5194  ;;  %v3645_v33 = vmul.f32 0.6931472, %v5193_v26  ;;  %v3368_v21 = vsub.f32 0.0, %v3305_v25 }
 0x2e7   : > { %4239 = vst [vmem:[%s8388_s8 + $0x58] sm:$0xff] %v4176_v62  ;;  %5208 = vpow2.f32 %v3449_v24  ;;  %v3688_v42 = vadd.f32 1.0, %v8666_v15  ;;  %v8677_v43 = vpop.eup %5196  ;;  %v3666_v24 = vmul.f32 %v8614_v16, %v3665_v54  ;;  %v8696_v38 = vadd.f32 %v8660_v19, %v8405_v60 }
 0x2e8   : > { %v2973_v18 = vpop.f32.mrf.mxu1  ;;  %v3651_v34 = vsel %vm3650_vm8, %v3648_v40, %v3645_v33  ;;  %5210 = vpow2.f32 %v3451_v27  ;;  %v3697_v63 = vadd.f32 1.0, %v8677_v43  ;;  %v3676_v7 = vand.u32 2147483647, %v8632_v57 }
 0x2e9   : > { %v4114_v8 = vadd.f32 %v3651_v34, %v3106_v29  ;;  %5212 = vlog2.f32 %v3688_v42  ;;  %v3685_v55 = vand.u32 2147483647, %v8638_v28  ;;  %vm3668_vm12 = vcmp.lt.f32.partialorder %v3667_v0, 0.0004427343 }
 0x2ea   : > { %v5199_v5 = vpop.eup %5198  ;;  %5214 = vlog2.f32 %v3697_v63  ;;  %vm3172_vm13 = vcmp.ne.f32.partialorder %v8547_v56, %v8547_v56  ;;  %v3453_v16 = vmul.f32 1.442695, %v3368_v21  ;;  %vm3173_vm14 = vcmp.ne.f32.partialorder %v8551_v35, %v8551_v35 }
 0x2eb   : > { %v5201_v20 = vpop.eup %5200  ;;  %v4177_v29 = vsel %vm3169_vm7, %v8495_v23, %v4114_v8  ;;  %v3654_v51 = vmul.f32 0.6931472, %v5199_v5  ;;  %v3674_v23 = vadd.f32 1.0, %v3673_v2  ;;  %v3683_v26 = vadd.f32 1.0, %v3682_v22 }
 0x2ec   : > { %v8687_v12 = vpop.f32.mrf.mxu1  ;;  %4240 = vst [vmem:[%s8388_s8 + $0x60] sm:$0xff] %v4177_v29  ;;  %v3663_v14 = vmul.f32 0.6931472, %v5201_v20  ;;  %v3691_v62 = vmul.f32 -0.5, %v8666_v15  ;;  %v3111_v13 = vmax.f32 %v8569_v3, 0.0  ;;  %5216 = vpow2.f32 %v3453_v16 }
 0x2ed   : > { %v3660_v40 = vsel %vm8679_vm11, %v3657_v30, %v3654_v51  ;;  %v3306_v27 = vand.u32 2147483647, %v8696_v38  ;;  %vm8720_vm15 = vcmp.lt.f32.partialorder %v3676_v7, 0.0004427343  ;;  %vm8724_vm0 = vcmp.lt.f32.partialorder %v3685_v55, 0.0004427343 }
 0x2ee   : > { %v2978_v53 = vpop.f32.mrf.mxu1  ;;  %v4115_v60 = vadd.f32 %v3660_v40, %v3107_v39  ;;  %v3669_v36 = vsel %vm3668_vm12, %v3666_v24, %v3663_v14  ;;  %v8737_v58 = vadd.f32 %v8660_v19, %v8458_v41  ;;  %v3684_v30 = vmul.f32 %v8638_v28, %v3683_v26 }
 0x2ef   : > { %v4116_v33 = vadd.f32 %v3669_v36, %v3108_v32  ;;  %v3700_v32 = vmul.f32 -0.5, %v8677_v43  ;;  %v3692_v22 = vadd.f32 1.0, %v3691_v62  ;;  %v3694_v63 = vand.u32 2147483647, %v8666_v15 }
 0x2f0   : > { %v8710_v6 = vpop.f32.mrf.mxu1  ;;  %v4178_v18 = vsel %vm3170_vm9, %v8526_v44, %v4115_v60  ;;  %v3675_v44 = vmul.f32 %v8632_v57, %v3674_v23  ;;  %vm3174_vm1 = vcmp.ne.f32.partialorder %v8569_v3, %v8569_v3  ;;  %v3703_v41 = vand.u32 2147483647, %v8677_v43 }
 0x2f1   : > { %v5203_v39 = vpop.eup %5202  ;;  %4241 = vst [vmem:[%s8388_s8 + $0x68] sm:$0xff] %v4178_v18  ;;  %v4179_v25 = vsel %vm3171_vm10, %v8530_v9, %v4116_v33  ;;  %v3369_v20 = vsub.f32 0.0, %v3306_v27  ;;  %v3701_v51 = vadd.f32 1.0, %v3700_v32  ;;  %v3112_v55 = vmax.f32 %v8581_v31, 0.0 }
 0x2f2   : > { %v2981_v34 = vpop.f32.mrf.mxu1  ;;  %v5205_v0 = vpop.eup %5204  ;;  %v3672_v8 = vmul.f32 0.6931472, %v5203_v39  ;;  %4242 = vst [vmem:[%s8388_s8 + $0x70] sm:$0xff] %v4179_v25  ;;  %v3307_v53 = vand.u32 2147483647, %v8737_v58  ;;  %v3693_v16 = vmul.f32 %v8666_v15, %v3692_v22  ;;  %vm3175_vm2 = vcmp.ne.f32.partialorder %v8581_v31, %v8581_v31 }
 0x2f3   : > { %v8739_v2 = vpop.eup %5206  ;;  %v3681_v5 = vmul.f32 0.6931472, %v5205_v0  ;;  %vm3695_vm3 = vcmp.lt.f32.partialorder %v3694_v63, 0.0004427343  ;;  %v3702_v15 = vmul.f32 %v8677_v43, %v3701_v51  ;;  %vm8784_vm4 = vcmp.lt.f32.partialorder %v3703_v41, 0.0004427343 }
 0x2f4   : > { %v8744_v21 = vpop.eup %5208  ;;  %v3678_v9 = vsel %vm8720_vm15, %v3675_v44, %v3672_v8  ;;  %v3706_v57 = vadd.f32 1.0, %v8739_v2  ;;  %v3709_v18 = vmul.f32 -0.5, %v8739_v2  ;;  %v3712_v34 = vand.u32 2147483647, %v8739_v2 }
 0x2f5   : > { %v4117_v29 = vadd.f32 %v3678_v9, %v3109_v11  ;;  %v3687_v28 = vsel %vm8724_vm0, %v3684_v30, %v3681_v5  ;;  %v3715_v24 = vadd.f32 1.0, %v8744_v21  ;;  %v8757_v14 = vpop.eup %5210  ;;  %v8795_v43 = vadd.f32 %v8660_v19, %v8513_v59 }
 0x2f6   : > { %v4118_v7 = vadd.f32 %v3687_v28, %v3110_v45  ;;  %5218 = vlog2.f32 %v3706_v57  ;;  %v5213_v11 = vpop.eup %5212  ;;  %v8774_v45 = vadd.f32 %v8660_v19, %v8474_v4  ;;  %v3724_v26 = vadd.f32 1.0, %v8757_v14 }
 0x2f7   : > { %v8763_v40 = vpop.f32.mrf.mxu1  ;;  %v4180_v23 = vsel %vm3172_vm13, %v8547_v56, %v4117_v29  ;;  %5220 = vlog2.f32 %v3715_v24  ;;  %v3690_v36 = vmul.f32 0.6931472, %v5213_v11  ;;  %v3455_v56 = vmul.f32 1.442695, %v3369_v20  ;;  %v5215_v27 = vpop.eup %5214 }
 0x2f8   : > { %4243 = vst [vmem:[%s8388_s8 + $0x78] sm:$0xff] %v4180_v23  ;;  %v4181_v60 = vsel %vm3173_vm14, %v8551_v35, %v4118_v7  ;;  %v3113_v4 = vmax.f32 %v8596_v48, 0.0  ;;  %5222 = vlog2.f32 %v3724_v26  ;;  %v3370_v35 = vsub.f32 0.0, %v3307_v53 }
 0x2f9   : > { %v2986_v62 = vpop.f32.mrf.mxu1  ;;  %4244 = vst [vmem:[%s8388_s8 + $0x80] sm:$0xff] %v4181_v60  ;;  %v3696_v39 = vsel %vm3695_vm3, %v3693_v16, %v3690_v36  ;;  %v3699_v32 = vmul.f32 0.6931472, %v5215_v27  ;;  %v3718_v0 = vmul.f32 -0.5, %v8744_v21  ;;  %5224 = vpow2.f32 %v3455_v56  ;;  %v8799_v5 = vpop.eup %5216 }
 0x2fa   : > { %v4119_v42 = vadd.f32 %v3696_v39, %v3111_v13  ;;  %v3457_v25 = vmul.f32 1.442695, %v3370_v35  ;;  %v3308_v8 = vand.u32 2147483647, %v8774_v45  ;;  %v3114_v59 = vmax.f32 %v8603_v1, 0.0 }
 0x2fb   : > { %v8790_v54 = vpop.f32.mrf.mxu1  ;;  %v3705_v30 = vsel %vm8784_vm4, %v3702_v15, %v3699_v32  ;;  %v8810_v22 = vadd.f32 %v8660_v19, %v8532_v10  ;;  %v3710_v9 = vadd.f32 1.0, %v3709_v18  ;;  %v3721_v41 = vand.u32 2147483647, %v8744_v21 }
 0x2fc   : > { %v4182_v13 = vsel %vm3174_vm1, %v8569_v3, %v4119_v42  ;;  %v4120_v63 = vadd.f32 %v3705_v30, %v3112_v55  ;;  %v3733_v57 = vadd.f32 1.0, %v8799_v5  ;;  %v3727_v20 = vmul.f32 -0.5, %v8757_v14 }
 0x2fd   : > { %v2989_v44 = vpop.f32.mrf.mxu1  ;;  %4245 = vst [vmem:[%s8388_s8 + $0x88] sm:$0xff] %v4182_v13  ;;  %5226 = vpow2.f32 %v3457_v25  ;;  %v3371_v3 = vsub.f32 0.0, %v3308_v8  ;;  %v3309_v29 = vand.u32 2147483647, %v8795_v43  ;;  %vm3176_vm5 = vcmp.ne.f32.partialorder %v8596_v48, %v8596_v48 }
 0x2fe   : > { %v4183_v10 = vsel %vm3175_vm2, %v8581_v31, %v4120_v63  ;;  %vm8823_vm6 = vcmp.lt.f32.partialorder %v3712_v34, 0.0004427343  ;;  %v3719_v51 = vadd.f32 1.0, %v3718_v0  ;;  %5228 = vlog2.f32 %v3733_v57 }
 0x2ff   : > { %4246 = vst [vmem:[%s8388_s8 + $0x90] sm:$0xff] %v4183_v10  ;;  %vm3177_vm7 = vcmp.ne.f32.partialorder %v8603_v1, %v8603_v1  ;;  %v3115_v7 = vmax.f32 %v8622_v37, 0.0  ;;  %v3459_v55 = vmul.f32 1.442695, %v3371_v3  ;;  %v3372_v53 = vsub.f32 0.0, %v3309_v29 }
 0x300   : > { %v3310_v31 = vand.u32 2147483647, %v8810_v22  ;;  %v3711_v11 = vmul.f32 %v8739_v2, %v3710_v9  ;;  %vm8835_vm8 = vcmp.lt.f32.partialorder %v3721_v41, 0.0004427343  ;;  %v8841_v16 = vadd.f32 %v8660_v19, %v8561_v52 }
 0x301   : > { %v8845_v60 = vadd.f32 %v8660_v19, %v8573_v50  ;;  %v3728_v56 = vadd.f32 1.0, %v3727_v20  ;;  %5230 = vpow2.f32 %v3459_v55  ;;  %v3461_v62 = vmul.f32 1.442695, %v3372_v53 }
 0x302   : > { %v8827_v24 = vpop.f32.mrf.mxu1  ;;  %v3373_v15 = vsub.f32 0.0, %v3310_v31  ;;  %v3720_v27 = vmul.f32 %v8744_v21, %v3719_v51  ;;  %v3730_v39 = vand.u32 2147483647, %v8757_v14  ;;  %v3311_v18 = vand.u32 2147483647, %v8841_v16 }
 0x303   : > { %v5219_v26 = vpop.eup %5218  ;;  %5232 = vpow2.f32 %v3461_v62  ;;  %v8854_v42 = vadd.f32 %v8660_v19, %v8598_v49  ;;  %v3736_v34 = vmul.f32 -0.5, %v8799_v5  ;;  %v3312_v21 = vand.u32 2147483647, %v8845_v60 }
 0x304   : > { %v2994_v36 = vpop.f32.mrf.mxu1  ;;  %v5221_v33 = vpop.eup %5220  ;;  %v3708_v2 = vmul.f32 0.6931472, %v5219_v26  ;;  %v3463_v50 = vmul.f32 1.442695, %v3373_v15  ;;  %v3374_v0 = vsub.f32 0.0, %v3311_v18  ;;  %v3729_v49 = vmul.f32 %v8757_v14, %v3728_v56 }
 0x305   : > { %v3717_v35 = vmul.f32 0.6931472, %v5221_v33  ;;  %v5223_v8 = vpop.eup %5222  ;;  %v3375_v41 = vsub.f32 0.0, %v3312_v21  ;;  %vm3731_vm9 = vcmp.lt.f32.partialorder %v3730_v39, 0.0004427343  ;;  %v3737_v29 = vadd.f32 1.0, %v3736_v34 }
 0x306   : > { %v8850_v52 = vpop.f32.mrf.mxu1  ;;  %v3714_v32 = vsel %vm8823_vm6, %v3711_v11, %v3708_v2  ;;  %5234 = vpow2.f32 %v3463_v50  ;;  %v3726_v63 = vmul.f32 0.6931472, %v5223_v8  ;;  %v3465_v9 = vmul.f32 1.442695, %v3374_v0  ;;  %v8865_v57 = vpop.eup %5224 }
 0x307   : > { %v4121_v44 = vadd.f32 %v3714_v32, %v3113_v4  ;;  %v3723_v13 = vsel %vm8835_vm8, %v3720_v27, %v3717_v35  ;;  %v3739_v4 = vand.u32 2147483647, %v8799_v5  ;;  %v3313_v3 = vand.u32 2147483647, %v8854_v42 }
 0x308   : > { %v2997_v25 = vpop.f32.mrf.mxu1  ;;  %v4122_v30 = vadd.f32 %v3723_v13, %v3114_v59  ;;  %v3732_v59 = vsel %vm3731_vm9, %v3729_v49, %v3726_v63  ;;  %v3742_v10 = vadd.f32 1.0, %v8865_v57  ;;  %5236 = vpow2.f32 %v3465_v9 }
 0x309   : > { %v4184_v20 = vsel %vm3176_vm5, %v8596_v48, %v4121_v44  ;;  %v4123_v28 = vadd.f32 %v3732_v59, %v3115_v7  ;;  %v3467_v48 = vmul.f32 1.442695, %v3375_v41  ;;  %v8882_v51 = vadd.f32 %v8660_v19, %v8612_v61 }
 0x30a   : > { %4247 = vst [vmem:[%s8388_s8 + $0x98] sm:$0xff] %v4184_v20  ;;  %v4185_v14 = vsel %vm3177_vm7, %v8603_v1, %v4122_v30  ;;  %v8886_v53 = vpop.eup %5226  ;;  %vm3178_vm10 = vcmp.ne.f32.partialorder %v8622_v37, %v8622_v37  ;;  %5238 = vlog2.f32 %v3742_v10  ;;  %v3376_v1 = vsub.f32 0.0, %v3313_v3 }
 0x30b   : > { %4248 = vst [vmem:[%s8388_s8 + $0xa0] sm:$0xff] %v4185_v14  ;;  %v5229_v31 = vpop.eup %5228  ;;  %v4186_v11 = vsel %vm3178_vm10, %v8622_v37, %v4123_v28  ;;  %v3751_v7 = vadd.f32 1.0, %v8886_v53  ;;  %v3116_v36 = vmax.f32 %v8664_v17, 0.0  ;;  %v3738_v26 = vmul.f32 %v8799_v5, %v3737_v29 }
 0x30c   : > { %v8884_v55 = vpop.f32.mrf.mxu1  ;;  %4249 = vst [vmem:[%s8388_s8 + $0xa8] sm:$0xff] %v4186_v11  ;;  %v3735_v61 = vmul.f32 0.6931472, %v5229_v31  ;;  %5240 = vpow2.f32 %v3467_v48  ;;  %vm3740_vm11 = vcmp.lt.f32.partialorder %v3739_v4, 0.0004427343  ;;  %vm3179_vm12 = vcmp.ne.f32.partialorder %v8664_v17, %v8664_v17 }
 0x30d   : > { %5242 = vlog2.f32 %v3751_v7  ;;  %v3469_v56 = vmul.f32 1.442695, %v3376_v1  ;;  %v3314_v62 = vand.u32 2147483647, %v8882_v51  ;;  %v3745_v27 = vmul.f32 -0.5, %v8865_v57 }
 0x30e   : > { %v3002_v23 = vpop.f32.mrf.mxu1  ;;  %v8898_v33 = vpop.eup %5230  ;;  %v3741_v37 = vsel %vm3740_vm11, %v3738_v26, %v3735_v61  ;;  %v3117_v35 = vmax.f32 %v8696_v38, 0.0  ;;  %v3754_v50 = vmul.f32 -0.5, %v8886_v53  ;;  %v8910_v32 = vadd.f32 %v8660_v19, %v8636_v46 }
 0x30f   : > { %v4124_v2 = vadd.f32 %v3741_v37, %v3116_v36  ;;  %v3760_v5 = vadd.f32 1.0, %v8898_v33  ;;  %5244 = vpow2.f32 %v3469_v56  ;;  %v3377_v21 = vsub.f32 0.0, %v3314_v62 }
 0x310   : > { %v8896_v15 = vpop.f32.mrf.mxu1  ;;  %v8904_v18 = vpop.eup %5232  ;;  %v3748_v8 = vand.u32 2147483647, %v8865_v57  ;;  %v3118_v44 = vmax.f32 %v8737_v58, 0.0  ;;  %v3119_v13 = vmax.f32 %v8774_v45, 0.0  ;;  %v8922_v49 = vadd.f32 %v8660_v19, %v8650_v47 }
 0x311   : > { %v4187_v34 = vsel %vm3179_vm12, %v8664_v17, %v4124_v2  ;;  %5246 = vlog2.f32 %v3760_v5  ;;  %v3769_v0 = vadd.f32 1.0, %v8904_v18  ;;  %v3746_v46 = vadd.f32 1.0, %v3745_v27 }
 0x312   : > { %v3005_v39 = vpop.f32.mrf.mxu1  ;;  %4250 = vst [vmem:[%s8388_s8 + $0xb0] sm:$0xff] %v4187_v34  ;;  %v3757_v17 = vand.u32 2147483647, %v8886_v53  ;;  %vm3180_vm13 = vcmp.ne.f32.partialorder %v8696_v38, %v8696_v38  ;;  %v3755_v9 = vadd.f32 1.0, %v3754_v50  ;;  %v3763_v41 = vmul.f32 -0.5, %v8898_v33 }
 0x313   : > { %v8914_v25 = vpop.eup %5234  ;;  %5248 = vlog2.f32 %v3769_v0  ;;  %v3120_v20 = vmax.f32 %v8795_v43, 0.0  ;;  %v3121_v4 = vmax.f32 %v8810_v22, 0.0  ;;  %v3766_v47 = vand.u32 2147483647, %v8898_v33 }
 0x314   : > { %v3778_v30 = vadd.f32 1.0, %v8914_v25  ;;  %v3471_v3 = vmul.f32 1.442695, %v3377_v21  ;;  %v3315_v14 = vand.u32 2147483647, %v8910_v32  ;;  %v3122_v28 = vmax.f32 %v8841_v16, 0.0 }
 0x315   : > { %v8935_v29 = vpop.eup %5236  ;;  %vm8937_vm14 = vcmp.lt.f32.partialorder %v3748_v8, 0.0004427343  ;;  %v3123_v48 = vmax.f32 %v8845_v60, 0.0  ;;  %v3316_v1 = vand.u32 2147483647, %v8922_v49  ;;  %v3747_v11 = vmul.f32 %v8865_v57, %v3746_v46 }
 0x316   : > { %v8926_v63 = vpop.f32.mrf.mxu1  ;;  %5250 = vlog2.f32 %v3778_v30  ;;  %vm3181_vm15 = vcmp.ne.f32.partialorder %v8737_v58, %v8737_v58  ;;  %vm8947_vm0 = vcmp.lt.f32.partialorder %v3757_v17, 0.0004427343  ;;  %v3772_v23 = vmul.f32 -0.5, %v8904_v18 }
 0x317   : > { %v5239_v31 = vpop.eup %5238  ;;  %v3787_v36 = vadd.f32 1.0, %v8935_v29  ;;  %5252 = vpow2.f32 %v3471_v3  ;;  %v3378_v56 = vsub.f32 0.0, %v3315_v14  ;;  %v3379_v62 = vsub.f32 0.0, %v3316_v1 }
 0x318   : > { %v3010_v59 = vpop.f32.mrf.mxu1  ;;  %v3744_v26 = vmul.f32 0.6931472, %v5239_v31  ;;  %v3756_v57 = vmul.f32 %v8886_v53, %v3755_v9  ;;  %v3764_v2 = vadd.f32 1.0, %v3763_v41  ;;  %vm8958_vm1 = vcmp.lt.f32.partialorder %v3766_v47, 0.0004427343 }
 0x319   : > { %v8955_v37 = vpop.eup %5240  ;;  %5254 = vlog2.f32 %v3787_v36  ;;  %v3775_v34 = vand.u32 2147483647, %v8904_v18  ;;  %v3781_v0 = vmul.f32 -0.5, %v8914_v25  ;;  %vm3182_vm2 = vcmp.ne.f32.partialorder %v8774_v45, %v8774_v45 }
 0x31a   : > { %v8953_v61 = vpop.f32.mrf.mxu1  ;;  %v5243_v39 = vpop.eup %5242  ;;  %v3750_v50 = vsel %vm8937_vm14, %v3747_v11, %v3744_v26  ;;  %v3796_v21 = vadd.f32 1.0, %v8955_v37  ;;  %v3773_v46 = vadd.f32 1.0, %v3772_v23  ;;  %v3473_v17 = vmul.f32 1.442695, %v3378_v56 }
 0x31b   : > { %v4125_v8 = vadd.f32 %v3750_v50, %v3117_v35  ;;  %v3753_v53 = vmul.f32 0.6931472, %v5243_v39  ;;  %v3784_v30 = vand.u32 2147483647, %v8914_v25  ;;  %v3475_v9 = vmul.f32 1.442695, %v3379_v62 }
 0x31c   : > { %v3013_v5 = vpop.f32.mrf.mxu1  ;;  %5256 = vlog2.f32 %v3796_v21  ;;  %v8972_v41 = vadd.f32 %v8660_v19, %v8687_v12  ;;  %v8974_v47 = vpop.eup %5244  ;;  %v3765_v14 = vmul.f32 %v8898_v33, %v3764_v2  ;;  %vm3183_vm3 = vcmp.ne.f32.partialorder %v8795_v43, %v8795_v43 }
 0x31d   : > { %v4188_v35 = vsel %vm3180_vm13, %v8696_v38, %v4125_v8  ;;  %v3759_v3 = vsel %vm8947_vm0, %v3756_v57, %v3753_v53  ;;  %5258 = vpow2.f32 %v3473_v17  ;;  %vm8986_vm4 = vcmp.lt.f32.partialorder %v3775_v34, 0.0004427343 }
 0x31e   : > { %v5247_v59 = vpop.eup %5246  ;;  %4251 = vst [vmem:[%s8388_s8 + $0xb8] sm:$0xff] %v4188_v35  ;;  %v4126_v12 = vadd.f32 %v3759_v3, %v3118_v44  ;;  %v3782_v1 = vadd.f32 1.0, %v3781_v0  ;;  %v3805_v38 = vadd.f32 1.0, %v8974_v47  ;;  %v3774_v11 = vmul.f32 %v8904_v18, %v3773_v46 }
 0x31f   : > { %v3762_v31 = vmul.f32 0.6931472, %v5247_v59  ;;  %vm3184_vm5 = vcmp.ne.f32.partialorder %v8810_v22, %v8810_v22  ;;  %v3790_v33 = vmul.f32 -0.5, %v8935_v29  ;;  %5260 = vpow2.f32 %v3475_v9 }
 0x320   : > { %v5249_v23 = vpop.eup %5248  ;;  %v4189_v44 = vsel %vm3181_vm15, %v8737_v58, %v4126_v12  ;;  %vm9001_vm6 = vcmp.lt.f32.partialorder %v3784_v30, 0.0004427343  ;;  %5262 = vlog2.f32 %v3805_v38  ;;  %v3317_v18 = vand.u32 2147483647, %v8972_v41 }
 0x321   : > { %v8995_v7 = vpop.f32.mrf.mxu1  ;;  %4252 = vst [vmem:[%s8388_s8 + $0xc0] sm:$0xff] %v4189_v44  ;;  %v3768_v26 = vsel %vm8958_vm1, %v3765_v14, %v3762_v31  ;;  %v3771_v56 = vmul.f32 0.6931472, %v5249_v23  ;;  %v3799_v62 = vmul.f32 -0.5, %v8955_v37  ;;  %v9012_v57 = vadd.f32 %v8660_v19, %v8710_v6 }
 0x322   : > { %v4127_v5 = vadd.f32 %v3768_v26, %v3119_v13  ;;  %v3783_v39 = vmul.f32 %v8914_v25, %v3782_v1  ;;  %v3380_v50 = vsub.f32 0.0, %v3317_v18  ;;  %v9019_v27 = vadd.f32 %v8660_v19, %v8763_v40 }
 0x323   : > { %v3018_v2 = vpop.f32.mrf.mxu1  ;;  %v5251_v58 = vpop.eup %5250  ;;  %v3777_v34 = vsel %vm8986_vm4, %v3774_v11, %v3771_v56  ;;  %vm3185_vm7 = vcmp.ne.f32.partialorder %v8841_v16, %v8841_v16  ;;  %v3791_v6 = vadd.f32 1.0, %v3790_v33  ;;  %v3793_v21 = vand.u32 2147483647, %v8935_v29 }
 0x324   : > { %v3780_v0 = vmul.f32 0.6931472, %v5251_v58  ;;  %v4190_v25 = vsel %vm3182_vm2, %v8774_v45, %v4127_v5  ;;  %v4128_v40 = vadd.f32 %v3777_v34, %v3120_v20  ;;  %v3477_v13 = vmul.f32 1.442695, %v3380_v50  ;;  %v9035_v46 = vpop.eup %5252 }
 0x325   : > { %v9026_v8 = vpop.f32.mrf.mxu1  ;;  %v3318_v53 = vand.u32 2147483647, %v9012_v57  ;;  %4253 = vst [vmem:[%s8388_s8 + $0xc8] sm:$0xff] %v4190_v25  ;;  %v3800_v30 = vadd.f32 1.0, %v3799_v62  ;;  %v3802_v9 = vand.u32 2147483647, %v8955_v37  ;;  %v3792_v1 = vmul.f32 %v8935_v29, %v3791_v6 }
 0x326   : > { %v3786_v17 = vsel %vm9001_vm6, %v3783_v39, %v3780_v0  ;;  %v3319_v35 = vand.u32 2147483647, %v9019_v27  ;;  %v5255_v45 = vpop.eup %5254  ;;  %v4191_v20 = vsel %vm3183_vm3, %v8795_v43, %v4128_v40  ;;  %v3808_v59 = vmul.f32 -0.5, %v8974_v47 }
 0x327   : > { %v3021_v3 = vpop.f32.mrf.mxu1  ;;  %v4129_v14 = vadd.f32 %v3786_v17, %v3121_v4  ;;  %v3814_v12 = vadd.f32 1.0, %v9035_v46  ;;  %4254 = vst [vmem:[%s8388_s8 + $0xd0] sm:$0xff] %v4191_v20  ;;  %v3789_v10 = vmul.f32 0.6931472, %v5255_v45  ;;  %5264 = vpow2.f32 %v3477_v13 }
 0x328   : > { %v3381_v38 = vsub.f32 0.0, %v3318_v53  ;;  %vm3794_vm8 = vcmp.lt.f32.partialorder %v3793_v21, 0.0004427343  ;;  %v3382_v43 = vsub.f32 0.0, %v3319_v35  ;;  %v3801_v33 = vmul.f32 %v8955_v37, %v3800_v30 }
 0x329   : > { %v4192_v31 = vsel %vm3184_vm5, %v8810_v22, %v4129_v14  ;;  %5266 = vlog2.f32 %v3814_v12  ;;  %v5257_v11 = vpop.eup %5256  ;;  %v3795_v4 = vsel %vm3794_vm8, %v3792_v1, %v3789_v10  ;;  %vm9058_vm9 = vcmp.lt.f32.partialorder %v3802_v9, 0.0004427343 }
 0x32a   : > { %4255 = vst [vmem:[%s8388_s8 + $0xd8] sm:$0xff] %v4192_v31  ;;  %v3479_v29 = vmul.f32 1.442695, %v3381_v38  ;;  %v9062_v44 = vpop.f32.mrf.mxu1  ;;  %v9064_v36 = vpop.eup %5258  ;;  %v4130_v22 = vadd.f32 %v3795_v4, %v3122_v28  ;;  %v3798_v18 = vmul.f32 0.6931472, %v5257_v11  ;;  %v3809_v26 = vadd.f32 1.0, %v3808_v59 }
 0x32b   : > { %v3481_v56 = vmul.f32 1.442695, %v3382_v43  ;;  %v3811_v62 = vand.u32 2147483647, %v8974_v47  ;;  %v3823_v37 = vadd.f32 1.0, %v9064_v36  ;;  %v9072_v2 = vadd.f32 %v8660_v19, %v8790_v54 }
 0x32c   : > { %5268 = vpow2.f32 %v3479_v29  ;;  %v3026_v58 = vpop.f32.mrf.mxu1  ;;  %v9074_v5 = vpop.eup %5260  ;;  %v4193_v28 = vsel %vm3185_vm7, %v8841_v16, %v4130_v22  ;;  %v3804_v39 = vsel %vm9058_vm9, %v3801_v33, %v3798_v18  ;;  %v3817_v50 = vmul.f32 -0.5, %v9035_v46 }
 0x32d   : > { %5270 = vpow2.f32 %v3481_v56  ;;  %v5263_v34 = vpop.eup %5262  ;;  %4256 = vst [vmem:[%s8388_s8 + $0xe0] sm:$0xff] %v4193_v28  ;;  %v4131_v54 = vadd.f32 %v3804_v39, %v3123_v48  ;;  %vm3186_vm10 = vcmp.ne.f32.partialorder %v8845_v60, %v8845_v60  ;;  %v3810_v16 = vmul.f32 %v8974_v47, %v3809_v26 }
 0x32e   : > { %5272 = vlog2.f32 %v3823_v37  ;;  %v9086_v0 = vpop.f32.mrf.mxu1  ;;  %v3807_v6 = vmul.f32 0.6931472, %v5263_v34  ;;  %v3832_v21 = vadd.f32 1.0, %v9074_v5  ;;  %v3124_v40 = vmax.f32 %v8854_v42, 0.0 }
 0x32f   : > { %v4194_v25 = vsel %vm3186_vm10, %v8845_v60, %v4131_v54  ;;  %vm3812_vm11 = vcmp.lt.f32.partialorder %v3811_v62, 0.0004427343  ;;  %v3320_v13 = vand.u32 2147483647, %v9072_v2  ;;  %v3818_v17 = vadd.f32 1.0, %v3817_v50 }
 0x330   : > { %v3029_v53 = vpop.f32.mrf.mxu1  ;;  %4257 = vst [vmem:[%s8388_s8 + $0xe8] sm:$0xff] %v4194_v25  ;;  %v3813_v48 = vsel %vm3812_vm11, %v3810_v16, %v3807_v6  ;;  %v3826_v30 = vmul.f32 -0.5, %v9064_v36  ;;  %5274 = vlog2.f32 %v3832_v21  ;;  %v9099_v47 = vadd.f32 %v8660_v19, %v8827_v24 }
 0x331   : > { %v4132_v9 = vadd.f32 %v3813_v48, %v3124_v40  ;;  %v3383_v35 = vsub.f32 0.0, %v3320_v13  ;;  %v9103_v60 = vadd.f32 %v8660_v19, %v8850_v52  ;;  %vm3187_vm12 = vcmp.ne.f32.partialorder %v8854_v42, %v8854_v42 }
 0x332   : > { %v3125_v45 = vmax.f32 %v8882_v51, 0.0  ;;  %v3820_v20 = vand.u32 2147483647, %v9035_v46  ;;  %vm3188_vm13 = vcmp.ne.f32.partialorder %v8882_v51, %v8882_v51  ;;  %v3819_v24 = vmul.f32 %v9035_v46, %v3818_v17 }
 0x333   : > { %v4195_v3 = vsel %vm3187_vm12, %v8854_v42, %v4132_v9  ;;  %v3483_v14 = vmul.f32 1.442695, %v3383_v35  ;;  %v3321_v52 = vand.u32 2147483647, %v9099_v47  ;;  %v3322_v10 = vand.u32 2147483647, %v9103_v60 }
 0x334   : > { %v9110_v59 = vpop.f32.mrf.mxu1  ;;  %v9112_v12 = vpop.eup %5264  ;;  %4258 = vst [vmem:[%s8388_s8 + $0xf0] sm:$0xff] %v4195_v3  ;;  %v3827_v1 = vadd.f32 1.0, %v3826_v30  ;;  %v9123_v31 = vadd.f32 %v8660_v19, %v8884_v55  ;;  %v3835_v4 = vmul.f32 -0.5, %v9074_v5  ;;  %vm3821_vm14 = vcmp.lt.f32.partialorder %v3820_v20, 0.0004427343 }
 0x335   : > { %v3841_v38 = vadd.f32 1.0, %v9112_v12  ;;  %5276 = vpow2.f32 %v3483_v14  ;;  %v3384_v33 = vsub.f32 0.0, %v3321_v52  ;;  %v3385_v23 = vsub.f32 0.0, %v3322_v10 }
 0x336   : > { %v5267_v42 = vpop.eup %5266  ;;  %v3034_v43 = vpop.f32.mrf.mxu1  ;;  %v3126_v46 = vmax.f32 %v8910_v32, 0.0  ;;  %vm3189_vm15 = vcmp.ne.f32.partialorder %v8910_v32, %v8910_v32  ;;  %v3829_v55 = vand.u32 2147483647, %v9064_v36  ;;  %v3127_v26 = vmax.f32 %v8922_v49, 0.0 }
 0x337   : > { %v3816_v11 = vmul.f32 0.6931472, %v5267_v42  ;;  %5278 = vlog2.f32 %v3841_v38  ;;  %v3838_v56 = vand.u32 2147483647, %v9074_v5  ;;  %v3485_v28 = vmul.f32 1.442695, %v3384_v33 }
 0x338   : > { %v9129_v29 = vpop.f32.mrf.mxu1  ;;  %v3323_v39 = vand.u32 2147483647, %v9123_v31  ;;  %v3828_v54 = vmul.f32 %v9064_v36, %v3827_v1  ;;  %v3836_v6 = vadd.f32 1.0, %v3835_v4  ;;  %v3487_v21 = vmul.f32 1.442695, %v3385_v23 }
 0x339   : > { %v9131_v22 = vpop.eup %5268  ;;  %v3822_v18 = vsel %vm3821_vm14, %v3819_v24, %v3816_v11  ;;  %v9148_v13 = vadd.f32 %v8660_v19, %v8896_v15  ;;  %vm3830_vm0 = vcmp.lt.f32.partialorder %v3829_v55, 0.0004427343  ;;  %vm9151_vm1 = vcmp.lt.f32.partialorder %v3838_v56, 0.0004427343 }
 0x33a   : > { %v9136_v62 = vpop.eup %5270  ;;  %v4133_v37 = vadd.f32 %v3822_v18, %v3125_v45  ;;  %v3850_v58 = vadd.f32 1.0, %v9131_v22  ;;  %v3037_v50 = vpop.f32.mrf.mxu1  ;;  %v3844_v36 = vmul.f32 -0.5, %v9112_v12  ;;  %v3386_v30 = vsub.f32 0.0, %v3323_v39 }
 0x33b   : > { %v5273_v34 = vpop.eup %5272  ;;  %v3859_v16 = vadd.f32 1.0, %v9136_v62  ;;  %v3837_v3 = vmul.f32 %v9074_v5, %v3836_v6  ;;  %vm3190_vm2 = vcmp.ne.f32.partialorder %v8922_v49, %v8922_v49  ;;  %v3847_v45 = vand.u32 2147483647, %v9112_v12 }
 0x33c   : > { %v4196_v25 = vsel %vm3188_vm13, %v8882_v51, %v4133_v37  ;;  %v3825_v40 = vmul.f32 0.6931472, %v5273_v34  ;;  %5280 = vlog2.f32 %v3850_v58  ;;  %v9158_v51 = vadd.f32 %v8660_v19, %v8926_v63 }
 0x33d   : > { %4259 = vst [vmem:[%s8388_s8 + $0xf8] sm:$0xff] %v4196_v25  ;;  %5282 = vlog2.f32 %v3859_v16  ;;  %v5275_v48 = vpop.eup %5274  ;;  %v3489_v20 = vmul.f32 1.442695, %v3386_v30  ;;  %v3324_v14 = vand.u32 2147483647, %v9148_v13  ;;  %v3845_v10 = vadd.f32 1.0, %v3844_v36 }
 0x33e   : > { %v3831_v17 = vsel %vm3830_vm0, %v3828_v54, %v3825_v40  ;;  %5284 = vpow2.f32 %v3485_v28  ;;  %v9160_v15 = vpop.f32.mrf.mxu1  ;;  %v3834_v35 = vmul.f32 0.6931472, %v5275_v48  ;;  %v3853_v5 = vmul.f32 -0.5, %v9131_v22  ;;  %v9223_v30 = vld [vmem:[%s9748_s4] ss:$0 sm:$0xff] }
 0x33f   : > { %v4134_v9 = vadd.f32 %v3831_v17, %v3126_v46  ;;  %5286 = vpow2.f32 %v3487_v21  ;;  %v3387_v1 = vsub.f32 0.0, %v3324_v14  ;;  %v3325_v38 = vand.u32 2147483647, %v9158_v51 }
 0x340   : > { %v3042_v24 = vpop.f32.mrf.mxu1  ;;  %v3840_v52 = vsel %vm9151_vm1, %v3837_v3, %v3834_v35  ;;  %5288 = vpow2.f32 %v3489_v20  ;;  %v3128_v4 = vmax.f32 %v8972_v41, 0.0  ;;  %vm3191_vm3 = vcmp.ne.f32.partialorder %v8972_v41, %v8972_v41 }
 0x341   : > { %v4197_v63 = vsel %vm3189_vm15, %v8910_v32, %v4134_v9  ;;  %v4135_v42 = vadd.f32 %v3840_v52, %v3127_v26  ;;  %v3862_v32 = vmul.f32 -0.5, %v9136_v62  ;;  %v9186_v33 = vadd.f32 %v8660_v19, %v8953_v61 }
 0x342   : > { %4260 = vst [vmem:[%s8388_s8 + $0x100] sm:$0xff] %v4197_v63  ;;  %v9176_v43 = vpop.f32.mrf.mxu1  ;;  %v9178_v11 = vpop.eup %5276  ;;  %vm9192_vm4 = vcmp.lt.f32.partialorder %v3847_v45, 0.0004427343  ;;  %v3129_v18 = vmax.f32 %v9012_v57, 0.0  ;;  %v3846_v37 = vmul.f32 %v9112_v12, %v3845_v10  ;;  %v3856_v61 = vand.u32 2147483647, %v9131_v22 }
 0x343   : > { %v4198_v23 = vsel %vm3190_vm2, %v8922_v49, %v4135_v42  ;;  %v3868_v55 = vadd.f32 1.0, %v9178_v11  ;;  %v3491_v58 = vmul.f32 1.442695, %v3387_v1  ;;  %v3388_v28 = vsub.f32 0.0, %v3325_v38 }
 0x344   : > { %v3045_v26 = vpop.f32.mrf.mxu1  ;;  %v5279_v56 = vpop.eup %5278  ;;  %4261 = vst [vmem:[%s8388_s8 + $0x108] sm:$0xff] %v4198_v23  ;;  %vm3192_vm5 = vcmp.ne.f32.partialorder %v9012_v57, %v9012_v57  ;;  %v3854_v49 = vadd.f32 1.0, %v3853_v5  ;;  %v9205_v50 = vadd.f32 %v8660_v19, %v8995_v7  ;;  %v3863_v34 = vadd.f32 1.0, %v3862_v32 }
 0x345   : > { %v3843_v39 = vmul.f32 0.6931472, %v5279_v56  ;;  %5290 = vlog2.f32 %v3868_v55  ;;  %v3493_v54 = vmul.f32 1.442695, %v3388_v28  ;;  %v3326_v6 = vand.u32 2147483647, %v9186_v33 }
 0x346   : > { %5292 = vpow2.f32 %v3491_v58  ;;  %v3130_v16 = vmax.f32 %v9019_v27, 0.0  ;;  %vm3193_vm6 = vcmp.ne.f32.partialorder %v9019_v27, %v9019_v27  ;;  %v3865_v21 = vand.u32 2147483647, %v9136_v62 }
 0x347   : > { %v3849_v12 = vsel %vm9192_vm4, %v3846_v37, %v3843_v39  ;;  %vm9214_vm7 = vcmp.lt.f32.partialorder %v3856_v61, 0.0004427343  ;;  %5294 = vpow2.f32 %v3493_v54  ;;  %v3389_v7 = vsub.f32 0.0, %v3326_v6 }
 0x348   : > { %v4136_v40 = vadd.f32 %v3849_v12, %v3128_v4  ;;  %v3855_v48 = vmul.f32 %v9131_v22, %v3854_v49  ;;  %v3327_v17 = vand.u32 2147483647, %v9205_v50  ;;  %v9227_v9 = vadd.f32 %v9223_v30, %v9026_v8 }
 0x349   : > { %v5281_v25 = vpop.eup %5280  ;;  %v3864_v22 = vmul.f32 %v9136_v62, %v3863_v34  ;;  %v3871_v20 = vmul.f32 -0.5, %v9178_v11  ;;  %vm3866_vm8 = vcmp.lt.f32.partialorder %v3865_v21, 0.0004427343  ;;  %v9245_v63 = vadd.f32 %v9223_v30, %v9062_v44 }
 0x34a   : > { %v5283_v53 = vpop.eup %5282  ;;  %v3852_v36 = vmul.f32 0.6931472, %v5281_v25  ;;  %v4199_v3 = vsel %vm3191_vm3, %v8972_v41, %v4136_v40  ;;  %v3495_v5 = vmul.f32 1.442695, %v3389_v7  ;;  %v3390_v1 = vsub.f32 0.0, %v3327_v17 }
 0x34b   : > { %v9229_v35 = vpop.eup %5284  ;;  %v3861_v45 = vmul.f32 0.6931472, %v5283_v53  ;;  %4262 = vst [vmem:[%s8388_s8 + $0x110] sm:$0xff] %v4199_v3  ;;  %v3328_v38 = vand.u32 2147483647, %v9227_v9  ;;  %v3872_v23 = vadd.f32 1.0, %v3871_v20  ;;  %vm3194_vm9 = vcmp.ne.f32.partialorder %v9072_v2, %v9072_v2 }
 0x34c   : > { %v9237_v14 = vpop.eup %5286  ;;  %v3858_v24 = vsel %vm9214_vm7, %v3855_v48, %v3852_v36  ;;  %v3877_v8 = vadd.f32 1.0, %v9229_v35  ;;  %v9247_v41 = vpop.f32.mrf.mxu1  ;;  %v3874_v46 = vand.u32 2147483647, %v9178_v11  ;;  %v3131_v56 = vmax.f32 %v9072_v2, 0.0 }
 0x34d   : > { %v4137_v52 = vadd.f32 %v3858_v24, %v3129_v18  ;;  %v3867_v62 = vsel %vm3866_vm8, %v3864_v22, %v3861_v45  ;;  %v3886_v10 = vadd.f32 1.0, %v9237_v14  ;;  %v9251_v32 = vpop.eup %5288  ;;  %v3391_v37 = vsub.f32 0.0, %v3328_v38 }
 0x34e   : > { %v4138_v42 = vadd.f32 %v3867_v62, %v3130_v16  ;;  %5296 = vlog2.f32 %v3877_v8  ;;  %v3050_v4 = vpop.f32.mrf.mxu1  ;;  %v3895_v55 = vadd.f32 1.0, %v9251_v32  ;;  %v3873_v28 = vmul.f32 %v9178_v11, %v3872_v23 }
 0x34f   : > { %v4200_v44 = vsel %vm3192_vm5, %v9012_v57, %v4137_v52  ;;  %5298 = vlog2.f32 %v3886_v10  ;;  %v3497_v57 = vmul.f32 1.442695, %v3390_v1  ;;  %vm9271_vm10 = vcmp.lt.f32.partialorder %v3874_v46, 0.0004427343 }
 0x350   : > { %4263 = vst [vmem:[%s8388_s8 + $0x118] sm:$0xff] %v4200_v44  ;;  %v4201_v18 = vsel %vm3193_vm6, %v9019_v27, %v4138_v42  ;;  %v9264_v26 = vpop.f32.mrf.mxu1  ;;  %5300 = vpow2.f32 %v3495_v5  ;;  %v3329_v39 = vand.u32 2147483647, %v9245_v63  ;;  %v3880_v54 = vmul.f32 -0.5, %v9229_v35 }
 0x351   : > { %4264 = vst [vmem:[%s8388_s8 + $0x120] sm:$0xff] %v4201_v18  ;;  %5302 = vlog2.f32 %v3895_v55  ;;  %v3499_v6 = vmul.f32 1.442695, %v3391_v37  ;;  %v3889_v12 = vmul.f32 -0.5, %v9237_v14  ;;  %v9283_v11 = vadd.f32 %v9223_v30, %v9086_v0 }
 0x352   : > { %v3053_v61 = vpop.f32.mrf.mxu1  ;;  %v5291_v58 = vpop.eup %5290  ;;  %5304 = vpow2.f32 %v3497_v57  ;;  %v3392_v21 = vsub.f32 0.0, %v3329_v39  ;;  %v3132_v7 = vmax.f32 %v9099_v47, 0.0  ;;  %v3133_v53 = vmax.f32 %v9103_v60, 0.0 }
 0x353   : > { %v9276_v49 = vpop.eup %5292  ;;  %v3870_v34 = vmul.f32 0.6931472, %v5291_v58  ;;  %5306 = vpow2.f32 %v3499_v6  ;;  %v3883_v48 = vand.u32 2147483647, %v9229_v35  ;;  %v3892_v17 = vand.u32 2147483647, %v9237_v14 }
 0x354   : > { %v3904_v16 = vadd.f32 1.0, %v9276_v49  ;;  %v9287_v40 = vpop.eup %5294  ;;  %vm3195_vm11 = vcmp.ne.f32.partialorder %v9099_v47, %v9099_v47  ;;  %v3881_v3 = vadd.f32 1.0, %v3880_v54  ;;  %v3898_v45 = vmul.f32 -0.5, %v9251_v32 }
 0x355   : > { %v9285_v25 = vpop.f32.mrf.mxu1  ;;  %v3876_v19 = vsel %vm9271_vm10, %v3873_v28, %v3870_v34  ;;  %v3913_v22 = vadd.f32 1.0, %v9287_v40  ;;  %v3501_v20 = vmul.f32 1.442695, %v3392_v21  ;;  %vm3196_vm12 = vcmp.ne.f32.partialorder %v9103_v60, %v9103_v60 }
 0x356   : > { %v4139_v36 = vadd.f32 %v3876_v19, %v3131_v56  ;;  %5308 = vlog2.f32 %v3904_v16  ;;  %v3890_v8 = vadd.f32 1.0, %v3889_v12  ;;  %v3330_v52 = vand.u32 2147483647, %v9283_v11 }
 0x357   : > { %v3058_v0 = vpop.f32.mrf.mxu1  ;;  %v9308_v62 = vadd.f32 %v9223_v30, %v9110_v59  ;;  %v3134_v5 = vmax.f32 %v9123_v31, 0.0  ;;  %v3901_v42 = vand.u32 2147483647, %v9251_v32  ;;  %v3135_v1 = vmax.f32 %v9148_v13, 0.0 }
 0x358   : > { %v4202_v24 = vsel %vm3194_vm9, %v9072_v2, %v4139_v36  ;;  %5310 = vlog2.f32 %v3913_v22  ;;  %vm9316_vm13 = vcmp.lt.f32.partialorder %v3883_v48, 0.0004427343  ;;  %vm9320_vm14 = vcmp.lt.f32.partialorder %v3892_v17, 0.0004427343 }
 0x359   : > { %v9310_v10 = vpop.f32.mrf.mxu1  ;;  %4265 = vst [vmem:[%s8388_s8 + $0x128] sm:$0xff] %v4202_v24  ;;  %5312 = vpow2.f32 %v3501_v20  ;;  %v3393_v59 = vsub.f32 0.0, %v3330_v52  ;;  %v3882_v18 = vmul.f32 %v9229_v35, %v3881_v3  ;;  %vm3197_vm15 = vcmp.ne.f32.partialorder %v9123_v31, %v9123_v31 }
 0x35a   : > { %v3899_v55 = vadd.f32 1.0, %v3898_v45  ;;  %v3331_v56 = vand.u32 2147483647, %v9308_v62  ;;  %v3891_v37 = vmul.f32 %v9237_v14, %v3890_v8  ;;  %v3907_v61 = vmul.f32 -0.5, %v9276_v49 }
 0x35b   : > { %v5297_v2 = vpop.eup %5296  ;;  %v3061_v44 = vpop.f32.mrf.mxu1  ;;  %v3503_v58 = vmul.f32 1.442695, %v3393_v59  ;;  %vm9334_vm0 = vcmp.lt.f32.partialorder %v3901_v42, 0.0004427343  ;;  %v3916_v35 = vmul.f32 -0.5, %v9287_v40  ;;  %v9341_v34 = vadd.f32 %v9223_v30, %v9129_v29 }
 0x35c   : > { %v5299_v23 = vpop.eup %5298  ;;  %v3879_v46 = vmul.f32 0.6931472, %v5297_v2  ;;  %v3394_v16 = vsub.f32 0.0, %v3331_v56  ;;  %v3900_v36 = vmul.f32 %v9251_v32, %v3899_v55  ;;  %vm3198_vm1 = vcmp.ne.f32.partialorder %v9148_v13, %v9148_v13 }
 0x35d   : > { %v3888_v57 = vmul.f32 0.6931472, %v5299_v23  ;;  %v9330_v28 = vpop.eup %5300  ;;  %5314 = vpow2.f32 %v3503_v58  ;;  %v3910_v17 = vand.u32 2147483647, %v9276_v49  ;;  %v3136_v22 = vmax.f32 %v9158_v51, 0.0 }
 0x35e   : > { %v3885_v27 = vsel %vm9316_vm13, %v3882_v18, %v3879_v46  ;;  %v5303_v14 = vpop.eup %5302  ;;  %v3922_v12 = vadd.f32 1.0, %v9330_v28  ;;  %v3917_v20 = vadd.f32 1.0, %v3916_v35  ;;  %v3505_v24 = vmul.f32 1.442695, %v3394_v16 }
 0x35f   : > { %v4140_v54 = vadd.f32 %v3885_v27, %v3132_v7  ;;  %v3894_v6 = vsel %vm9320_vm14, %v3891_v37, %v3888_v57  ;;  %v3897_v19 = vmul.f32 0.6931472, %v5303_v14  ;;  %v9347_v48 = vpop.eup %5304  ;;  %v3908_v7 = vadd.f32 1.0, %v3907_v61 }
 0x360   : > { %v4141_v21 = vadd.f32 %v3894_v6, %v3133_v53  ;;  %5316 = vlog2.f32 %v3922_v12  ;;  %v3931_v0 = vadd.f32 1.0, %v9347_v48  ;;  %v9365_v3 = vpop.eup %5306  ;;  %vm3199_vm2 = vcmp.ne.f32.partialorder %v9158_v51, %v9158_v51 }
 0x361   : > { %v4203_v29 = vsel %vm3195_vm11, %v9099_v47, %v4140_v54  ;;  %v3903_v53 = vsel %vm9334_vm0, %v3900_v36, %v3897_v19  ;;  %v3332_v47 = vand.u32 2147483647, %v9341_v34  ;;  %v3940_v52 = vadd.f32 1.0, %v9365_v3 }
 0x362   : > { %4266 = vst [vmem:[%s8388_s8 + $0x130] sm:$0xff] %v4203_v29  ;;  %v4204_v32 = vsel %vm3196_vm12, %v9103_v60, %v4141_v21  ;;  %v4142_v45 = vadd.f32 %v3903_v53, %v3134_v5  ;;  %v3919_v60 = vand.u32 2147483647, %v9287_v40  ;;  %5318 = vlog2.f32 %v3931_v0 }
 0x363   : > { %4267 = vst [vmem:[%s8388_s8 + $0x138] sm:$0xff] %v4204_v32  ;;  %v5309_v8 = vpop.eup %5308  ;;  %v3909_v5 = vmul.f32 %v9276_v49, %v3908_v7  ;;  %v3925_v38 = vmul.f32 -0.5, %v9330_v28  ;;  %vm3911_vm3 = vcmp.lt.f32.partialorder %v3910_v17, 0.0004427343  ;;  %5320 = vlog2.f32 %v3940_v52 }
 0x364   : > { %v4205_v42 = vsel %vm3197_vm15, %v9123_v31, %v4142_v45  ;;  %v3906_v2 = vmul.f32 0.6931472, %v5309_v8  ;;  %v3395_v4 = vsub.f32 0.0, %v3332_v47  ;;  %v9382_v59 = vadd.f32 %v9223_v30, %v9160_v15 }
 0x365   : > { %4268 = vst [vmem:[%s8388_s8 + $0x140] sm:$0xff] %v4205_v42  ;;  %v5311_v44 = vpop.eup %5310  ;;  %v3918_v46 = vmul.f32 %v9287_v40, %v3917_v20  ;;  %v3137_v18 = vmax.f32 %v9186_v33, 0.0  ;;  %5322 = vpow2.f32 %v3505_v24  ;;  %v9386_v31 = vpop.f32.mrf.mxu1  ;;  %v9394_v15 = vadd.f32 %v9223_v30, %v9176_v43 }
 0x366   : > { %v3912_v23 = vsel %vm3911_vm3, %v3909_v5, %v3906_v2  ;;  %v9388_v49 = vpop.eup %5312  ;;  %v3915_v56 = vmul.f32 0.6931472, %v5311_v44  ;;  %v3507_v57 = vmul.f32 1.442695, %v3395_v4  ;;  %vm3920_vm4 = vcmp.lt.f32.partialorder %v3919_v60, 0.0004427343 }
 0x367   : > { %v4143_v55 = vadd.f32 %v3912_v23, %v3135_v1  ;;  %v3926_v37 = vadd.f32 1.0, %v3925_v38  ;;  %v3934_v40 = vmul.f32 -0.5, %v9347_v48  ;;  %v3949_v61 = vadd.f32 1.0, %v9388_v49  ;;  %v3066_v58 = vpop.f32.mrf.mxu1 }
 0x368   : > { %v3921_v39 = vsel %vm3920_vm4, %v3918_v46, %v3915_v56  ;;  %5324 = vpow2.f32 %v3507_v57  ;;  %v3333_v1 = vand.u32 2147483647, %v9382_v59  ;;  %vm3200_vm5 = vcmp.ne.f32.partialorder %v9186_v33, %v9186_v33 }
 0x369   : > { %v4206_v27 = vsel %vm3198_vm1, %v9148_v13, %v4143_v55  ;;  %v4144_v35 = vadd.f32 %v3921_v39, %v3136_v22  ;;  %v3928_v43 = vand.u32 2147483647, %v9330_v28  ;;  %v3943_v14 = vmul.f32 -0.5, %v9365_v3  ;;  %v9408_v54 = vpop.f32.mrf.mxu1 }
 0x36a   : > { %4269 = vst [vmem:[%s8388_s8 + $0x148] sm:$0xff] %v4206_v27  ;;  %5326 = vlog2.f32 %v3949_v61  ;;  %v3138_v6 = vmax.f32 %v9205_v50, 0.0  ;;  %v3937_v13 = vand.u32 2147483647, %v9347_v48  ;;  %v3396_v12 = vsub.f32 0.0, %v3333_v1  ;;  %v9413_v21 = vpop.eup %5314 }
 0x36b   : > { %v3334_v16 = vand.u32 2147483647, %v9394_v15  ;;  %v4207_v19 = vsel %vm3199_vm2, %v9158_v51, %v4144_v35  ;;  %v3927_v36 = vmul.f32 %v9330_v28, %v3926_v37  ;;  %v3139_v29 = vmax.f32 %v9227_v9, 0.0  ;;  %v3069_v17 = vpop.f32.mrf.mxu1 }
 0x36c   : > { %v9423_v7 = vadd.f32 %v9223_v30, %v9247_v41  ;;  %4270 = vst [vmem:[%s8388_s8 + $0x150] sm:$0xff] %v4207_v19  ;;  %vm3201_vm6 = vcmp.ne.f32.partialorder %v9205_v50, %v9205_v50  ;;  %v3935_v53 = vadd.f32 1.0, %v3934_v40  ;;  %v3946_v0 = vand.u32 2147483647, %v9365_v3 }
 0x36d   : > { %v5317_v32 = vpop.eup %5316  ;;  %v3958_v47 = vadd.f32 1.0, %v9413_v21  ;;  %v3509_v51 = vmul.f32 1.442695, %v3396_v12  ;;  %v3944_v28 = vadd.f32 1.0, %v3943_v14  ;;  %v3397_v22 = vsub.f32 0.0, %v3334_v16 }
 0x36e   : > { %v3924_v45 = vmul.f32 0.6931472, %v5317_v32  ;;  %v9432_v20 = vadd.f32 %v9223_v30, %v9264_v26  ;;  %vm3929_vm7 = vcmp.lt.f32.partialorder %v3928_v43, 0.0004427343  ;;  %vm9434_vm8 = vcmp.lt.f32.partialorder %v3937_v13, 0.0004427343 }
 0x36f   : > { %5328 = vlog2.f32 %v3958_v47  ;;  %v3335_v24 = vand.u32 2147483647, %v9423_v7  ;;  %v5319_v8 = vpop.eup %5318  ;;  %v3952_v52 = vmul.f32 -0.5, %v9388_v49  ;;  %v3511_v42 = vmul.f32 1.442695, %v3397_v22 }
 0x370   : > { %v3930_v60 = vsel %vm3929_vm7, %v3927_v36, %v3924_v45  ;;  %5330 = vpow2.f32 %v3509_v51  ;;  %v3933_v5 = vmul.f32 0.6931472, %v5319_v8  ;;  %v3936_v26 = vmul.f32 %v9347_v48, %v3935_v53  ;;  %v5321_v4 = vpop.eup %5320 }
 0x371   : > { %v4145_v2 = vadd.f32 %v3930_v60, %v3137_v18  ;;  %v3398_v38 = vsub.f32 0.0, %v3335_v24  ;;  %v3945_v44 = vmul.f32 %v9365_v3, %v3944_v28  ;;  %vm9442_vm9 = vcmp.lt.f32.partialorder %v3946_v0, 0.0004427343 }
 0x372   : > { %5332 = vpow2.f32 %v3511_v42  ;;  %v3336_v46 = vand.u32 2147483647, %v9432_v20  ;;  %v9447_v55 = vpop.eup %5322  ;;  %v3939_v48 = vsel %vm9434_vm8, %v3936_v26, %v3933_v5  ;;  %v3942_v56 = vmul.f32 0.6931472, %v5321_v4 }
 0x373   : > { %v4208_v18 = vsel %vm3200_vm5, %v9186_v33, %v4145_v2  ;;  %v3513_v57 = vmul.f32 1.442695, %v3398_v38  ;;  %v4146_v3 = vadd.f32 %v3939_v48, %v3138_v6  ;;  %v3953_v37 = vadd.f32 1.0, %v3952_v52 }
 0x374   : > { %4271 = vst [vmem:[%s8388_s8 + $0x158] sm:$0xff] %v4208_v18  ;;  %v3955_v40 = vand.u32 2147483647, %v9388_v49  ;;  %v3967_v61 = vadd.f32 1.0, %v9447_v55  ;;  %v3948_v58 = vsel %vm9442_vm9, %v3945_v44, %v3942_v56  ;;  %v3961_v27 = vmul.f32 -0.5, %v9413_v21 }
 0x375   : > { %5334 = vpow2.f32 %v3513_v57  ;;  %v3399_v33 = vsub.f32 0.0, %v3336_v46  ;;  %v9461_v39 = vpop.eup %5324  ;;  %v4209_v1 = vsel %vm3201_vm6, %v9205_v50, %v4146_v3  ;;  %v4147_v35 = vadd.f32 %v3948_v58, %v3139_v29 }
 0x376   : > { %5336 = vlog2.f32 %v3967_v61  ;;  %v9469_v43 = vadd.f32 %v9223_v30, %v9285_v25  ;;  %4272 = vst [vmem:[%s8388_s8 + $0x160] sm:$0xff] %v4209_v1  ;;  %vm3202_vm10 = vcmp.ne.f32.partialorder %v9227_v9, %v9227_v9  ;;  %v3140_v6 = vmax.f32 %v9245_v63, 0.0 }
 0x377   : > { %v5327_v14 = vpop.eup %5326  ;;  %v3976_v13 = vadd.f32 1.0, %v9461_v39  ;;  %v4210_v12 = vsel %vm3202_vm10, %v9227_v9, %v4147_v35  ;;  %v3954_v50 = vmul.f32 %v9388_v49, %v3953_v37  ;;  %v3515_v19 = vmul.f32 1.442695, %v3399_v33 }
 0x378   : > { %v3951_v16 = vmul.f32 0.6931472, %v5327_v14  ;;  %4273 = vst [vmem:[%s8388_s8 + $0x168] sm:$0xff] %v4210_v12  ;;  %vm3956_vm11 = vcmp.lt.f32.partialorder %v3955_v40, 0.0004427343  ;;  %v3962_v36 = vadd.f32 1.0, %v3961_v27  ;;  %v9483_v32 = vadd.f32 %v9223_v30, %v9310_v10 }
 0x379   : > { %v3964_v25 = vand.u32 2147483647, %v9413_v21  ;;  %5338 = vlog2.f32 %v3976_v13  ;;  %v3337_v17 = vand.u32 2147483647, %v9469_v43  ;;  %v9487_v49 = vadd.f32 %v9223_v30, %v9386_v31 }
 0x37a   : > { %v3957_v29 = vsel %vm3956_vm11, %v3954_v50, %v3951_v16  ;;  %5340 = vpow2.f32 %v3515_v19  ;;  %vm3203_vm12 = vcmp.ne.f32.partialorder %v9245_v63, %v9245_v63  ;;  %v3970_v0 = vmul.f32 -0.5, %v9447_v55 }
 0x37b   : > { %v4148_v9 = vadd.f32 %v3957_v29, %v3140_v6  ;;  %v3400_v47 = vsub.f32 0.0, %v3337_v17  ;;  %v3338_v51 = vand.u32 2147483647, %v9483_v32  ;;  %v3963_v41 = vmul.f32 %v9413_v21, %v3962_v36 }
 0x37c   : > { %v5329_v53 = vpop.eup %5328  ;;  %v3979_v31 = vmul.f32 -0.5, %v9461_v39  ;;  %v3141_v24 = vmax.f32 %v9283_v11, 0.0  ;;  %vm3965_vm13 = vcmp.lt.f32.partialorder %v3964_v25, 0.0004427343  ;;  %v3339_v26 = vand.u32 2147483647, %v9487_v49 }
 0x37d   : > { %v3072_v45 = vpop.f32.mrf.mxu1  ;;  %v9493_v28 = vpop.eup %5330  ;;  %v4211_v10 = vsel %vm3203_vm12, %v9245_v63, %v4148_v9  ;;  %v3960_v22 = vmul.f32 0.6931472, %v5329_v53  ;;  %v3517_v60 = vmul.f32 1.442695, %v3400_v47  ;;  %v3401_v5 = vsub.f32 0.0, %v3338_v51 }
 0x37e   : > { %4274 = vst [vmem:[%s8388_s8 + $0x170] sm:$0xff] %v4211_v10  ;;  %v3985_v8 = vadd.f32 1.0, %v9493_v28  ;;  %vm3204_vm14 = vcmp.ne.f32.partialorder %v9283_v11, %v9283_v11  ;;  %v3971_v21 = vadd.f32 1.0, %v3970_v0  ;;  %v3973_v4 = vand.u32 2147483647, %v9447_v55 }
 0x37f   : > { %v3074_v52 = vpop.f32.mrf.mxu1  ;;  %v9501_v42 = vpop.eup %5332  ;;  %v3966_v2 = vsel %vm3965_vm13, %v3963_v41, %v3960_v22  ;;  %v3980_v44 = vadd.f32 1.0, %v3979_v31  ;;  %v3519_v48 = vmul.f32 1.442695, %v3401_v5  ;;  %v3402_v56 = vsub.f32 0.0, %v3339_v26 }
 0x380   : > { %v4149_v63 = vadd.f32 %v3966_v2, %v3141_v24  ;;  %5342 = vlog2.f32 %v3985_v8  ;;  %v3994_v23 = vadd.f32 1.0, %v9501_v42  ;;  %v9513_v57 = vadd.f32 %v9223_v30, %v9408_v54 }
 0x381   : > { %v3075_v38 = vpop.f32.mrf.mxu1  ;;  %5344 = vpow2.f32 %v3517_v60  ;;  %v3142_v40 = vmax.f32 %v9308_v62, 0.0  ;;  %v3982_v61 = vand.u32 2147483647, %v9461_v39  ;;  %v3972_v33 = vmul.f32 %v9447_v55, %v3971_v21 }
 0x382   : > { %v9508_v46 = vpop.eup %5334  ;;  %v4212_v18 = vsel %vm3204_vm14, %v9283_v11, %v4149_v63  ;;  %5346 = vlog2.f32 %v3994_v23  ;;  %v3988_v11 = vmul.f32 -0.5, %v9493_v28  ;;  %vm3205_vm15 = vcmp.ne.f32.partialorder %v9308_v62, %v9308_v62 }
 0x383   : > { %v3077_v3 = vpop.f32.mrf.mxu1  ;;  %v5337_v37 = vpop.eup %5336  ;;  %4275 = vst [vmem:[%s8388_s8 + $0x178] sm:$0xff] %v4212_v18  ;;  %v4003_v58 = vadd.f32 1.0, %v9508_v46  ;;  %5348 = vpow2.f32 %v3519_v48  ;;  %vm3974_vm0 = vcmp.lt.f32.partialorder %v3973_v4, 0.0004427343  ;;  %v3521_v54 = vmul.f32 1.442695, %v3402_v56 }
 0x384   : > { %v3969_v27 = vmul.f32 0.6931472, %v5337_v37  ;;  %v3143_v6 = vmax.f32 %v9341_v34, 0.0  ;;  %v3981_v13 = vmul.f32 %v9461_v39, %v3980_v44  ;;  %v3340_v12 = vand.u32 2147483647, %v9513_v57 }
 0x385   : > { %v3080_v1 = vpop.f32.mrf.mxu1  ;;  %5350 = vlog2.f32 %v4003_v58  ;;  %v9529_v36 = vadd.f32 %v9223_v30, %v3072_v45  ;;  %vm3206_vm1 = vcmp.ne.f32.partialorder %v9341_v34, %v9341_v34  ;;  %vm3983_vm2 = vcmp.lt.f32.partialorder %v3982_v61, 0.0004427343 }
 0x386   : > { %v5339_v35 = vpop.eup %5338  ;;  %v3975_v14 = vsel %vm3974_vm0, %v3972_v33, %v3969_v27  ;;  %5352 = vpow2.f32 %v3521_v54  ;;  %v3989_v25 = vadd.f32 1.0, %v3988_v11  ;;  %v3997_v53 = vmul.f32 -0.5, %v9501_v42 }
 0x387   : > { %v3082_v55 = vpop.f32.mrf.mxu1  ;;  %v9526_v16 = vpop.eup %5340  ;;  %v4150_v50 = vadd.f32 %v3975_v14, %v3142_v40  ;;  %v3978_v19 = vmul.f32 0.6931472, %v5339_v35  ;;  %v3403_v0 = vsub.f32 0.0, %v3340_v12  ;;  %v3144_v51 = vmax.f32 %v9382_v59, 0.0 }
 0x388   : > { %v4012_v29 = vadd.f32 1.0, %v9526_v16  ;;  %v4006_v45 = vmul.f32 -0.5, %v9508_v46  ;;  %v3991_v22 = vand.u32 2147483647, %v9493_v28  ;;  %v3341_v31 = vand.u32 2147483647, %v9529_v36 }
 0x389   : > { %v9534_v39 = vpop.f32.mrf.mxu1  ;;  %v4213_v17 = vsel %vm3205_vm15, %v9308_v62, %v4150_v50  ;;  %v3984_v9 = vsel %vm3983_vm2, %v3981_v13, %v3978_v19  ;;  %v3523_v41 = vmul.f32 1.442695, %v3403_v0  ;;  %v9547_v62 = vadd.f32 %v9223_v30, %v3075_v38 }
 0x38a   : > { %4276 = vst [vmem:[%s8388_s8 + $0x180] sm:$0xff] %v4213_v17  ;;  %v4151_v47 = vadd.f32 %v3984_v9, %v3143_v6  ;;  %5354 = vlog2.f32 %v4012_v29  ;;  %vm3207_vm3 = vcmp.ne.f32.partialorder %v9382_v59, %v9382_v59  ;;  %v3145_v8 = vmax.f32 %v9394_v15, 0.0 }
 0x38b   : > { %v3085_v10 = vpop.f32.mrf.mxu1  ;;  %v4000_v60 = vand.u32 2147483647, %v9501_v42  ;;  %v3990_v2 = vmul.f32 %v9493_v28, %v3989_v25  ;;  %vm3208_vm4 = vcmp.ne.f32.partialorder %v9394_v15, %v9394_v15  ;;  %v3998_v5 = vadd.f32 1.0, %v3997_v53 }
 0x38c   : > { %v4214_v24 = vsel %vm3206_vm1, %v9341_v34, %v4151_v47  ;;  %5356 = vpow2.f32 %v3523_v41  ;;  %v4007_v34 = vadd.f32 1.0, %v4006_v45  ;;  %v4009_v21 = vand.u32 2147483647, %v9508_v46 }
 0x38d   : > { %v5343_v52 = vpop.eup %5342  ;;  %4277 = vst [vmem:[%s8388_s8 + $0x188] sm:$0xff] %v4214_v24  ;;  %v3404_v38 = vsub.f32 0.0, %v3341_v31  ;;  %vm3992_vm5 = vcmp.lt.f32.partialorder %v3991_v22, 0.0004427343  ;;  %v3146_v44 = vmax.f32 %v9423_v7, 0.0  ;;  %v4015_v3 = vmul.f32 -0.5, %v9526_v16 }
 0x38e   : > { %v9561_v26 = vpop.eup %5344  ;;  %v3987_v63 = vmul.f32 0.6931472, %v5343_v52  ;;  %v3342_v28 = vand.u32 2147483647, %v9547_v62  ;;  %vm9567_vm6 = vcmp.lt.f32.partialorder %v4000_v60, 0.0004427343  ;;  %v9573_v37 = vadd.f32 %v9223_v30, %v3080_v1 }
 0x38f   : > { %v3088_v4 = vpop.f32.mrf.mxu1  ;;  %v4021_v23 = vadd.f32 1.0, %v9561_v26  ;;  %v5347_v18 = vpop.eup %5346  ;;  %v3999_v33 = vmul.f32 %v9501_v42, %v3998_v5  ;;  %v4008_v54 = vmul.f32 %v9508_v46, %v4007_v34  ;;  %vm9579_vm7 = vcmp.lt.f32.partialorder %v4009_v21, 0.0004427343 }
 0x390   : > { %v3993_v48 = vsel %vm3992_vm5, %v3990_v2, %v3987_v63  ;;  %v9575_v61 = vpop.eup %5348  ;;  %v3996_v27 = vmul.f32 0.6931472, %v5347_v18  ;;  %v3525_v1 = vmul.f32 1.442695, %v3404_v38  ;;  %v3405_v55 = vsub.f32 0.0, %v3342_v28 }
 0x391   : > { %v3090_v40 = vpop.f32.mrf.mxu1  ;;  %v4152_v58 = vadd.f32 %v3993_v48, %v3144_v51  ;;  %5358 = vlog2.f32 %v4021_v23  ;;  %v4030_v14 = vadd.f32 1.0, %v9575_v61  ;;  %v4016_v19 = vadd.f32 1.0, %v4015_v3 }
 0x392   : > { %v5351_v11 = vpop.eup %5350  ;;  %v4002_v42 = vsel %vm9567_vm6, %v3999_v33, %v3996_v27  ;;  %v3343_v25 = vand.u32 2147483647, %v9573_v37  ;;  %v9600_v53 = vadd.f32 %v9223_v30, %v9534_v39  ;;  %vm3209_vm8 = vcmp.ne.f32.partialorder %v9423_v7, %v9423_v7 }
 0x393   : > { %v3091_v6 = vpop.f32.mrf.mxu1  ;;  %v4215_v13 = vsel %vm3207_vm3, %v9382_v59, %v4152_v58  ;;  %v4005_v12 = vmul.f32 0.6931472, %v5351_v11  ;;  %v9590_v46 = vpop.eup %5352  ;;  %v4153_v50 = vadd.f32 %v4002_v42, %v3145_v8  ;;  %5360 = vlog2.f32 %v4030_v14 }
 0x394   : > { %4278 = vst [vmem:[%s8388_s8 + $0x190] sm:$0xff] %v4215_v13  ;;  %v4018_v59 = vand.u32 2147483647, %v9526_v16  ;;  %v4039_v9 = vadd.f32 1.0, %v9590_v46  ;;  %5362 = vpow2.f32 %v3525_v1  ;;  %v4024_v45 = vmul.f32 -0.5, %v9561_v26 }
 0x395   : > { %v3092_v29 = vpop.f32.mrf.mxu1  ;;  %v4011_v17 = vsel %vm9579_vm7, %v4008_v54, %v4005_v12  ;;  %v4216_v0 = vsel %vm3208_vm4, %v9394_v15, %v4153_v50  ;;  %v3527_v10 = vmul.f32 1.442695, %v3405_v55  ;;  %v4017_v41 = vmul.f32 %v9526_v16, %v4016_v19 }
 0x396   : > { %v4154_v47 = vadd.f32 %v4011_v17, %v3146_v44  ;;  %4279 = vst [vmem:[%s8388_s8 + $0x198] sm:$0xff] %v4216_v0  ;;  %5364 = vlog2.f32 %v4039_v9  ;;  %v3406_v31 = vsub.f32 0.0, %v3343_v25  ;;  %v3147_v15 = vmax.f32 %v9432_v20, 0.0 }
 0x397   : > { %v5355_v51 = vpop.eup %5354  ;;  %vm4019_vm9 = vcmp.lt.f32.partialorder %v4018_v59, 0.0004427343  ;;  %5366 = vpow2.f32 %v3527_v10  ;;  %v3344_v24 = vand.u32 2147483647, %v9600_v53  ;;  %v4033_v52 = vmul.f32 -0.5, %v9575_v61 }
 0x398   : > { %v4217_v22 = vsel %vm3209_vm8, %v9423_v7, %v4154_v47  ;;  %v4014_v39 = vmul.f32 0.6931472, %v5355_v51  ;;  %v3529_v2 = vmul.f32 1.442695, %v3406_v31  ;;  %v9619_v7 = vadd.f32 %v9223_v30, %v3088_v4 }
 0x399   : > { %4280 = vst [vmem:[%s8388_s8 + $0x1a0] sm:$0xff] %v4217_v22  ;;  %v9615_v8 = vpop.eup %5356  ;;  %v4025_v16 = vadd.f32 1.0, %v4024_v45  ;;  %vm3210_vm10 = vcmp.ne.f32.partialorder %v9432_v20, %v9432_v20  ;;  %v4027_v34 = vand.u32 2147483647, %v9561_v26  ;;  %v3407_v21 = vsub.f32 0.0, %v3344_v24 }
 0x39a   : > { %v4020_v60 = vsel %vm4019_vm9, %v4017_v41, %v4014_v39  ;;  %v4048_v63 = vadd.f32 1.0, %v9615_v8  ;;  %5368 = vpow2.f32 %v3529_v2  ;;  %v4042_v44 = vmul.f32 -0.5, %v9590_v46 }
 0x39b   : > { %v4155_v5 = vadd.f32 %v4020_v60, %v3147_v15  ;;  %v4034_v30 = vadd.f32 1.0, %v4033_v52  ;;  %v3531_v4 = vmul.f32 1.442695, %v3407_v21  ;;  %v3345_v28 = vand.u32 2147483647, %v9619_v7 }
 0x39c   : > { %5370 = vlog2.f32 %v4048_v63  ;;  %v4026_v48 = vmul.f32 %v9561_v26, %v4025_v16  ;;  %v4036_v56 = vand.u32 2147483647, %v9575_v61  ;;  %v3148_v3 = vmax.f32 %v9469_v43, 0.0 }
 0x39d   : > { %v4218_v38 = vsel %vm3210_vm10, %v9432_v20, %v4155_v5  ;;  %vm4028_vm11 = vcmp.lt.f32.partialorder %v4027_v34, 0.0004427343  ;;  %5372 = vpow2.f32 %v3531_v4  ;;  %v3408_v40 = vsub.f32 0.0, %v3345_v28 }
 0x39e   : > { %v5359_v23 = vpop.eup %5358  ;;  %4281 = vst [vmem:[%s8388_s8 + $0x1a8] sm:$0xff] %v4218_v38  ;;  %v4043_v27 = vadd.f32 1.0, %v4042_v44  ;;  %v4045_v33 = vand.u32 2147483647, %v9590_v46  ;;  %v4035_v35 = vmul.f32 %v9575_v61, %v4034_v30  ;;  %vm3211_vm12 = vcmp.ne.f32.partialorder %v9469_v43, %v9469_v43 }
 0x39f   : > { %v4023_v18 = vmul.f32 0.6931472, %v5359_v23  ;;  %v3533_v14 = vmul.f32 1.442695, %v3408_v40  ;;  %v3149_v26 = vmax.f32 %v9483_v32, 0.0  ;;  %v4051_v6 = vmul.f32 -0.5, %v9615_v8 }
 0x3a0   : > { %v5361_v20 = vpop.eup %5360  ;;  %vm4037_vm13 = vcmp.lt.f32.partialorder %v4036_v56, 0.0004427343  ;;  %v4044_v61 = vmul.f32 %v9590_v46, %v4043_v27  ;;  %vm3212_vm14 = vcmp.ne.f32.partialorder %v9483_v32, %v9483_v32  ;;  %v3150_v29 = vmax.f32 %v9487_v49, 0.0 }
 0x3a1   : > { %v4029_v58 = vsel %vm4028_vm11, %v4026_v48, %v4023_v18  ;;  %v4032_v54 = vmul.f32 0.6931472, %v5361_v20  ;;  %v5363_v1 = vpop.eup %5362  ;;  %5374 = vpow2.f32 %v3533_v14  ;;  %vm4046_vm15 = vcmp.lt.f32.partialorder %v4045_v33, 0.0004427343 }
 0x3a2   : > { %v4156_v11 = vadd.f32 %v4029_v58, %v3148_v3  ;;  %v4057_v55 = vadd.f32 1.0, %v5363_v1  ;;  %v4052_v59 = vadd.f32 1.0, %v4051_v6  ;;  %v4054_v47 = vand.u32 2147483647, %v9615_v8 }
 0x3a3   : > { %v5365_v13 = vpop.eup %5364  ;;  %v4038_v12 = vsel %vm4037_vm13, %v4035_v35, %v4032_v54  ;;  %vm3213_vm0 = vcmp.ne.f32.partialorder %v9487_v49, %v9487_v49  ;;  %v3151_v39 = vmax.f32 %v9513_v57, 0.0  ;;  %v4060_v41 = vmul.f32 -0.5, %v5363_v1 }
 0x3a4   : > { %v4219_v42 = vsel %vm3211_vm12, %v9469_v43, %v4156_v11  ;;  %v4157_v50 = vadd.f32 %v4038_v12, %v3149_v26  ;;  %v4041_v19 = vmul.f32 0.6931472, %v5365_v13  ;;  %v5367_v25 = vpop.eup %5366  ;;  %5376 = vlog2.f32 %v4057_v55 }
 0x3a5   : > { %4282 = vst [vmem:[%s8388_s8 + $0x1b0] sm:$0xff] %v4219_v42  ;;  %v4066_v9 = vadd.f32 1.0, %v5367_v25  ;;  %vm4055_vm1 = vcmp.lt.f32.partialorder %v4054_v47, 0.0004427343  ;;  %vm3214_vm2 = vcmp.ne.f32.partialorder %v9513_v57, %v9513_v57  ;;  %v4069_v52 = vmul.f32 -0.5, %v5367_v25 }
 0x3a6   : > { %v4220_v43 = vsel %vm3212_vm14, %v9483_v32, %v4157_v50  ;;  %v4047_v17 = vsel %vm4046_vm15, %v4044_v61, %v4041_v19  ;;  %v4053_v32 = vmul.f32 %v9615_v8, %v4052_v59  ;;  %v4061_v2 = vadd.f32 1.0, %v4060_v41 }
 0x3a7   : > { %4283 = vst [vmem:[%s8388_s8 + $0x1b8] sm:$0xff] %v4220_v43  ;;  %v4158_v0 = vadd.f32 %v4047_v17, %v3150_v29  ;;  %v5369_v46 = vpop.eup %5368  ;;  %5378 = vlog2.f32 %v4066_v9  ;;  %v4063_v5 = vand.u32 2147483647, %v5363_v1  ;;  %v4070_v34 = vadd.f32 1.0, %v4069_v52 }
 0x3a8   : > { %v4075_v10 = vadd.f32 1.0, %v5369_v46  ;;  %v4078_v16 = vmul.f32 -0.5, %v5369_v46  ;;  %v4062_v44 = vmul.f32 %v5363_v1, %v4061_v2  ;;  %v4072_v23 = vand.u32 2147483647, %v5367_v25 }
 0x3a9   : > { %v5371_v51 = vpop.eup %5370  ;;  %v4221_v45 = vsel %vm3213_vm0, %v9487_v49, %v4158_v0  ;;  %v3152_v30 = vmax.f32 %v9529_v36, 0.0  ;;  %vm4064_vm3 = vcmp.lt.f32.partialorder %v4063_v5, 0.0004427343  ;;  %v4071_v3 = vmul.f32 %v5367_v25, %v4070_v34 }
 0x3aa   : > { %4284 = vst [vmem:[%s8388_s8 + $0x1c0] sm:$0xff] %v4221_v45  ;;  %v4050_v22 = vmul.f32 0.6931472, %v5371_v51  ;;  %5380 = vlog2.f32 %v4075_v10  ;;  %v5373_v31 = vpop.eup %5372  ;;  %v4081_v40 = vand.u32 2147483647, %v5369_v46  ;;  %vm3215_vm4 = vcmp.ne.f32.partialorder %v9529_v36, %v9529_v36 }
 0x3ab   : > { %v4084_v60 = vadd.f32 1.0, %v5373_v31  ;;  %v4087_v18 = vmul.f32 -0.5, %v5373_v31  ;;  %v3153_v20 = vmax.f32 %v9547_v62, 0.0  ;;  %vm4073_vm5 = vcmp.lt.f32.partialorder %v4072_v23, 0.0004427343 }
 0x3ac   : > { %v4056_v15 = vsel %vm4055_vm1, %v4053_v32, %v4050_v22  ;;  %vm3216_vm6 = vcmp.ne.f32.partialorder %v9547_v62, %v9547_v62  ;;  %v3154_v1 = vmax.f32 %v9573_v37, 0.0  ;;  %vm4082_vm7 = vcmp.lt.f32.partialorder %v4081_v40, 0.0004427343 }
 0x3ad   : > { %v4159_v24 = vadd.f32 %v4056_v15, %v3151_v39  ;;  %5382 = vlog2.f32 %v4084_v60  ;;  %v4088_v14 = vadd.f32 1.0, %v4087_v18  ;;  %v4090_v26 = vand.u32 2147483647, %v5373_v31 }
 0x3ae   : > { %v5375_v8 = vpop.eup %5374  ;;  %vm3217_vm8 = vcmp.ne.f32.partialorder %v9573_v37, %v9573_v37  ;;  %v3155_v61 = vmax.f32 %v9600_v53, 0.0  ;;  %vm3218_vm10 = vcmp.ne.f32.partialorder %v9600_v53, %v9600_v53  ;;  %vm3219_vm12 = vcmp.ne.f32.partialorder %v9619_v7, %v9619_v7 }
 0x3af   : > { %v4222_v49 = vsel %vm3214_vm2, %v9513_v57, %v4159_v24  ;;  %v4093_v21 = vadd.f32 1.0, %v5375_v8  ;;  %v4079_v57 = vadd.f32 1.0, %v4078_v16  ;;  %v4096_v6 = vmul.f32 -0.5, %v5375_v8 }
 0x3b0   : > { %4285 = vst [vmem:[%s8388_s8 + $0x1c8] sm:$0xff] %v4222_v49  ;;  %v4089_v50 = vmul.f32 %v5373_v31, %v4088_v14  ;;  %vm4091_vm9 = vcmp.lt.f32.partialorder %v4090_v26, 0.0004427343 }
 0x3b1   : > { %v5377_v63 = vpop.eup %5376  ;;  %5384 = vlog2.f32 %v4093_v21  ;;  %v4080_v35 = vmul.f32 %v5369_v46, %v4079_v57  ;;  %v4097_v25 = vadd.f32 1.0, %v4096_v6 }
 0x3b2   : > { %v4059_v38 = vmul.f32 0.6931472, %v5377_v63 }
 0x3b3   : > { %v4098_v0 = vmul.f32 %v5375_v8, %v4097_v25 }
 0x3b4   : > { %v5379_v4 = vpop.eup %5378  ;;  %v4065_v28 = vsel %vm4064_vm3, %v4062_v44, %v4059_v38 }
 0x3b5   : > { %v4160_v48 = vadd.f32 %v4065_v28, %v3152_v30  ;;  %v4068_v56 = vmul.f32 0.6931472, %v5379_v4 }
 0x3b7   : > { %v5381_v58 = vpop.eup %5380  ;;  %v4223_v27 = vsel %vm3215_vm4, %v9529_v36, %v4160_v48  ;;  %v4074_v33 = vsel %vm4073_vm5, %v4071_v3, %v4068_v56 }
 0x3b8   : > { %4286 = vst [vmem:[%s8388_s8 + $0x1d0] sm:$0xff] %v4223_v27  ;;  %v4161_v11 = vadd.f32 %v4074_v33, %v3153_v20  ;;  %v4077_v54 = vmul.f32 0.6931472, %v5381_v58 }
 0x3ba   : > { %v4224_v13 = vsel %vm3216_vm6, %v9547_v62, %v4161_v11  ;;  %v4083_v42 = vsel %vm4082_vm7, %v4080_v35, %v4077_v54  ;;  %v5383_v12 = vpop.eup %5382  ;;  %v4099_v62 = vand.u32 2147483647, %v5375_v8 }
 0x3bb   : > { %4287 = vst [vmem:[%s8388_s8 + $0x1d8] sm:$0xff] %v4224_v13  ;;  %v4162_v36 = vadd.f32 %v4083_v42, %v3154_v1  ;;  %v4086_v55 = vmul.f32 0.6931472, %v5383_v12 }
 0x3bc   : > { %vm4100_vm11 = vcmp.lt.f32.partialorder %v4099_v62, 0.0004427343 }
 0x3bd   : > { %v4225_v19 = vsel %vm3217_vm8, %v9573_v37, %v4162_v36  ;;  %v4092_v29 = vsel %vm4091_vm9, %v4089_v50, %v4086_v55  ;;  %v3156_v37 = vmax.f32 %v9619_v7, 0.0 }
 0x3be   : > { %4288 = vst [vmem:[%s8388_s8 + $0x1e0] sm:$0xff] %v4225_v19  ;;  %v4163_v43 = vadd.f32 %v4092_v29, %v3155_v61  ;;  %v5385_v17 = vpop.eup %5384 }
 0x3bf   : > { %v4095_v9 = vmul.f32 0.6931472, %v5385_v17 }
 0x3c0   : > { %v4226_v59 = vsel %vm3218_vm10, %v9600_v53, %v4163_v43 }
 0x3c1   : > { %4289 = vst [vmem:[%s8388_s8 + $0x1e8] sm:$0xff] %v4226_v59  ;;  %v4101_v47 = vsel %vm4100_vm11, %v4098_v0, %v4095_v9  ;;  %4298 = sbr.rel (!%p10024_p10) target bundleno = 993 (0x3e1), region = 56 }
 0x3c2   : > { %v4164_v46 = vadd.f32 %v4101_v47, %v3156_v37 }
 0x3c4   : > { %v4227_v51 = vsel %vm3219_vm12, %v9619_v7, %v4164_v46 }
 0x3c5   : > { %4290 = vst [vmem:[%s8388_s8 + $0x1f0] sm:$0xff] %v4227_v51 }
 0x3c6   : > { %s10033_s14 = smov (!%p4301_p1, %s4300_s14), 63 }
 0x3c7   : > { %s9686_s15 = sshll.u32 %s10033_s14, 7 }
 0x3c8   : > { %s4305_s12 = ssub.s32 8064, %s9686_s15 }
 0x3c9   : > { %4306 = vsyncadd %s4292_s11, %s4305_s12  ;;  %p4450_p3 = scmp.ne.s32.totalorder %s9686_s15, 0  ;;  %s4457_s30 = smul.u32 8064, %s5600_s22 }
 0x3ca   : > { %s4311_s29 = sshll.u32 %s8388_s8, 4  ;;  %s5546_s17 = smov [#allocation8]   ;;  %s9699_s29 = int_to_ptr.vmem [resolvable:$true] %s4311_s29 }
 0x3cb   : > { %s9697_s16 = scalar_lea.hbm %s9749_s5, %s4457_s30  ;;  %s5466_s23 = scalar_lea.vmem %s9699_s29, %s9686_s15 }
 0x3cc   : > { %p5467_p7 = scmp.ne.s32.totalorder %s9699_s29, %s5466_s23  ;;  %s5470_s28 = sshll.u32 %s5546_s17, 4  ;;  %s5471_s28 = int_to_ptr.vmem [resolvable:$false] %s5470_s28 }
 0x3cd   : > { %s5472_s22 = scalar_lea.vmem %s5471_s28, 16128  ;;  %p5473_p4 = scmp.lt.s32.totalorder %s9699_s29, %s5471_s28 }
 0x3ce   : > { %p5468_p9 = pnand %p5467_p7, %p4450_p3  ;;  %p5474_p6 = scmp.lt.s32.totalorder %s5472_s22, %s5466_s23 }
 0x3d0   : > { %p5469_p12 = pneg %p5468_p9  ;;  %p5475_p11 = por %p5474_p6, %p5473_p4 }
 0x3d2   : > { %p5476_p0 = pnand %p5475_p11, %p5469_p12 }
 0x3d4   : > { %5479 = shalt.err (!%p5476_p0)
}
 0x3d5   : > { %s5480_s8 = scalar_lea.hbm %s9697_s16, %s9686_s15  ;;  %s5484_s9 = scalar_lea.hbm %s9749_s5, 16000 }
 0x3d6   : > { %p5481_p2 = scmp.ne.s32.totalorder %s9697_s16, %s5480_s8  ;;  %p5485_p10 = scmp.lt.s32.totalorder %s9697_s16, %s9749_s5 }
 0x3d7   : > { %p5486_p1 = scmp.lt.s32.totalorder %s5484_s9, %s5480_s8 }
 0x3d8   : > { %p5482_p5 = pnand %p5481_p2, %p4450_p3 }
 0x3d9   : > { %p5487_p7 = por %p5486_p1, %p5485_p10 }
 0x3da   : > { %p5483_p13 = pneg %p5482_p5 }
 0x3dc   : > { %p5488_p9 = pnand %p5487_p7, %p5483_p13 }
 0x3de   : > { %5491 = shalt.err (!%p5488_p9)
}
 0x3df   : > { %s5547_s30 = smov 128   ;;  %s5548_s7 = smov 8  }
 0x3e0   : > { %4317 = dma.vmem_to_hbm [thread:$0]  (%p4450_p3), %s9699_s29, %s9686_s15, %s9697_s16, %s4292_s11, %s5547_s30, %s5547_s30, %s5548_s7  }
 0x3e1 PF: > { %s4326_s10 = sand.u32 1, %s5522_s18   ;;  %p10025_p12 = scmp.ne.s32.totalorder %s9761_s6, 0 }
 0x3e2   : > { %s4327_s23 = scalar_lea.sflag [#allocation4], %s4326_s10 }
 0x3e3   : > { %p4665_p4 = pnand %p4407_p8, %p10025_p12 }
 0x3e5   : > { %p4666_p6 = pneg %p4665_p4 }
 0x3e7   : > { %5517 = dma.done.wait (%p4666_p6), %s4327_s23, 8064  }
 0x3e8   : > { %5519 = vsyncadd (%p4666_p6), %s4327_s23, 4294959232  ;;  %p19_p11 = scmp.ge.s32.totalorder %s5604_s24, 4   ;;  %s10026_s18 = smov %s5526_s19 }
 0x3e9   : > { %s10027_s19 = smov %s5530_s20  ;;  %s10028_s20 = smov %s5616_s27 }
 0x3ea   : > { %s10029_s21 = smov %s5604_s24  ;;  %21 = sbr.rel (!%p19_p11) target bundleno = 6 (0x6), region = 93 }
 0x3ef   :  { %4332 = vsyncpa [#allocation3], 1 }
 0x3f0   :  { %4334 = vsyncpa [#allocation3 + $0x1], 1 }
 0x3f1   :  { %4335 = vsyncpa [#allocation6], 1 }
 0x3f2   :  { %4336 = vsyncpa [#allocation4], 1 }
 0x3f3   :  { %4338 = vsyncpa [#allocation4 + $0x1], 1 }

</bundles_post_ra>
